<compile_context>
chip_gen: v7x
topology: tpu7x:2x2x1
jax: 0.10.0
libtpu: 0.0.40
codegen_flags: <defaults>
</compile_context>

<pallas_src>
import jax
import jax.numpy as jnp
import numpy as np
from jax.experimental import pallas as pl
from jax.experimental.pallas import tpu as pltpu


def _sine_layer_kernel(x_ref, w_ref, b_ref, o_ref):
    # x_ref: (TILE_N, in_f); w_ref: (in_f, out_f_p) — MXU-native layout,
    # omega_0 already folded into w/b by the wrapper.
    y = jnp.dot(x_ref[...], w_ref[...], preferred_element_type=jnp.float32)
    o_ref[...] = jnp.sin(y + b_ref[...]).astype(o_ref.dtype)


def _round_up(x, m):
    return (x + m - 1) // m * m


def _vmem_capacity_bytes():
    try:
        return int(pltpu.get_tpu_info().vmem_capacity_bytes)
    except Exception:
        # Conservative fallback (v7x per-TC VMEM).
        return 64 * 1024 * 1024


def _choose_tile_n(n, in_f, out_f_p, x_itemsize, out_itemsize, sublane, vmem_cap):
    """Largest sublane-aligned row tile fitting a generation-aware VMEM budget,
    shrunk so the grid has enough steps for megacore + pipelining."""
    # Resident params (constant index_map but still double-buffered by Pallas).
    resident = 2 * (in_f * out_f_p * 4 + out_f_p * 4)
    # Target ~55% of physical VMEM for the kernel's total footprint.
    budget = max(int(vmem_cap * 0.55) - resident, sublane * 1024)
    # Per-row bytes: 2x x tile, 2x out tile (double-buffered) + f32 intermediate.
    per_row = 2 * in_f * x_itemsize + 2 * out_f_p * out_itemsize + out_f_p * 4
    tile = max(sublane, (budget // max(per_row, 1)) // sublane * sublane)
    tile = min(tile, 1024)
    # Ensure >= ~8 grid steps when N permits (>= 2 per TC on v7x), floor 256.
    min_steps_tile = _round_up(pl.cdiv(n, 8), sublane)
    tile = min(tile, max(256, min_steps_tile))
    tile = min(tile, _round_up(n, sublane))
    return int(max(tile, sublane)), resident, per_row


def sine_layer(x, weight, bias, omega_0=30.0, out_dtype=None):
    """x: (N, in_f); weight: (out_f, in_f); bias: (out_f,) — PyTorch layout.

    Computes sin(omega_0 * (x @ weight.T + bias)).
    """
    n, in_f = x.shape
    out_f, _ = weight.shape
    out_dtype = x.dtype if out_dtype is None else out_dtype

    # Lane-dense output: pad out_features up to a multiple of 128.
    out_f_p = _round_up(out_f, 128)

    # One-time parameter prep (tiny): fold omega_0, transpose to MXU-native
    # (in_f, out_f) layout, zero-pad the padded output columns.
    w_t = (jnp.float32(omega_0) * weight.astype(jnp.float32)).T  # (in_f, out_f)
    b2 = (jnp.float32(omega_0) * bias.astype(jnp.float32)).reshape(1, out_f)
    if out_f_p != out_f:
        w_t = jnp.pad(w_t, ((0, 0), (0, out_f_p - out_f)))
        b2 = jnp.pad(b2, ((0, 0), (0, out_f_p - out_f)))

    x_itemsize = jnp.dtype(x.dtype).itemsize
    out_itemsize = jnp.dtype(out_dtype).itemsize
    sublane = max(8, 32 // min(x_itemsize, out_itemsize))  # 8/f32, 16/bf16, 32/int8

    vmem_cap = _vmem_capacity_bytes()
    tile_n, resident, per_row = _choose_tile_n(
        n, in_f, out_f_p, x_itemsize, out_itemsize, sublane, vmem_cap
    )
    grid = (pl.cdiv(n, tile_n),)

    # Scoped-VMEM limit: actual footprint + headroom, capped below physical.
    usage = resident + tile_n * per_row
    vmem_limit = int(min(max(usage * 5 // 4, 32 * 1024 * 1024),
                         vmem_cap * 3 // 4))

    out_p = pl.pallas_call(
        _sine_layer_kernel,
        out_shape=jax.ShapeDtypeStruct((n, out_f_p), out_dtype),
        grid_spec=pltpu.PrefetchScalarGridSpec(
            num_scalar_prefetch=0,
            grid=grid,
            in_specs=[
                # Row tile of x streams through the software pipeline.
                pl.BlockSpec((tile_n, in_f), lambda i: (i, 0)),
                # Weight + bias: same block every step -> resident in VMEM.
                pl.BlockSpec((in_f, out_f_p), lambda i: (0, 0)),
                pl.BlockSpec((1, out_f_p), lambda i: (0, 0)),
            ],
            out_specs=pl.BlockSpec((tile_n, out_f_p), lambda i: (i, 0)),
        ),
        compiler_params=pltpu.CompilerParams(
            # Row tiles are independent: shard across TensorCores on v7x.
            dimension_semantics=("parallel",),
            vmem_limit_bytes=vmem_limit,
        ),
    )(x, w_t, b2)

    if out_f_p != out_f:
        out_p = out_p[:, :out_f]
    return out_p


def init_sine_layer_params(key, in_features, out_features, is_first=False, omega_0=30.0):
    """SIREN-style init matching the PyTorch module's init_weights."""
    kw, kb = jax.random.split(key)
    if is_first:
        bound_w = 1.0 / in_features
    else:
        bound_w = np.sqrt(6.0 / in_features) / omega_0
    weight = jax.random.uniform(
        kw, (out_features, in_features), jnp.float32, -bound_w, bound_w
    )
    # nn.Linear default bias init: U(-1/sqrt(in_features), 1/sqrt(in_features))
    bound_b = 1.0 / np.sqrt(in_features)
    bias = jax.random.uniform(kb, (out_features,), jnp.float32, -bound_b, bound_b)
    return weight, bias


if __name__ == "__main__":
    key = jax.random.PRNGKey(0)
    k_x, k_p = jax.random.split(key)

    # Small shapes that exercise the partial-last-tile path (N=1000) and the
    # out_features lane-padding path (96 -> 128).
    batch = 1000
    in_features = 64
    out_features = 96
    omega_0 = 30.0

    x = jax.random.normal(k_x, (batch, in_features), jnp.float32)
    weight, bias = init_sine_layer_params(
        k_p, in_features, out_features, is_first=False, omega_0=omega_0
    )

    out = sine_layer(x, weight, bias, omega_0=omega_0)
    out = jax.block_until_ready(out)

    # Reference check in plain JAX (PyTorch semantics: sin(w0 * (x @ W.T + b))).
    ref = jnp.sin(omega_0 * (x @ weight.T + bias))
    np.testing.assert_allclose(np.asarray(out), np.asarray(ref), rtol=1e-5, atol=1e-4)
    assert out.shape == (batch, out_features)

    print("KERNEL_OK")
</pallas_src>

<mosaic_0001>
module attributes {stable_mosaic.version = 11 : i64} {
  func.func @_sine_layer_kernel(%arg0: i32, %arg1: memref<256x64xf32, #tpu.memory_space<vmem>>, %arg2: memref<64x128xf32, #tpu.memory_space<vmem>>, %arg3: memref<1x128xf32, #tpu.memory_space<vmem>>, %arg4: memref<256x128xf32, #tpu.memory_space<vmem>>) attributes {dimension_semantics = [#tpu.dimension_semantics<parallel>], iteration_bounds = array<i64: 4>, scalar_prefetch = 0 : i64, scratch_operands = 0 : i64, tpu.core_type = #tpu.core_type<tc>, window_params = [{transform_indices = @transform_0, window_bounds = array<i64: 256, 64>}, {pipeline_mode = #tpu.pipeline_mode<synchronous>, transform_indices = @transform_1, window_bounds = array<i64: 64, 128>}, {pipeline_mode = #tpu.pipeline_mode<synchronous>, transform_indices = @transform_2, window_bounds = array<i64: 1, 128>}, {transform_indices = @transform_3, window_bounds = array<i64: 256, 128>}]} {
    %c0 = arith.constant 0 : index
    %c0_0 = arith.constant 0 : index
    %0 = vector.load %arg1[%c0, %c0_0] : memref<256x64xf32, #tpu.memory_space<vmem>>, vector<256x64xf32>
    %c0_1 = arith.constant 0 : index
    %c0_2 = arith.constant 0 : index
    %1 = vector.load %arg2[%c0_1, %c0_2] : memref<64x128xf32, #tpu.memory_space<vmem>>, vector<64x128xf32>
    %cst = arith.constant dense<0.000000e+00> : vector<256x128xf32>
    %2 = tpu.matmul %0, %1, %cst {dimension_numbers = #tpu.dot_dimension_numbers<[1], [0], [0], [1], [0, 0, 1, 1], [], []>} : vector<256x64xf32>, vector<64x128xf32>, vector<256x128xf32> -> vector<256x128xf32>
    %c0_3 = arith.constant 0 : index
    %c0_4 = arith.constant 0 : index
    %3 = vector.load %arg3[%c0_3, %c0_4] : memref<1x128xf32, #tpu.memory_space<vmem>>, vector<1x128xf32>
    %4 = vector.broadcast %3 : vector<1x128xf32> to vector<256x128xf32>
    %5 = arith.addf %2, %4 : vector<256x128xf32>
    %6 = math.sin %5 : vector<256x128xf32>
    %c0_5 = arith.constant 0 : index
    %c0_6 = arith.constant 0 : index
    %7 = vector.load %arg4[%c0_5, %c0_6] : memref<256x128xf32, #tpu.memory_space<vmem>>, vector<256x128xf32>
    tpu.vector_store %arg4[%c0_5, %c0_6], %6 {strides = array<i32>} : memref<256x128xf32, #tpu.memory_space<vmem>>, vector<256x128xf32>,
    return
  }
  func.func @transform_0(%arg0: i32) -> (i32, i32) {
    %c0_i32 = arith.constant 0 : i32
    %c0_i32_0 = arith.constant 0 : i32
    return %arg0, %c0_i32 : i32, i32
  }
  func.func @transform_1(%arg0: i32) -> (i32, i32) {
    %c0_i32 = arith.constant 0 : i32
    %c0_i32_0 = arith.constant 0 : i32
    %c0_i32_1 = arith.constant 0 : i32
    return %c0_i32, %c0_i32_0 : i32, i32
  }
  func.func @transform_2(%arg0: i32) -> (i32, i32) {
    %c0_i32 = arith.constant 0 : i32
    %c0_i32_0 = arith.constant 0 : i32
    %c0_i32_1 = arith.constant 0 : i32
    return %c0_i32, %c0_i32_0 : i32, i32
  }
  func.func @transform_3(%arg0: i32) -> (i32, i32) {
    %c0_i32 = arith.constant 0 : i32
    %c0_i32_0 = arith.constant 0 : i32
    return %arg0, %c0_i32 : i32, i32
  }
}

</mosaic_0001>

<bundles_post_ra>
// kernel: tpu_custom_call.1
= control target key start
LH: loop header
LB: loop body
LE: loop exit
PB: predicated region body
PF: predicated region fallthrough
CT: control target
= control target key end

     0   :  { %8 = vsyncpa [#allocation3], 0  ;;  %s7594_s0 = inlined_call_operand.vmem [shape: f32[1000,64], index: 0, kind: input, shape index: {}]   ;;  %s7595_s1 = inlined_call_operand.vmem [shape: f32[64,128], index: 1, kind: input, shape index: {}]   ;;  %s7596_s2 = inlined_call_operand.vmem [shape: f32[1,128], index: 2, kind: input, shape index: {}]   ;;  %s7597_s3 = inlined_call_operand.hbm [shape: f32[1000,128], index: 3, kind: output, shape index: {}]  }
   0x1   :  { %10 = vsyncpa [#allocation3 + $0x1], 0  ;;  %s4713_s12 = smov 0   ;;  %s4715_s13 = smov 0  }
   0x2   :  { %s4717_s14 = smov 0   ;;  %s4719_s15 = smov 0  }
   0x3 LB: > { %s4734_s16 = sadd.s32 4294967295, %s4682_s15   ;;  %s4007_s17 = sadd.s32 4294967294, %s4682_s15   ;;  %s4682_s15 = sphi %s4719_s15, %s7663_s15   ;;  %s4678_s14 = sphi %s4717_s14, %s7662_s14   ;;  %s4674_s13 = sphi %s4715_s13, %s7661_s13   ;;  %s4670_s12 = sphi %s4713_s12, %s7660_s12  }
   0x4   : > { %s4738_s18 = sadd.s32 1, %s4682_s15   ;;  %s91_s19 = sadd.s32 1, %s4678_s14 }
   0x5   : > { %s88_s20 = ssub.s32 %s4682_s15, %s4738_s18  ;;  %p101_p0 = scmp.ne.s32.totalorder %s4678_s14, %s4674_s13 }
   0x6   : > { %p89_p1 = scmp.eq.s32.totalorder %s88_s20, 0  ;;  %p102_p2 = scmp.eq.s32.totalorder %s4734_s16, 3 }
   0x7   : > { %p107_p3 = scmp.ne.s32.totalorder %s4674_s13, %s4670_s12  ;;  %p108_p4 = scmp.eq.s32.totalorder %s4007_s17, 3 }
   0x8   : > { %s4749_s21 = scalar_select %p89_p1, %s4678_s14, %s91_s19  }
   0x9   : > { %p4751_p5 = por %p102_p2, %p101_p0  ;;  %p4755_p6 = por %p108_p4, %p107_p3 }
   0xa   : > { %p4010_p7 = scmp.ge.s32.totalorder %s4682_s15, 1  ;;  %p149_p8 = scmp.lt.s32.totalorder %s4682_s15, 5 }
   0xc   : > { %p150_p9 = pnand %p4010_p7, %p149_p8 }
   0xd   : > { %v228_v0 = vld [vmem:[%s7595_s1] sm:$0xff] (!%p150_p9)  ;;  %v229_v1 = vld [vmem:[%s7595_s1 + $0x8] sm:$0xff] (!%p150_p9)  ;;  %v230_v2 = vld [vmem:[%s7595_s1 + $0x10] sm:$0xff] (!%p150_p9)  ;;  %s4771_s30 = sshll.u32 (!%p150_p9), %s4734_s16, 5  ;;  %vm243_vm0 = vcmask (!%p150_p9), 523264   ;;  %s174_s28 = sand.u32 (!%p150_p9), 1, %s4674_s13  }
   0xe   : > { %153 = sbr.rel (%p150_p9) target bundleno = 1103 (0x44f), region = 32  ;;  %v4289_v3 = vpack.c.bf16 (!%p150_p9), %v229_v1, %v228_v0  ;;  %v231_v4 = vld [vmem:[%s7595_s1 + $0x18] sm:$0xff] (!%p150_p9)  ;;  %p182_p10 = scmp.lt.s32.totalorder (!%p150_p9), %s4771_s30, 124  ;;  %v232_v6 = vld [vmem:[%s7595_s1 + $0x20] sm:$0xff] (!%p150_p9)  ;;  %v233_v7 = vld [vmem:[%s7595_s1 + $0x28] sm:$0xff] (!%p150_p9) }
   0xf   : > { %v4293_v5 = vpack.c.bf16 (!%p150_p9), %v231_v4, %v230_v2  ;;  %v4297_v8 = vpack.c.bf16 (!%p150_p9), %v233_v7, %v232_v6  ;;  %v234_v9 = vld [vmem:[%s7595_s1 + $0x30] sm:$0xff] (!%p150_p9)  ;;  %v235_v10 = vld [vmem:[%s7595_s1 + $0x38] sm:$0xff] (!%p150_p9)  ;;  %v4863_v44 = vld [vmem:[%s7596_s2] ss:$0 sm:$0xff] (!%p150_p9)  ;;  %s4011_s5 = sshll.u32 (!%p150_p9), %s174_s28, 8  ;;  %s7533_s26 = scalar_lea.sflag (!%p150_p9), [#allocation3], %s174_s28 }
  0x10   : > { %4290 = vmatprep.subr.bf16.mxu0 (!%p150_p9), %v4289_v3  ;;  %4305 = vmatprep.subr.bf16.mxu1 (!%p150_p9), %v4289_v3  ;;  %v4301_v13 = vpack.c.bf16 (!%p150_p9), %v235_v10, %v234_v9  ;;  %s5180_s6 = scalar_lea.vmem (!%p150_p9), [#allocation2], %s4011_s5 }
  0x11   : > { %4292 = vmatpush3.bf16.msra.mxu0 (!%p150_p9), %v4289_v3  ;;  %4309 = vmatpush3.bf16.msra.mxu1 (!%p150_p9), %v4289_v3 }
  0x12   : > { %4294 = vmatprep.subr.bf16.mxu0 (!%p150_p9), %v4293_v5  ;;  %4306 = vmatprep.subr.bf16.mxu1 (!%p150_p9), %v4293_v5 }
  0x15   : > { %s183_s10 = scalar_select %p182_p10, %s4771_s30, 124  ;;  %4296 = vmatpush3.bf16.msra.mxu0 %v4293_v5  ;;  %4310 = vmatpush3.bf16.msra.mxu1 %v4293_v5 }
  0x16   : > { %4298 = vmatprep.subr.bf16.mxu0 %v4297_v8  ;;  %4307 = vmatprep.subr.bf16.mxu1 %v4297_v8 }
  0x17   : > { %s4013_s11 = sshll.u32 %s183_s10, 3 }
  0x18   : > { %s4793_s27 = scalar_lea.vmem %s7594_s0, %s4013_s11 }
  0x19   : > { %v196_v11 = vld [vmem:[%s4793_s27] sm:$0xff]  ;;  %4300 = vmatpush3.bf16.msra.mxu0 %v4297_v8  ;;  %4311 = vmatpush3.bf16.msra.mxu1 %v4297_v8  ;;  %v197_v14 = vld [vmem:[%s4793_s27 + $0x8] sm:$0xff]  ;;  %v198_v16 = vld [vmem:[%s4793_s27 + $0x10] sm:$0xff] }
  0x1a   : > { %v212_v12 = vld [vmem:[%s4793_s27 + $0x80] sm:$0xff]  ;;  %4241 = vmatprep.mubr.msk.f32.mxu0 %vm243_vm0, %v196_v11  ;;  %4302 = vmatprep.subr.bf16.mxu0 %v4301_v13  ;;  %v213_v15 = vld [vmem:[%s4793_s27 + $0x88] sm:$0xff]  ;;  %v214_v17 = vld [vmem:[%s4793_s27 + $0x90] sm:$0xff] }
  0x1b   : > { %4265 = vmatprep.mubr.msk.f32.mxu1 %vm243_vm0, %v212_v12  ;;  %4308 = vmatprep.subr.bf16.mxu1 %v4301_v13  ;;  %v199_v18 = vld [vmem:[%s4793_s27 + $0x18] sm:$0xff]  ;;  %v200_v20 = vld [vmem:[%s4793_s27 + $0x20] sm:$0xff]  ;;  %v201_v22 = vld [vmem:[%s4793_s27 + $0x28] sm:$0xff] }
  0x1c   : > { %v215_v19 = vld [vmem:[%s4793_s27 + $0x98] sm:$0xff]  ;;  %v216_v21 = vld [vmem:[%s4793_s27 + $0xa0] sm:$0xff]  ;;  %v217_v23 = vld [vmem:[%s4793_s27 + $0xa8] sm:$0xff] }
  0x1d   : > { %4304 = vmatpush3.bf16.msra.mxu0 %v4301_v13  ;;  %4312 = vmatpush3.bf16.msra.mxu1 %v4301_v13  ;;  %v202_v24 = vld [vmem:[%s4793_s27 + $0x30] sm:$0xff]  ;;  %v203_v26 = vld [vmem:[%s4793_s27 + $0x38] sm:$0xff]  ;;  %v204_v28 = vld [vmem:[%s4793_s27 + $0x40] sm:$0xff] }
  0x1e   : > { %v218_v25 = vld [vmem:[%s4793_s27 + $0xb0] sm:$0xff]  ;;  %v219_v27 = vld [vmem:[%s4793_s27 + $0xb8] sm:$0xff]  ;;  %v220_v29 = vld [vmem:[%s4793_s27 + $0xc0] sm:$0xff] }
  0x1f   : > { %v205_v30 = vld [vmem:[%s4793_s27 + $0x48] sm:$0xff]  ;;  %v206_v32 = vld [vmem:[%s4793_s27 + $0x50] sm:$0xff]  ;;  %v207_v34 = vld [vmem:[%s4793_s27 + $0x58] sm:$0xff] }
  0x20   : > { %4242 = vmatmul.mubr.msk.f32.vlgmr.msra.gmra.mrb[0].mxu0 %vm243_vm0, %v197_v14  ;;  %4266 = vmatmul.mubr.msk.f32.vlgmr.msra.gmra.mrb[0].mxu1 %vm243_vm0, %v213_v15  ;;  %v221_v31 = vld [vmem:[%s4793_s27 + $0xc8] sm:$0xff]  ;;  %v222_v33 = vld [vmem:[%s4793_s27 + $0xd0] sm:$0xff]  ;;  %v223_v35 = vld [vmem:[%s4793_s27 + $0xd8] sm:$0xff] }
  0x21   : > { %4244 = vmatprep.mubr.msk.f32.mxu0 %vm243_vm0, %v198_v16  ;;  %4268 = vmatprep.mubr.msk.f32.mxu1 %vm243_vm0, %v214_v17  ;;  %v208_v36 = vld [vmem:[%s4793_s27 + $0x60] sm:$0xff]  ;;  %v209_v38 = vld [vmem:[%s4793_s27 + $0x68] sm:$0xff]  ;;  %v210_v40 = vld [vmem:[%s4793_s27 + $0x70] sm:$0xff] }
  0x22   : > { %v224_v37 = vld [vmem:[%s4793_s27 + $0xe0] sm:$0xff]  ;;  %v225_v39 = vld [vmem:[%s4793_s27 + $0xe8] sm:$0xff]  ;;  %v226_v41 = vld [vmem:[%s4793_s27 + $0xf0] sm:$0xff] }
  0x23   : > { %v211_v42 = vld [vmem:[%s4793_s27 + $0x78] sm:$0xff] }
  0x24   : > { %4245 = vmatmul.mubr.msk.f32.gmra.mrb[2].mxu0 %vm243_vm0, %v199_v18  ;;  %4269 = vmatmul.mubr.msk.f32.gmra.mrb[2].mxu1 %vm243_vm0, %v215_v19  ;;  %v227_v43 = vld [vmem:[%s4793_s27 + $0xf8] sm:$0xff]  ;;  %s3934_s27 = ssub.s32 (%p4751_p5), 125, %s4771_s30 }
  0x25   : > { %4247 = vmatprep.mubr.msk.f32.mxu0 %vm243_vm0, %v200_v20  ;;  %4271 = vmatprep.mubr.msk.f32.mxu1 %vm243_vm0, %v216_v21  ;;  %v4684_v21 = vmov 683565275   ;;  %p3935_p11 = scmp.lt.s32.totalorder (%p4751_p5), %s3934_s27, 32 }
  0x28   : > { %4248 = vmatmul.mubr.msk.f32.gmra.mrb[4].mxu0 %vm243_vm0, %v201_v22  ;;  %4272 = vmatmul.mubr.msk.f32.gmra.mrb[4].mxu1 %vm243_vm0, %v217_v23 }
  0x29   : > { %4250 = vmatprep.mubr.msk.f32.mxu0 %vm243_vm0, %v202_v24  ;;  %4274 = vmatprep.mubr.msk.f32.mxu1 %vm243_vm0, %v218_v25  ;;  %v4685_v25 = vmov 2475754826  }
  0x2c   : > { %4251 = vmatmul.mubr.msk.f32.gmra.mrb[6].mxu0 %vm243_vm0, %v203_v26  ;;  %4275 = vmatmul.mubr.msk.f32.gmra.mrb[6].mxu1 %vm243_vm0, %v219_v27  ;;  %v4686_v27 = vmov 2131351028  }
  0x2d   : > { %4253 = vmatprep.mubr.msk.f32.mxu0 %vm243_vm0, %v204_v28  ;;  %4277 = vmatprep.mubr.msk.f32.mxu1 %vm243_vm0, %v220_v29  ;;  %v4687_v29 = vmov 2102212464  }
  0x30   : > { %4254 = vmatmul.mubr.msk.f32.gmra.mrb[8].mxu0 %vm243_vm0, %v205_v30  ;;  %4278 = vmatmul.mubr.msk.f32.gmra.mrb[8].mxu1 %vm243_vm0, %v221_v31  ;;  %v4688_v31 = vmov 920167782  }
  0x31   : > { %4256 = vmatprep.mubr.msk.f32.mxu0 %vm243_vm0, %v206_v32  ;;  %4280 = vmatprep.mubr.msk.f32.mxu1 %vm243_vm0, %v222_v33 }
  0x34   : > { %4257 = vmatmul.mubr.msk.f32.gmra.mrb[10].mxu0 %vm243_vm0, %v207_v34  ;;  %4281 = vmatmul.mubr.msk.f32.gmra.mrb[10].mxu1 %vm243_vm0, %v223_v35 }
  0x35   : > { %4259 = vmatprep.mubr.msk.f32.mxu0 %vm243_vm0, %v208_v36  ;;  %4283 = vmatprep.mubr.msk.f32.mxu1 %vm243_vm0, %v224_v37 }
  0x38   : > { %4260 = vmatmul.mubr.msk.f32.gmra.mrb[12].mxu0 %vm243_vm0, %v209_v38  ;;  %4284 = vmatmul.mubr.msk.f32.gmra.mrb[12].mxu1 %vm243_vm0, %v225_v39  ;;  %v4689_v38 = vmov 1326507024  }
  0x39   : > { %4262 = vmatprep.mubr.msk.f32.mxu0 %vm243_vm0, %v210_v40  ;;  %4286 = vmatprep.mubr.msk.f32.mxu1 %vm243_vm0, %v226_v41 }
  0x3c   : > { %4263 = vmatmul.mubr.msk.f32.gmra.mrb[14].mxu0 %vm243_vm0, %v211_v42  ;;  %4287 = vmatmul.mubr.msk.f32.gmra.mrb[14].mxu1 %vm243_vm0, %v227_v43 }
  0xf3   : > { %v4243_v45 = vpop.f32.mrb[0].mxu0  ;;  %v4267_v46 = vpop.f32.mrb[0].mxu1 }
  0xf4   : > { %v4866_v47 = vadd.f32 %v4243_v45, %v4863_v44  ;;  %v4869_v48 = vadd.f32 %v4267_v46, %v4863_v44  ;;  %v406_v49 = vpop.f32.mrb[1].mxu0  ;;  %v486_v50 = vpop.f32.mrb[1].mxu1 }
  0xf5   : > { %v4872_v51 = vadd.f32 %v4863_v44, %v406_v49  ;;  %v4890_v5 = vadd.f32 %v4863_v44, %v486_v50 }
  0xf6   : > { %v669_v52 = vand.u32 2147483647, %v4866_v47  ;;  %v672_v53 = vand.u32 2139095040, %v4866_v47  ;;  %v2333_v54 = vand.u32 2147483647, %v4869_v48  ;;  %v2336_v55 = vand.u32 2139095040, %v4869_v48 }
  0xf7   : > { %v4878_v56 = vpop.f32.mrb[2].mxu0  ;;  %v4880_v57 = vpop.f32.mrb[2].mxu1  ;;  %v568_v62 = vand.u32 2139095040, %v4872_v51  ;;  %v565_v8 = vand.u32 2147483647, %v4872_v51  ;;  %v2232_v19 = vand.u32 2139095040, %v4890_v5 }
  0xf8   : > { %v673_v58 = vshrl.u32 %v672_v53, 23  ;;  %v676_v59 = vand.u32 8388607, %v669_v52  ;;  %v2337_v60 = vshrl.u32 %v2336_v55, 23  ;;  %v2340_v61 = vand.u32 8388607, %v2333_v54 }
  0xf9   : > { %v4887_v0 = vpop.f32.mrb[3].mxu0  ;;  %v569_v2 = vshrl.u32 %v568_v62, 23  ;;  %v4893_v10 = vpop.f32.mrb[3].mxu1  ;;  %v4901_v17 = vand.u32 8388607, %v565_v8  ;;  %vm671_vm14 = vcmp.lt.s32.totalorder %v4866_v47, 0 }
  0xfa   : > { %v4051_v63 = vadd.s32 4294967169, %v673_v58  ;;  %v4115_v1 = vadd.s32 4294967169, %v2337_v60  ;;  %v677_v3 = vor.u32 8388608, %v676_v59  ;;  %v2341_v6 = vor.u32 8388608, %v2340_v61 }
  0xfb   : > { %v4047_v9 = vadd.s32 4294967169, %v569_v2  ;;  %vm4993_vm15 = vcmp.le.f32.partialorder %v669_v52, 0.7853982 }
  0xfc   : > { %v679_v4 = vadd.s32 1, %v4051_v63  ;;  %v2343_v7 = vadd.s32 1, %v4115_v1  ;;  %v4895_v14 = vshll.u32 %v677_v3, 8  ;;  %v4897_v16 = vshll.u32 %v2341_v6, 8 }
  0xfd   : > { %v4903_v18 = vadd.s32 1, %v4047_v9 }
  0xfe   : > { %vm680_vm1 = vcmp.gt.s32.totalorder %v679_v4, 0  ;;  %vm2344_vm2 = vcmp.gt.s32.totalorder %v2343_v7, 0 }
  0xff   : > { %v681_v11 = vsel %vm680_vm1, %v679_v4, 0  ;;  %v2345_v15 = vsel %vm2344_vm2, %v2343_v7, 0  ;;  %vm576_vm7 = vcmp.gt.s32.totalorder %v4903_v18, 0 }
 0x100   : > { %v682_v12 = vshrl.u32 %v681_v11, 5  ;;  %v683_v13 = vand.u32 31, %v681_v11  ;;  %v4907_v23 = vshrl.u32 %v2345_v15, 5  ;;  %v2347_v24 = vand.u32 31, %v2345_v15 }
 0x102   : > { %v684_v20 = vsub.s32 32, %v683_v13  ;;  %v686_v22 = vshll.u32 %v4684_v21, %v683_v13  ;;  %v689_v26 = vshll.u32 %v4685_v25, %v683_v13  ;;  %v692_v28 = vshll.u32 %v4686_v27, %v683_v13 }
 0x103   : > { %v695_v30 = vshll.u32 %v4687_v29, %v683_v13  ;;  %v698_v32 = vshll.u32 %v4688_v31, %v683_v13  ;;  %vm701_vm3 = vcmp.lt.s32.totalorder %v682_v12, 1  ;;  %vm702_vm4 = vcmp.lt.s32.totalorder %v682_v12, 2 }
 0x104   : > { %v687_v33 = vshrl.u32 %v4685_v25, %v684_v20  ;;  %v690_v34 = vshrl.u32 %v4686_v27, %v684_v20  ;;  %v693_v35 = vshrl.u32 %v4687_v29, %v684_v20  ;;  %v685_v36 = vshrl.u32 %v4684_v21, %v684_v20 }
 0x105   : > { %v696_v37 = vshrl.u32 %v4688_v31, %v684_v20  ;;  %v699_v39 = vshrl.u32 %v4689_v38, %v684_v20  ;;  %v2348_v43 = vsub.s32 32, %v2347_v24  ;;  %vm703_vm5 = vcmp.lt.s32.totalorder %v682_v12, 3 }
 0x106   : > { %v688_v40 = vor.u32 %v687_v33, %v686_v22  ;;  %v691_v41 = vor.u32 %v690_v34, %v689_v26  ;;  %v694_v42 = vor.u32 %v693_v35, %v692_v28  ;;  %vm704_vm6 = vcmp.lt.s32.totalorder %v682_v12, 4 }
 0x107   : > { %v697_v45 = vor.u32 %v696_v37, %v695_v30  ;;  %v700_v46 = vor.u32 %v699_v39, %v698_v32  ;;  %v2350_v61 = vshll.u32 %v4684_v21, %v2347_v24  ;;  %v2351_v1 = vshrl.u32 %v4685_v25, %v2348_v43 }
 0x108   : > { %v705_v49 = vsel %vm701_vm3, %v685_v36, %v688_v40  ;;  %v706_v50 = vsel %vm704_vm6, %v694_v42, 2102212464  ;;  %v709_v53 = vsel %vm701_vm3, %v688_v40, %v691_v41  ;;  %v713_v55 = vsel %vm701_vm3, %v691_v41, %v694_v42 }
 0x109   : > { %v707_v58 = vsel %vm703_vm5, %v691_v41, %v706_v50  ;;  %v710_v59 = vsel %vm704_vm6, %v697_v45, 920167782  ;;  %v714_v60 = vsel %vm704_vm6, %v700_v46, 1326507024  ;;  %v2353_v2 = vshll.u32 %v4685_v25, %v2347_v24 }
 0x10a   : > { %v711_v62 = vsel %vm703_vm5, %v694_v42, %v710_v59  ;;  %v715_v63 = vsel %vm703_vm5, %v697_v45, %v714_v60  ;;  %v708_v3 = vsel %vm702_vm4, %v705_v49, %v707_v58  ;;  %v2354_v7 = vshrl.u32 %v4686_v27, %v2348_v43 }
 0x10b   : > { %v712_v4 = vsel %vm702_vm4, %v709_v53, %v711_v62  ;;  %v716_v6 = vsel %vm702_vm4, %v713_v55, %v715_v63  ;;  %v2352_v20 = vor.u32 %v2351_v1, %v2350_v61  ;;  %v2356_v26 = vshll.u32 %v4686_v27, %v2347_v24 }
 0x10c   : > { %v4931_v9 = vmul.u32.u64.low %v4895_v14, %v716_v6  ;;  %v4932_v11 = vmul.u32.u64.high %v4895_v14, %v716_v6, %v4931_v9  ;;  %v4935_v13 = vmul.u32.u64.low %v4895_v14, %v712_v4  ;;  %v4936_v15 = vmul.u32.u64.high %v4895_v14, %v712_v4, %v4935_v13 }
 0x10d   : > { %v2355_v22 = vor.u32 %v2354_v7, %v2353_v2  ;;  %v2357_v28 = vshrl.u32 %v4687_v29, %v2348_v43  ;;  %v2349_v30 = vshrl.u32 %v4684_v21, %v2348_v43  ;;  %v2359_v12 = vshll.u32 %v4687_v29, %v2347_v24 }
 0x10e   : > { %v2360_v32 = vshrl.u32 %v4688_v31, %v2348_v43  ;;  %v2363_v33 = vshrl.u32 %v4689_v38, %v2348_v43  ;;  %v724_v34 = vmul.u32 %v4895_v14, %v708_v3  ;;  %v2362_v36 = vshll.u32 %v4688_v31, %v2347_v24 }
 0x10f   : > { %v2358_v35 = vor.u32 %v2357_v28, %v2356_v26  ;;  %vm2365_vm8 = vcmp.lt.s32.totalorder %v4907_v23, 1  ;;  %vm726_vm9 = vc.u32 %v4932_v11, %v4935_v13  ;;  %v727_v37 = vadd.s32 1, %v4936_v15  ;;  %v4976_v26 = vpop.f32.mrb[4].mxu0 }
 0x110   : > { %v2361_v39 = vor.u32 %v2360_v32, %v2359_v12  ;;  %vm2366_vm10 = vcmp.lt.s32.totalorder %v4907_v23, 2  ;;  %v2364_v40 = vor.u32 %v2363_v33, %v2362_v36  ;;  %vm2367_vm11 = vcmp.lt.s32.totalorder %v4907_v23, 3 }
 0x111   : > { %vm2368_vm12 = vcmp.lt.s32.totalorder %v4907_v23, 4  ;;  %v2373_v41 = vsel %vm2365_vm8, %v2352_v20, %v2355_v22  ;;  %v728_v14 = vsel %vm726_vm9, %v727_v37, %v4936_v15  ;;  %v2377_v24 = vsel %vm2365_vm8, %v2355_v22, %v2358_v35 }
 0x112   : > { %v2370_v42 = vsel %vm2368_vm12, %v2358_v35, 2102212464  ;;  %v2374_v43 = vsel %vm2368_vm12, %v2361_v39, 920167782  ;;  %v729_v45 = vadd.s32 %v728_v14, %v724_v34  ;;  %v2369_v46 = vsel %vm2365_vm8, %v2349_v30, %v2352_v20 }
 0x113   : > { %v2375_v49 = vsel %vm2367_vm11, %v2358_v35, %v2374_v43  ;;  %v2378_v50 = vsel %vm2368_vm12, %v2364_v40, 1326507024  ;;  %v2371_v53 = vsel %vm2367_vm11, %v2355_v22, %v2370_v42  ;;  %v577_v59 = vsel %vm576_vm7, %v4903_v18, 0 }
 0x114   : > { %v2376_v55 = vsel %vm2366_vm10, %v2373_v41, %v2375_v49  ;;  %v2379_v58 = vsel %vm2367_vm11, %v2361_v39, %v2378_v50  ;;  %v730_v60 = vadd.s32 536870912, %v729_v45  ;;  %v2229_v3 = vand.u32 2147483647, %v4890_v5 }
 0x115   : > { %v2380_v61 = vsel %vm2366_vm10, %v2377_v24, %v2379_v58  ;;  %v4961_v62 = vmul.u32.u64.low %v4897_v16, %v2376_v55  ;;  %v4962_v63 = vmul.u32.u64.high %v4897_v16, %v2376_v55, %v4961_v62  ;;  %v2372_v6 = vsel %vm2366_vm10, %v2369_v46, %v2371_v53 }
 0x116   : > { %v4966_v1 = vmul.u32.u64.low %v4897_v16, %v2380_v61  ;;  %v4967_v2 = vmul.u32.u64.high %v4897_v16, %v2380_v61, %v4966_v1  ;;  %v731_v4 = vshrl.u32 %v730_v60, 30  ;;  %v573_v18 = vor.u32 8388608, %v4901_v17 }
 0x117   : > { %v579_v7 = vand.u32 31, %v577_v59  ;;  %v2391_v15 = vadd.s32 1, %v4962_v63  ;;  %v2233_v22 = vshrl.u32 %v2232_v19, 23  ;;  %v2388_v28 = vmul.u32 %v4897_v16, %v2372_v6 }
 0x118   : > { %v732_v9 = vshll.u32 %v731_v4, 30  ;;  %vm2390_vm13 = vc.u32 %v4967_v2, %v4961_v62  ;;  %v4983_v23 = vand.u32 8388607, %v2229_v3  ;;  %v4989_v12 = vshll.u32 %v573_v18, 8 }
 0x119   : > { %v580_v20 = vsub.s32 32, %v579_v7  ;;  %v2392_v30 = vsel %vm2390_vm13, %v2391_v15, %v4962_v63  ;;  %v725_v16 = vadd.s32 %v4935_v13, %v4932_v11  ;;  %v4998_v33 = vshrl.u32 %v577_v59, 5 }
 0x11a   : > { %v4986_v17 = vsub.s32 %v729_v45, %v732_v9  ;;  %v2393_v32 = vadd.s32 %v2392_v30, %v2388_v28  ;;  %v4111_v39 = vadd.s32 4294967169, %v2233_v22  ;;  %v755_v40 = vsub.s32 4, %v731_v4 }
 0x11b   : > { %v583_v34 = vshrl.u32 %v4685_v25, %v580_v20  ;;  %v586_v36 = vshrl.u32 %v4686_v27, %v580_v20  ;;  %v589_v37 = vshrl.u32 %v4687_v29, %v580_v20  ;;  %v582_v52 = vshll.u32 %v4684_v21, %v579_v7 }
 0x11c   : > { %v735_v35 = vsub.s32 0, %v4986_v17  ;;  %v2394_v41 = vadd.s32 536870912, %v2393_v32  ;;  %v2237_v14 = vor.u32 8388608, %v4983_v23  ;;  %v585_v13 = vshll.u32 %v4685_v25, %v579_v7 }
 0x11d   : > { %v588_v42 = vshll.u32 %v4686_v27, %v579_v7  ;;  %v592_v43 = vshrl.u32 %v4688_v31, %v580_v20  ;;  %v584_v45 = vor.u32 %v583_v34, %v582_v52  ;;  %v591_v46 = vshll.u32 %v4687_v29, %v579_v7 }
 0x11e   : > { %v4052_v11 = vmin.u32 %v735_v35, %v4986_v17  ;;  %v2395_v24 = vshrl.u32 %v2394_v41, 30  ;;  %v595_v49 = vshrl.u32 %v4689_v38, %v580_v20  ;;  %v587_v53 = vor.u32 %v586_v36, %v585_v13 }
 0x11f   : > { %v590_v55 = vor.u32 %v589_v37, %v588_v42  ;;  %v594_v58 = vshll.u32 %v4688_v31, %v579_v7  ;;  %v756_v59 = vsel %vm671_vm14, %v755_v40, %v731_v4  ;;  %v593_v61 = vor.u32 %v592_v43, %v591_v46 }
 0x120   : > { %v737_v50 = vclz %v4052_v11  ;;  %v2396_v60 = vshll.u32 %v2395_v24, 30  ;;  %vm597_vm0 = vcmp.lt.s32.totalorder %v4998_v33, 1  ;;  %vm598_vm1 = vcmp.lt.s32.totalorder %v4998_v33, 2 }
 0x121   : > { %v596_v1 = vor.u32 %v595_v49, %v594_v58  ;;  %vm600_vm2 = vcmp.lt.s32.totalorder %v4998_v33, 4  ;;  %vm2335_vm3 = vcmp.lt.s32.totalorder %v4869_v48, 0  ;;  %v581_v18 = vshrl.u32 %v4684_v21, %v580_v20 }
 0x122   : > { %v4053_v63 = vadd.s32 4294967294, %v737_v50  ;;  %v5019_v6 = vsub.s32 %v2393_v32, %v2396_v60  ;;  %vm599_vm4 = vcmp.lt.s32.totalorder %v4998_v33, 3  ;;  %v606_v4 = vsel %vm600_vm2, %v593_v61, 920167782 }
 0x123   : > { %v758_v7 = vsel %vm4993_vm15, 0, %v756_v59  ;;  %v605_v9 = vsel %vm597_vm0, %v584_v45, %v587_v53  ;;  %v607_v15 = vsel %vm599_vm4, %v590_v55, %v606_v4  ;;  %v2419_v30 = vsub.s32 4, %v2395_v24 }
 0x124   : > { %vm4054_vm5 = vcmp.lt.s32.totalorder %v4053_v63, 0  ;;  %v2399_v28 = vsub.s32 0, %v5019_v6  ;;  %v609_v20 = vsel %vm597_vm0, %v587_v53, %v590_v55  ;;  %vm5036_vm6 = vcmp.le.f32.partialorder %v2333_v54, 0.7853982 }
 0x125   : > { %v740_v22 = vsel %vm4054_vm5, 0, %v4053_v63  ;;  %v602_v36 = vsel %vm600_vm2, %v590_v55, 2102212464  ;;  %v610_v37 = vsel %vm600_vm2, %v596_v1, 1326507024  ;;  %v608_v52 = vsel %vm598_vm1, %v605_v9, %v607_v15  ;;  %v5056_v55 = vpop.f32.mrb[4].mxu1 }
 0x126   : > { %v741_v32 = vsub.s32 32, %v740_v22  ;;  %v745_v34 = vsub.s32 4294967266, %v740_v22  ;;  %v742_v40 = vshll.u32 %v4986_v17, %v740_v22  ;;  %v4116_v41 = vmin.u32 %v2399_v28, %v5019_v6 }
 0x127   : > { %v611_v11 = vsel %vm599_vm4, %v593_v61, %v610_v37  ;;  %v2239_v43 = vadd.s32 1, %v4111_v39  ;;  %v762_v46 = vadd.s32 3, %v758_v7  ;;  %v601_v50 = vsel %vm597_vm0, %v581_v18, %v584_v45 }
 0x128   : > { %v743_v54 = vshrl.u32 %v725_v16, %v741_v32  ;;  %v746_v13 = vadd.s32 127, %v745_v34  ;;  %v612_v42 = vsel %vm598_vm1, %v609_v20, %v611_v11  ;;  %v2401_v49 = vclz %v4116_v41 }
 0x129   : > { %v603_v17 = vsel %vm599_vm4, %v587_v53, %v602_v36  ;;  %v5059_v60 = vmul.u32.u64.low %v4989_v12, %v612_v42  ;;  %v5060_v16 = vmul.u32.u64.high %v4989_v12, %v612_v42, %v5059_v60  ;;  %vm2240_vm7 = vcmp.gt.s32.totalorder %v2239_v43, 0 }
 0x12a   : > { %v744_v58 = vor.u32 %v743_v54, %v742_v40  ;;  %v747_v59 = vshll.u32 %v746_v13, 23  ;;  %v4117_v61 = vadd.s32 4294967294, %v2401_v49  ;;  %v2389_v45 = vadd.s32 %v4961_v62, %v4967_v2 }
 0x12b   : > { %v5063_v63 = vmul.u32.u64.low %v4989_v12, %v608_v52  ;;  %v5064_v39 = vmul.u32.u64.high %v4989_v12, %v608_v52, %v5063_v63  ;;  %v2420_v53 = vsel %vm2335_vm3, %v2419_v30, %v2395_v24  ;;  %v2241_v18 = vsel %vm2240_vm7, %v2239_v43, 0 }
 0x12c   : > { %v748_v1 = vor.u32 4788187, %v747_v59  ;;  %v5071_v4 = vand.u32 3, %v762_v46  ;;  %vm4118_vm8 = vcmp.lt.s32.totalorder %v4117_v61, 0  ;;  %v604_v7 = vsel %vm598_vm1, %v601_v50, %v603_v17 }
 0x12d   : > { %v2243_v9 = vand.u32 31, %v2241_v18  ;;  %v751_v22 = vcvt.s32.f32 %v744_v58  ;;  %v2404_v28 = vsel %vm4118_vm8, 0, %v4117_v61  ;;  %vm622_vm9 = vc.u32 %v5060_v16, %v5063_v63 }
 0x12e   : > { %v749_v15 = vand.u32 2147483647, %v748_v1  ;;  %v2405_v20 = vsub.s32 32, %v2404_v28  ;;  %v2409_v32 = vsub.s32 4294967266, %v2404_v28  ;;  %v2422_v62 = vsel %vm5036_vm6, 0, %v2420_v53 }
 0x12f   : > { %v623_v2 = vadd.s32 1, %v5064_v39  ;;  %v620_v30 = vmul.u32 %v4989_v12, %v604_v7  ;;  %v5081_v34 = vshrl.u32 %v2241_v18, 5  ;;  %v2244_v33 = vsub.s32 32, %v2243_v9 }
 0x130   : > { %v752_v24 = vmul.f32 %v751_v22, %v749_v15  ;;  %v2406_v36 = vshll.u32 %v5019_v6, %v2404_v28  ;;  %v2407_v37 = vshrl.u32 %v2389_v45, %v2405_v20  ;;  %v2410_v40 = vadd.s32 127, %v2409_v32 }
 0x131   : > { %v624_v41 = vsel %vm622_vm9, %v623_v2, %v5064_v39  ;;  %v2246_v54 = vshll.u32 %v4684_v21, %v2243_v9  ;;  %v2247_v13 = vshrl.u32 %v4685_v25, %v2244_v33  ;;  %v2249_v46 = vshll.u32 %v4685_v25, %v2243_v9 }
 0x132   : > { %v753_v52 = vxor.u32 2147483648, %v752_v24  ;;  %v625_v11 = vadd.s32 %v624_v41, %v620_v30  ;;  %v2408_v42 = vor.u32 %v2407_v37, %v2406_v36  ;;  %v2411_v43 = vshll.u32 %v2410_v40, 23 }
 0x133   : > { %v2250_v12 = vshrl.u32 %v4686_v27, %v2244_v33  ;;  %v2252_v50 = vshll.u32 %v4686_v27, %v2243_v9  ;;  %v2253_v17 = vshrl.u32 %v4687_v29, %v2244_v33  ;;  %v2248_v60 = vor.u32 %v2247_v13, %v2246_v54 }
 0x134   : > { %v754_v49 = vsel %vm671_vm14, %v753_v52, %v752_v24  ;;  %v626_v6 = vadd.s32 536870912, %v625_v11  ;;  %v2412_v59 = vor.u32 4788187, %v2411_v43  ;;  %v2255_v61 = vshll.u32 %v4687_v29, %v2243_v9 }
 0x135   : > { %v757_v58 = vsel %vm4993_vm15, %v4866_v47, %v754_v49  ;;  %v2415_v39 = vcvt.s32.f32 %v2408_v42  ;;  %v2256_v45 = vshrl.u32 %v4688_v31, %v2244_v33  ;;  %v2251_v18 = vor.u32 %v2250_v12, %v2249_v46 }
 0x136   : > { %4487 = vcosq.f32 %v757_v58  ;;  %v5097_v1 = vshrl.u32 %v626_v6, 30  ;;  %v2413_v53 = vand.u32 2147483647, %v2412_v59  ;;  %v2259_v7 = vshrl.u32 %v4689_v38, %v2244_v33 }
 0x137   : > { %4489 = vsinq.f32 %v757_v58  ;;  %v2257_v22 = vor.u32 %v2256_v45, %v2255_v61  ;;  %v2254_v28 = vor.u32 %v2253_v17, %v2252_v50  ;;  %v2258_v20 = vshll.u32 %v4688_v31, %v2243_v9 }
 0x138   : > { %v628_v15 = vshll.u32 %v5097_v1, 30  ;;  %v2416_v19 = vmul.f32 %v2415_v39, %v2413_v53  ;;  %v2426_v32 = vadd.s32 3, %v2422_v62  ;;  %vm2261_vm10 = vcmp.lt.s32.totalorder %v5081_v34, 1 }
 0x139   : > { %v5108_v24 = vshll.u32 %v2237_v14, 8  ;;  %vm765_vm11 = vcmp.eq.s32.totalorder %v5071_v4, 0  ;;  %v2260_v36 = vor.u32 %v2259_v7, %v2258_v20  ;;  %vm2264_vm12 = vcmp.lt.s32.totalorder %v5081_v34, 4 }
 0x13a   : > { %v5103_v2 = vsub.s32 %v625_v11, %v628_v15  ;;  %v2417_v30 = vxor.u32 2147483648, %v2416_v19  ;;  %v2269_v37 = vsel %vm2261_vm10, %v2248_v60, %v2251_v18  ;;  %vm764_vm13 = vcmp.lt.s32.totalorder %v5071_v4, 2 }
 0x13b   : > { %v2245_v62 = vshrl.u32 %v4684_v21, %v2244_v33  ;;  %vm2263_vm14 = vcmp.lt.s32.totalorder %v5081_v34, 3  ;;  %v2270_v23 = vsel %vm2264_vm12, %v2257_v22, 920167782  ;;  %vm761_vm15 = vweird.f32 %v4866_v47 }
 0x13c   : > { %v631_v9 = vsub.s32 0, %v5103_v2  ;;  %v2418_v14 = vsel %vm2335_vm3, %v2417_v30, %v2416_v19  ;;  %vm567_vm0 = vcmp.lt.s32.totalorder %v4872_v51, 0  ;;  %vm2262_vm1 = vcmp.lt.s32.totalorder %v5081_v34, 2 }
 0x13d   : > { %v2266_v40 = vsel %vm2264_vm12, %v2254_v28, 2102212464  ;;  %v2271_v33 = vsel %vm2263_vm14, %v2254_v28, %v2270_v23  ;;  %v2421_v41 = vsel %vm5036_vm6, %v4869_v48, %v2418_v14  ;;  %v2273_v54 = vsel %vm2261_vm10, %v2251_v18, %v2254_v28  ;;  %v5189_v14 = vpop.f32.mrb[5].mxu0 }
 0x13e   : > { %v4048_v52 = vmin.u32 %v631_v9, %v5103_v2  ;;  %v2272_v11 = vsel %vm2262_vm1, %v2269_v37, %v2271_v33  ;;  %4491 = vcosq.f32 %v2421_v41  ;;  %v2274_v13 = vsel %vm2264_vm12, %v2260_v36, 1326507024 }
 0x13f   : > { %v5140_v42 = vmul.u32.u64.low %v5108_v24, %v2272_v11  ;;  %v5141_v43 = vmul.u32.u64.high %v5108_v24, %v2272_v11, %v5140_v42  ;;  %vm768_vm2 = vcmp.eq.s32.totalorder %v5071_v4, 2  ;;  %4493 = vsinq.f32 %v2421_v41 }
 0x140   : > { %v4488_v46 = vpop.eup %4487  ;;  %v633_v35 = vclz %v4048_v52  ;;  %v651_v12 = vsub.s32 4, %v5097_v1  ;;  %v2265_v50 = vsel %vm2261_vm10, %v2245_v62, %v2248_v60  ;;  %v2267_v17 = vsel %vm2263_vm14, %v2251_v18, %v2266_v40 }
 0x141   : > { %v4490_v49 = vpop.eup %4489  ;;  %v769_v6 = vxor.u32 2147483648, %v4488_v46  ;;  %v2275_v58 = vsel %vm2263_vm14, %v2257_v22, %v2274_v13  ;;  %v5158_v45 = vadd.f32 %v4878_v56, %v4863_v44  ;;  %v2427_v7 = vand.u32 3, %v2426_v32 }
 0x142   : > { %v766_v59 = vxor.u32 2147483648, %v4490_v49  ;;  %v4049_v61 = vadd.s32 4294967294, %v633_v35  ;;  %v2276_v39 = vsel %vm2262_vm1, %v2273_v54, %v2275_v58  ;;  %v2268_v22 = vsel %vm2262_vm1, %v2265_v50, %v2267_v17 }
 0x143   : > { %v770_v53 = vsel %vm768_vm2, %v769_v6, %v4490_v49  ;;  %v5161_v15 = vmul.u32.u64.low %v5108_v24, %v2276_v39  ;;  %v5162_v60 = vmul.u32.u64.high %v5108_v24, %v2276_v39, %v5161_v15  ;;  %v2287_v19 = vadd.s32 1, %v5141_v43 }
 0x144   : > { %v767_v18 = vsel %vm765_vm11, %v4488_v46, %v766_v59  ;;  %vm4050_vm3 = vcmp.lt.s32.totalorder %v4049_v61, 0  ;;  %v621_v56 = vadd.s32 %v5063_v63, %v5060_v16  ;;  %v880_v32 = vand.u32 2139095040, %v5158_v45 }
 0x145   : > { %v771_v28 = vsel %vm764_vm13, %v767_v18, %v770_v53  ;;  %v636_v20 = vsel %vm4050_vm3, 0, %v4049_v61  ;;  %vm2425_vm4 = vweird.f32 %v4869_v48  ;;  %v652_v34 = vsel %vm567_vm0, %v651_v12, %v5097_v1 }
 0x146   : > { %v772_v30 = vsel %vm761_vm15, nan, %v771_v28  ;;  %v637_v36 = vsub.s32 32, %v636_v20  ;;  %v641_v37 = vsub.s32 4294967266, %v636_v20  ;;  %v2284_v16 = vmul.u32 %v5108_v24, %v2268_v22 }
 0x147   : > { %3894 = vst [vmem:[%s5180_s6 + $0x8] sm:$0xff] %v772_v30  ;;  %vm2286_vm5 = vc.u32 %v5162_v60, %v5140_v42  ;;  %v877_v47 = vand.u32 2147483647, %v5158_v45  ;;  %v881_v63 = vshrl.u32 %v880_v32, 23  ;;  %v638_v4 = vshll.u32 %v5103_v2, %v636_v20 }
 0x148   : > { %v639_v9 = vshrl.u32 %v621_v56, %v637_v36  ;;  %v642_v62 = vadd.s32 127, %v641_v37  ;;  %v2288_v23 = vsel %vm2286_vm5, %v2287_v19, %v5141_v43  ;;  %v4492_v1 = vpop.eup %4491  ;;  %vm2432_vm6 = vcmp.eq.s32.totalorder %v2427_v7, 2 }
 0x149   : > { %vm5193_vm7 = vcmp.le.f32.partialorder %v565_v8, 0.7853982  ;;  %v2289_v40 = vadd.s32 %v2288_v23, %v2284_v16  ;;  %v4059_v33 = vadd.s32 4294967169, %v881_v63  ;;  %v4494_v41 = vpop.eup %4493  ;;  %v2433_v52 = vxor.u32 2147483648, %v4492_v1 }
 0x14a   : > { %v640_v11 = vor.u32 %v639_v9, %v638_v4  ;;  %v643_v2 = vshll.u32 %v642_v62, 23  ;;  %v654_v54 = vsel %vm5193_vm7, 0, %v652_v34  ;;  %v2430_v13 = vxor.u32 2147483648, %v4494_v41 }
 0x14b   : > { %v2290_v43 = vadd.s32 536870912, %v2289_v40  ;;  %v884_v46 = vand.u32 8388607, %v877_v47  ;;  %v887_v35 = vadd.s32 1, %v4059_v33  ;;  %vm2428_vm8 = vcmp.lt.s32.totalorder %v2427_v7, 2 }
 0x14c   : > { %vm2429_vm9 = vcmp.eq.s32.totalorder %v2427_v7, 0  ;;  %v2434_v8 = vsel %vm2432_vm6, %v2433_v52, %v4494_v41  ;;  %v644_v12 = vor.u32 4788187, %v643_v2  ;;  %v658_v6 = vadd.s32 3, %v654_v54 }
 0x14d   : > { %v2431_v49 = vsel %vm2429_vm9, %v4492_v1, %v2430_v13  ;;  %v5201_v50 = vshrl.u32 %v2290_v43, 30  ;;  %vm888_vm10 = vcmp.gt.s32.totalorder %v887_v35, 0  ;;  %v647_v59 = vcvt.s32.f32 %v640_v11 }
 0x14e   : > { %v2435_v17 = vsel %vm2428_vm8, %v2431_v49, %v2434_v8  ;;  %v645_v58 = vand.u32 2147483647, %v644_v12  ;;  %v889_v61 = vsel %vm888_vm10, %v887_v35, 0  ;;  %v885_v15 = vor.u32 8388608, %v884_v46  ;;  %v5256_v8 = vpop.f32.mrb[5].mxu1 }
 0x14f   : > { %v2436_v39 = vsel %vm2425_vm4, nan, %v2435_v17  ;;  %v2292_v53 = vshll.u32 %v5201_v50, 30  ;;  %v891_v7 = vand.u32 31, %v889_v61  ;;  %v5207_v22 = vand.u32 3, %v658_v6 }
 0x150   : > { %3910 = vst [vmem:[%s5180_s6 + $0x88] sm:$0xff] %v2436_v39  ;;  %v648_v18 = vmul.f32 %v647_v59, %v645_v58  ;;  %v2285_v56 = vadd.s32 %v5140_v42, %v5162_v60  ;;  %v5215_v32 = vadd.f32 %v4880_v57, %v4863_v44  ;;  %v5218_v30 = vshrl.u32 %v889_v61, 5 }
 0x151   : > { %v5209_v19 = vsub.s32 %v2289_v40, %v2292_v53  ;;  %v892_v20 = vsub.s32 32, %v891_v7  ;;  %v5220_v36 = vshll.u32 %v885_v15, 8  ;;  %v5224_v37 = vadd.f32 %v4863_v44, %v4887_v0 }
 0x152   : > { %v649_v28 = vxor.u32 2147483648, %v648_v18  ;;  %v894_v42 = vshll.u32 %v4684_v21, %v891_v7  ;;  %v897_v4 = vshll.u32 %v4685_v25, %v891_v7  ;;  %v2315_v0 = vsub.s32 4, %v5201_v50 }
 0x153   : > { %v2295_v48 = vsub.s32 0, %v5209_v19  ;;  %v895_v60 = vshrl.u32 %v4685_v25, %v892_v20  ;;  %v898_v57 = vshrl.u32 %v4686_v27, %v892_v20  ;;  %v901_v44 = vshrl.u32 %v4687_v29, %v892_v20 }
 0x154   : > { %v650_v34 = vsel %vm567_vm0, %v649_v28, %v648_v18  ;;  %v900_v9 = vshll.u32 %v4686_v27, %v891_v7  ;;  %v2544_v62 = vand.u32 2139095040, %v5215_v32  ;;  %v903_v24 = vshll.u32 %v4687_v29, %v891_v7 }
 0x155   : > { %v653_v16 = vsel %vm5193_vm7, %v4872_v51, %v650_v34  ;;  %v4112_v63 = vmin.u32 %v2295_v48, %v5209_v19  ;;  %v896_v1 = vor.u32 %v895_v60, %v894_v42  ;;  %v899_v40 = vor.u32 %v898_v57, %v897_v4 }
 0x156   : > { %4495 = vcosq.f32 %v653_v16  ;;  %v902_v33 = vor.u32 %v901_v44, %v900_v9  ;;  %v904_v41 = vshrl.u32 %v4688_v31, %v892_v20  ;;  %vm909_vm11 = vcmp.lt.s32.totalorder %v5218_v30, 1 }
 0x157   : > { %4497 = vsinq.f32 %v653_v16  ;;  %v2297_v23 = vclz %v4112_v63  ;;  %v906_v11 = vshll.u32 %v4688_v31, %v891_v7  ;;  %v907_v2 = vshrl.u32 %v4689_v38, %v892_v20 }
 0x158   : > { %vm910_vm12 = vcmp.lt.s32.totalorder %v5218_v30, 2  ;;  %vm664_vm13 = vcmp.eq.s32.totalorder %v5207_v22, 2  ;;  %v893_v54 = vshrl.u32 %v4684_v21, %v892_v20  ;;  %v905_v13 = vor.u32 %v904_v41, %v903_v24 }
 0x159   : > { %v4113_v52 = vadd.s32 4294967294, %v2297_v23  ;;  %vm911_vm14 = vcmp.lt.s32.totalorder %v5218_v30, 3  ;;  %vm912_vm15 = vcmp.lt.s32.totalorder %v5218_v30, 4  ;;  %vm661_vm0 = vcmp.eq.s32.totalorder %v5207_v22, 0 }
 0x15a   : > { %vm2231_vm1 = vcmp.lt.s32.totalorder %v4890_v5, 0  ;;  %v908_v43 = vor.u32 %v907_v2, %v906_v11  ;;  %v914_v46 = vsel %vm912_vm15, %v902_v33, 2102212464  ;;  %v917_v35 = vsel %vm909_vm11, %v896_v1, %v899_v40 }
 0x15b   : > { %vm4114_vm2 = vcmp.lt.s32.totalorder %v4113_v52, 0  ;;  %vm660_vm3 = vcmp.lt.s32.totalorder %v5207_v22, 2  ;;  %v913_v49 = vsel %vm909_vm11, %v893_v54, %v896_v1  ;;  %v918_v6 = vsel %vm912_vm15, %v905_v13, 920167782 }
 0x15c   : > { %v2300_v12 = vsel %vm4114_vm2, 0, %v4113_v52  ;;  %v2545_v17 = vshrl.u32 %v2544_v62, 23  ;;  %vm657_vm4 = vweird.f32 %v4872_v51  ;;  %v919_v61 = vsel %vm911_vm14, %v902_v33, %v918_v6 }
 0x15d   : > { %v2301_v58 = vsub.s32 32, %v2300_v12  ;;  %v2305_v59 = vsub.s32 4294967266, %v2300_v12  ;;  %v921_v39 = vsel %vm909_vm11, %v899_v40, %v902_v33  ;;  %vm5270_vm5 = vcmp.le.f32.partialorder %v2229_v3, 0.7853982 }
 0x15e   : > { %v915_v15 = vsel %vm911_vm14, %v899_v40, %v914_v46  ;;  %v920_v18 = vsel %vm910_vm12, %v917_v35, %v919_v61  ;;  %v922_v7 = vsel %vm912_vm15, %v908_v43, 1326507024  ;;  %v4123_v28 = vadd.s32 4294967169, %v2545_v17 }
 0x15f   : > { %v2302_v20 = vshll.u32 %v5209_v19, %v2300_v12  ;;  %v2303_v48 = vshrl.u32 %v2285_v56, %v2301_v58  ;;  %v2306_v34 = vadd.s32 127, %v2305_v59  ;;  %v923_v3 = vsel %vm911_vm14, %v905_v13, %v922_v7 }
 0x160   : > { %v4496_v42 = vpop.eup %4495  ;;  %v924_v60 = vsel %vm910_vm12, %v921_v39, %v923_v3  ;;  %v5286_v57 = vmul.u32.u64.low %v5220_v36, %v920_v18  ;;  %v5287_v16 = vmul.u32.u64.high %v5220_v36, %v920_v18, %v5286_v57  ;;  %v2551_v63 = vadd.s32 1, %v4123_v28 }
 0x161   : > { %v4498_v4 = vpop.eup %4497  ;;  %v665_v44 = vxor.u32 2147483648, %v4496_v42  ;;  %v2304_v9 = vor.u32 %v2303_v48, %v2302_v20  ;;  %v2307_v62 = vshll.u32 %v2306_v34, 23  ;;  %v2541_v19 = vand.u32 2147483647, %v5215_v32 }
 0x162   : > { %v662_v56 = vxor.u32 2147483648, %v4498_v4  ;;  %v5292_v23 = vmul.u32.u64.low %v5220_v36, %v924_v60  ;;  %v5293_v1 = vmul.u32.u64.high %v5220_v36, %v924_v60, %v5292_v23  ;;  %vm2552_vm6 = vcmp.gt.s32.totalorder %v2551_v63, 0 }
 0x163   : > { %v666_v40 = vsel %vm664_vm13, %v665_v44, %v4498_v4  ;;  %v2308_v33 = vor.u32 4788187, %v2307_v62  ;;  %v916_v24 = vsel %vm910_vm12, %v913_v49, %v915_v15  ;;  %v2553_v41 = vsel %vm2552_vm6, %v2551_v63, 0 }
 0x164   : > { %v663_v52 = vsel %vm661_vm0, %v4496_v42, %v662_v56  ;;  %v2316_v11 = vsel %vm2231_vm1, %v2315_v0, %v5201_v50  ;;  %v935_v2 = vadd.s32 1, %v5287_v16  ;;  %v2555_v54 = vand.u32 31, %v2553_v41 }
 0x165   : > { %v667_v13 = vsel %vm660_vm3, %v663_v52, %v666_v40  ;;  %v2309_v43 = vand.u32 2147483647, %v2308_v33  ;;  %v2311_v46 = vcvt.s32.f32 %v2304_v9  ;;  %v2548_v30 = vand.u32 8388607, %v2541_v19 }
 0x166   : > { %v668_v35 = vsel %vm657_vm4, nan, %v667_v13  ;;  %v932_v12 = vmul.u32 %v5220_v36, %v916_v24  ;;  %vm934_vm7 = vc.u32 %v5293_v1, %v5286_v57  ;;  %v2556_v50 = vsub.s32 32, %v2555_v54 }
 0x167   : > { %3893 = vst [vmem:[%s5180_s6] sm:$0xff] %v668_v35  ;;  %v2312_v0 = vmul.f32 %v2311_v46, %v2309_v43  ;;  %v2318_v22 = vsel %vm5270_vm5, 0, %v2316_v11  ;;  %v936_v49 = vsel %vm934_vm7, %v935_v2, %v5287_v16  ;;  %v2554_v6 = vshrl.u32 %v2553_v41, 5 }
 0x168   : > { %v937_v17 = vadd.s32 %v936_v49, %v932_v12  ;;  %v2558_v58 = vshll.u32 %v4684_v21, %v2555_v54  ;;  %v2559_v51 = vshrl.u32 %v4685_v25, %v2556_v50  ;;  %v2562_v59 = vshrl.u32 %v4686_v27, %v2556_v50 }
 0x169   : > { %v2313_v36 = vxor.u32 2147483648, %v2312_v0  ;;  %v2561_v61 = vshll.u32 %v4685_v25, %v2555_v54  ;;  %v2564_v39 = vshll.u32 %v4686_v27, %v2555_v54  ;;  %v2565_v15 = vshrl.u32 %v4687_v29, %v2556_v50 }
 0x16a   : > { %v938_v18 = vadd.s32 536870912, %v937_v17  ;;  %v2560_v7 = vor.u32 %v2559_v51, %v2558_v58  ;;  %v2567_v28 = vshll.u32 %v4687_v29, %v2555_v54  ;;  %v2568_v20 = vshrl.u32 %v4688_v31, %v2556_v50 }
 0x16b   : > { %v2314_v48 = vsel %vm2231_vm1, %v2313_v36, %v2312_v0  ;;  %v2563_v34 = vor.u32 %v2562_v59, %v2561_v61  ;;  %v2566_v3 = vor.u32 %v2565_v15, %v2564_v39  ;;  %v2571_v42 = vshrl.u32 %v4689_v38, %v2556_v50 }
 0x16c   : > { %v2317_v60 = vsel %vm5270_vm5, %v4890_v5, %v2314_v48  ;;  %v939_v16 = vshrl.u32 %v938_v18, 30  ;;  %v2569_v63 = vor.u32 %v2568_v20, %v2567_v28  ;;  %v2570_v4 = vshll.u32 %v4688_v31, %v2555_v54 }
 0x16d   : > { %4499 = vcosq.f32 %v2317_v60  ;;  %v2322_v44 = vadd.s32 3, %v2318_v22  ;;  %v2549_v9 = vor.u32 8388608, %v2548_v30  ;;  %vm2573_vm8 = vcmp.lt.s32.totalorder %v2554_v6, 1 }
 0x16e   : > { %4501 = vsinq.f32 %v2317_v60  ;;  %v940_v62 = vshll.u32 %v939_v16, 30  ;;  %v2572_v56 = vor.u32 %v2571_v42, %v2570_v4  ;;  %vm2576_vm9 = vcmp.lt.s32.totalorder %v2554_v6, 4 }
 0x16f   : > { %v2557_v23 = vshrl.u32 %v4684_v21, %v2556_v50  ;;  %vm2575_vm10 = vcmp.lt.s32.totalorder %v2554_v6, 3  ;;  %v2581_v40 = vsel %vm2573_vm8, %v2560_v7, %v2563_v34  ;;  %v2582_v53 = vsel %vm2576_vm9, %v2569_v63, 920167782 }
 0x170   : > { %v5338_v33 = vsub.s32 %v937_v17, %v940_v62  ;;  %vm2574_vm11 = vcmp.lt.s32.totalorder %v2554_v6, 2  ;;  %v2578_v24 = vsel %vm2576_vm9, %v2566_v3, 2102212464  ;;  %v2583_v41 = vsel %vm2575_vm10, %v2566_v3, %v2582_v53 }
 0x171   : > { %v963_v52 = vsub.s32 4, %v939_v16  ;;  %v2584_v11 = vsel %vm2574_vm11, %v2581_v40, %v2583_v41  ;;  %v2585_v2 = vsel %vm2573_vm8, %v2563_v34, %v2566_v3  ;;  %v2589_v54 = vshll.u32 %v2549_v9, 8 }
 0x172   : > { %v2323_v13 = vand.u32 3, %v2322_v44  ;;  %v943_v43 = vsub.s32 0, %v5338_v33  ;;  %v2577_v46 = vsel %vm2573_vm8, %v2557_v23, %v2560_v7  ;;  %v2586_v30 = vsel %vm2576_vm9, %v2572_v56, 1326507024 }
 0x173   : > { %v2579_v35 = vsel %vm2575_vm10, %v2563_v34, %v2578_v24  ;;  %v2587_v12 = vsel %vm2575_vm10, %v2569_v63, %v2586_v30  ;;  %v5349_v50 = vmul.u32.u64.low %v2589_v54, %v2584_v11  ;;  %v5350_v0 = vmul.u32.u64.high %v2589_v54, %v2584_v11, %v5349_v50  ;;  %v5383_v11 = vpop.f32.mrb[6].mxu0 }
 0x174   : > { %vm2321_vm12 = vweird.f32 %v4890_v5  ;;  %vm879_vm13 = vcmp.lt.s32.totalorder %v5158_v45, 0  ;;  %v4060_v22 = vmin.u32 %v943_v43, %v5338_v33  ;;  %v2588_v49 = vsel %vm2574_vm11, %v2585_v2, %v2587_v12 }
 0x175   : > { %v964_v17 = vsel %vm879_vm13, %v963_v52, %v939_v16  ;;  %v5358_v58 = vmul.u32.u64.low %v2589_v54, %v2588_v49  ;;  %v5359_v51 = vmul.u32.u64.high %v2589_v54, %v2588_v49, %v5358_v58  ;;  %v776_v59 = vand.u32 2139095040, %v5224_v37 }
 0x176   : > { %vm5364_vm14 = vcmp.le.f32.partialorder %v877_v47, 0.7853982  ;;  %v945_v61 = vclz %v4060_v22  ;;  %v2580_v39 = vsel %vm2574_vm11, %v2577_v46, %v2579_v35  ;;  %v773_v15 = vand.u32 2147483647, %v5224_v37 }
 0x177   : > { %v4500_v18 = vpop.eup %4499  ;;  %vm2324_vm15 = vcmp.lt.s32.totalorder %v2323_v13, 2  ;;  %vm2325_vm0 = vcmp.eq.s32.totalorder %v2323_v13, 0  ;;  %v2599_v7 = vadd.s32 1, %v5350_v0  ;;  %v777_v28 = vshrl.u32 %v776_v59, 23 }
 0x178   : > { %v4502_v20 = vpop.eup %4501  ;;  %vm2328_vm1 = vcmp.eq.s32.totalorder %v2323_v13, 2  ;;  %v2329_v48 = vxor.u32 2147483648, %v4500_v18  ;;  %v4061_v34 = vadd.s32 4294967294, %v945_v61  ;;  %v966_v47 = vsel %vm5364_vm14, 0, %v964_v17 }
 0x179   : > { %v2326_v3 = vxor.u32 2147483648, %v4502_v20  ;;  %v2596_v42 = vmul.u32 %v2589_v54, %v2580_v39  ;;  %vm2598_vm2 = vc.u32 %v5359_v51, %v5349_v50  ;;  %v4055_v6 = vadd.s32 4294967169, %v777_v28 }
 0x17a   : > { %v2330_v60 = vsel %vm2328_vm1, %v2329_v48, %v4502_v20  ;;  %vm4062_vm3 = vcmp.lt.s32.totalorder %v4061_v34, 0  ;;  %v2600_v16 = vsel %vm2598_vm2, %v2599_v7, %v5350_v0  ;;  %v780_v63 = vand.u32 8388607, %v773_v15 }
 0x17b   : > { %v2327_v4 = vsel %vm2325_vm0, %v4500_v18, %v2326_v3  ;;  %v948_v44 = vsel %vm4062_vm3, 0, %v4061_v34  ;;  %v2601_v9 = vadd.s32 %v2600_v16, %v2596_v42  ;;  %v783_v62 = vadd.s32 1, %v4055_v6 }
 0x17c   : > { %v2331_v56 = vsel %vm2324_vm15, %v2327_v4, %v2330_v60  ;;  %v933_v23 = vadd.s32 %v5286_v57, %v5293_v1  ;;  %v949_v40 = vsub.s32 32, %v948_v44  ;;  %v953_v53 = vsub.s32 4294967266, %v948_v44 }
 0x17d   : > { %v2332_v24 = vsel %vm2321_vm12, nan, %v2331_v56  ;;  %v970_v41 = vadd.s32 3, %v966_v47  ;;  %v2602_v52 = vadd.s32 536870912, %v2601_v9  ;;  %vm784_vm4 = vcmp.gt.s32.totalorder %v783_v62, 0 }
 0x17e   : > { %3909 = vst [vmem:[%s5180_s6 + $0x80] sm:$0xff] %v2332_v24  ;;  %v950_v2 = vshll.u32 %v5338_v33, %v948_v44  ;;  %v951_v54 = vshrl.u32 %v933_v23, %v949_v40  ;;  %v954_v43 = vadd.s32 127, %v953_v53  ;;  %v785_v13 = vsel %vm784_vm4, %v783_v62, 0  ;;  %v5394_v33 = vld [vmem:[%s7596_s2] ss:$0 sm:$0xff] }
 0x17f   : > { %v2603_v46 = vshrl.u32 %v2602_v52, 30  ;;  %v781_v30 = vor.u32 8388608, %v780_v63  ;;  %v787_v35 = vand.u32 31, %v785_v13  ;;  %v5387_v12 = vand.u32 3, %v970_v41 }
 0x180   : > { %v952_v57 = vor.u32 %v951_v54, %v950_v2  ;;  %v955_v1 = vshll.u32 %v954_v43, 23  ;;  %vm2543_vm5 = vcmp.lt.s32.totalorder %v5215_v32, 0  ;;  %v2597_v49 = vadd.s32 %v5349_v50, %v5359_v51 }
 0x181   : > { %v2604_v5 = vshll.u32 %v2603_v46, 30  ;;  %v788_v0 = vsub.s32 32, %v787_v35  ;;  %v5398_v17 = vadd.f32 %v5394_v33, %v4893_v10  ;;  %v5402_v58 = vadd.f32 %v5394_v33, %v4976_v26 }
 0x182   : > { %v956_v22 = vor.u32 4788187, %v955_v1  ;;  %v786_v61 = vshrl.u32 %v785_v13, 5  ;;  %v5407_v18 = vshll.u32 %v781_v30, 8  ;;  %v959_v51 = vcvt.s32.f32 %v952_v57 }
 0x183   : > { %v5404_v59 = vsub.s32 %v2601_v9, %v2604_v5  ;;  %v791_v39 = vshrl.u32 %v4685_v25, %v788_v0  ;;  %v794_v7 = vshrl.u32 %v4686_v27, %v788_v0  ;;  %v797_v28 = vshrl.u32 %v4687_v29, %v788_v0 }
 0x184   : > { %v957_v50 = vand.u32 2147483647, %v956_v22  ;;  %v2627_v20 = vsub.s32 4, %v2603_v46  ;;  %v790_v48 = vshll.u32 %v4684_v21, %v787_v35  ;;  %v793_v26 = vshll.u32 %v4685_v25, %v787_v35 }
 0x185   : > { %v2607_v10 = vsub.s32 0, %v5404_v59  ;;  %v796_v47 = vshll.u32 %v4686_v27, %v787_v35  ;;  %v799_v3 = vshll.u32 %v4687_v29, %v787_v35  ;;  %v800_v42 = vshrl.u32 %v4688_v31, %v788_v0 }
 0x186   : > { %v960_v34 = vmul.f32 %v959_v51, %v957_v50  ;;  %v792_v60 = vor.u32 %v791_v39, %v790_v48  ;;  %v795_v16 = vor.u32 %v794_v7, %v793_v26  ;;  %v803_v63 = vshrl.u32 %v4689_v38, %v788_v0 }
 0x187   : > { %v4124_v6 = vmin.u32 %v2607_v10, %v5404_v59  ;;  %v798_v44 = vor.u32 %v797_v28, %v796_v47  ;;  %v801_v9 = vor.u32 %v800_v42, %v799_v3  ;;  %v802_v62 = vshll.u32 %v4688_v31, %v787_v35  ;;  %v5432_v35 = vpop.f32.mrb[6].mxu1 }
 0x188   : > { %v961_v4 = vxor.u32 2147483648, %v960_v34  ;;  %v2628_v23 = vsel %vm2543_vm5, %v2627_v20, %v2603_v46  ;;  %v789_v40 = vshrl.u32 %v4684_v21, %v788_v0  ;;  %v2440_v53 = vand.u32 2139095040, %v5398_v17 }
 0x189   : > { %v2609_v56 = vclz %v4124_v6  ;;  %v804_v41 = vor.u32 %v803_v63, %v802_v62  ;;  %vm805_vm6 = vcmp.lt.s32.totalorder %v786_v61, 1  ;;  %vm806_vm7 = vcmp.lt.s32.totalorder %v786_v61, 2 }
 0x18a   : > { %v962_v24 = vsel %vm879_vm13, %v961_v4, %v960_v34  ;;  %vm807_vm8 = vcmp.lt.s32.totalorder %v786_v61, 3  ;;  %vm808_vm9 = vcmp.lt.s32.totalorder %v786_v61, 4  ;;  %v813_v43 = vsel %vm805_vm6, %v792_v60, %v795_v16 }
 0x18b   : > { %v965_v52 = vsel %vm5364_vm14, %v5158_v45, %v962_v24  ;;  %v4125_v2 = vadd.s32 4294967294, %v2609_v56  ;;  %v810_v54 = vsel %vm808_vm9, %v798_v44, 2102212464  ;;  %v814_v13 = vsel %vm808_vm9, %v801_v9, 920167782 }
 0x18c   : > { %4503 = vcosq.f32 %v965_v52  ;;  %v809_v46 = vsel %vm805_vm6, %v789_v40, %v792_v60  ;;  %v815_v30 = vsel %vm807_vm8, %v798_v44, %v814_v13  ;;  %v817_v1 = vsel %vm805_vm6, %v795_v16, %v798_v44 }
 0x18d   : > { %4505 = vsinq.f32 %v965_v52  ;;  %vm4126_vm10 = vcmp.lt.s32.totalorder %v4125_v2, 0  ;;  %v816_v36 = vsel %vm806_vm7, %v813_v43, %v815_v30  ;;  %v818_v5 = vsel %vm808_vm9, %v804_v41, 1326507024 }
 0x18e   : > { %v2612_v57 = vsel %vm4126_vm10, 0, %v4125_v2  ;;  %v811_v39 = vsel %vm807_vm8, %v795_v16, %v810_v54  ;;  %v819_v50 = vsel %vm807_vm8, %v801_v9, %v818_v5  ;;  %vm5451_vm11 = vcmp.le.f32.partialorder %v2541_v19, 0.7853982 }
 0x18f   : > { %v2613_v0 = vsub.s32 32, %v2612_v57  ;;  %v2617_v22 = vsub.s32 4294967266, %v2612_v57  ;;  %v2614_v51 = vshll.u32 %v5404_v59, %v2612_v57  ;;  %v820_v7 = vsel %vm806_vm7, %v817_v1, %v819_v50 }
 0x190   : > { %v5441_v28 = vmul.u32.u64.low %v5407_v18, %v816_v36  ;;  %v5442_v10 = vmul.u32.u64.high %v5407_v18, %v816_v36, %v5441_v28  ;;  %v5446_v26 = vmul.u32.u64.low %v5407_v18, %v820_v7  ;;  %v5447_v34 = vmul.u32.u64.high %v5407_v18, %v820_v7, %v5446_v26 }
 0x191   : > { %v2615_v20 = vshrl.u32 %v2597_v49, %v2613_v0  ;;  %v2618_v48 = vadd.s32 127, %v2617_v22  ;;  %v812_v59 = vsel %vm806_vm7, %v809_v46, %v811_v39  ;;  %v2441_v3 = vshrl.u32 %v2440_v53, 23 }
 0x192   : > { %v2630_v60 = vsel %vm5451_vm11, 0, %v2628_v23  ;;  %v831_v49 = vadd.s32 1, %v5442_v10  ;;  %v2437_v16 = vand.u32 2147483647, %v5398_v17  ;;  %v1088_v4 = vand.u32 2139095040, %v5402_v58 }
 0x193   : > { %v2616_v42 = vor.u32 %v2615_v20, %v2614_v51  ;;  %v2619_v6 = vshll.u32 %v2618_v48, 23  ;;  %v4119_v63 = vadd.s32 4294967169, %v2441_v3  ;;  %vm973_vm12 = vcmp.eq.s32.totalorder %v5387_v12, 0 }
 0x194   : > { %v828_v44 = vmul.u32 %v5407_v18, %v812_v59  ;;  %vm830_vm13 = vc.u32 %v5447_v34, %v5441_v28  ;;  %vm976_vm14 = vcmp.eq.s32.totalorder %v5387_v12, 2  ;;  %v2634_v9 = vadd.s32 3, %v2630_v60 }
 0x195   : > { %v2620_v19 = vor.u32 4788187, %v2619_v6  ;;  %v832_v62 = vsel %vm830_vm13, %v831_v49, %v5442_v10  ;;  %v2447_v56 = vadd.s32 1, %v4119_v63  ;;  %v2623_v24 = vcvt.s32.f32 %v2616_v42 }
 0x196   : > { %v4504_v61 = vpop.eup %4503  ;;  %v833_v41 = vadd.s32 %v832_v62, %v828_v44  ;;  %v2444_v2 = vand.u32 8388607, %v2437_v16  ;;  %v1089_v18 = vshrl.u32 %v1088_v4, 23  ;;  %vm969_vm0 = vweird.f32 %v5158_v45 }
 0x197   : > { %v4506_v23 = vpop.eup %4505  ;;  %v977_v40 = vxor.u32 2147483648, %v4504_v61  ;;  %v2621_v53 = vand.u32 2147483647, %v2620_v19  ;;  %vm2448_vm15 = vcmp.gt.s32.totalorder %v2447_v56, 0  ;;  %vm972_vm1 = vcmp.lt.s32.totalorder %v5387_v12, 2 }
 0x198   : > { %v974_v52 = vxor.u32 2147483648, %v4506_v23  ;;  %v834_v13 = vadd.s32 536870912, %v833_v41  ;;  %v2449_v46 = vsel %vm2448_vm15, %v2447_v56, 0  ;;  %v5473_v5 = vand.u32 3, %v2634_v9 }
 0x199   : > { %v978_v54 = vsel %vm976_vm14, %v977_v40, %v4506_v23  ;;  %v2624_v43 = vmul.f32 %v2623_v24, %v2621_v53  ;;  %v2451_v57 = vand.u32 31, %v2449_v46  ;;  %v2445_v39 = vor.u32 8388608, %v2444_v2 }
 0x19a   : > { %v975_v30 = vsel %vm973_vm12, %v4504_v61, %v974_v52  ;;  %v5475_v0 = vshrl.u32 %v834_v13, 30  ;;  %v1085_v51 = vand.u32 2147483647, %v5402_v58  ;;  %v4067_v10 = vadd.s32 4294967169, %v1089_v18 }
 0x19b   : > { %v979_v36 = vsel %vm972_vm1, %v975_v30, %v978_v54  ;;  %v2625_v1 = vxor.u32 2147483648, %v2624_v43  ;;  %v2452_v50 = vsub.s32 32, %v2451_v57  ;;  %v2454_v12 = vshll.u32 %v4684_v21, %v2451_v57 }
 0x19c   : > { %v980_v22 = vsel %vm969_vm0, nan, %v979_v36  ;;  %v836_v7 = vshll.u32 %v5475_v0, 30  ;;  %v2457_v26 = vshll.u32 %v4685_v25, %v2451_v57  ;;  %v2460_v42 = vshll.u32 %v4686_v27, %v2451_v57 }
 0x19d   : > { %3896 = vst [vmem:[%s5180_s6 + $0x18] sm:$0xff] %v980_v22  ;;  %v2626_v45 = vsel %vm2543_vm5, %v2625_v1, %v2624_v43  ;;  %v2455_v48 = vshrl.u32 %v4685_v25, %v2452_v50  ;;  %v2458_v59 = vshrl.u32 %v4686_v27, %v2452_v50  ;;  %v2461_v6 = vshrl.u32 %v4687_v29, %v2452_v50 }
 0x19e   : > { %v2629_v20 = vsel %vm5451_vm11, %v5215_v32, %v2626_v45  ;;  %v5489_v3 = vsub.s32 %v833_v41, %v836_v7  ;;  %v829_v60 = vadd.s32 %v5441_v28, %v5447_v34  ;;  %v2450_v49 = vshrl.u32 %v2449_v46, 5 }
 0x19f   : > { %4507 = vcosq.f32 %v2629_v20  ;;  %v5495_v47 = vshll.u32 %v2445_v39, 8  ;;  %v2456_v4 = vor.u32 %v2455_v48, %v2454_v12  ;;  %v2459_v19 = vor.u32 %v2458_v59, %v2457_v26  ;;  %v5525_v59 = vpop.f32.mrb[7].mxu0 }
 0x1a0   : > { %4509 = vsinq.f32 %v2629_v20  ;;  %v839_v63 = vsub.s32 0, %v5489_v3  ;;  %v2462_v44 = vor.u32 %v2461_v6, %v2460_v42  ;;  %v2463_v61 = vshll.u32 %v4687_v29, %v2451_v57 }
 0x1a1   : > { %v2464_v9 = vshrl.u32 %v4688_v31, %v2452_v50  ;;  %v2466_v62 = vshll.u32 %v4688_v31, %v2451_v57  ;;  %v2467_v56 = vshrl.u32 %v4689_v38, %v2452_v50  ;;  %vm2640_vm2 = vcmp.eq.s32.totalorder %v5473_v5, 2 }
 0x1a2   : > { %v4056_v28 = vmin.u32 %v839_v63, %v5489_v3  ;;  %v859_v34 = vsub.s32 4, %v5475_v0  ;;  %v5507_v23 = vand.u32 8388607, %v1085_v51  ;;  %v1095_v40 = vadd.s32 1, %v4067_v10 }
 0x1a3   : > { %vm2637_vm3 = vcmp.eq.s32.totalorder %v5473_v5, 0  ;;  %v2453_v53 = vshrl.u32 %v4684_v21, %v2452_v50  ;;  %v2465_v24 = vor.u32 %v2464_v9, %v2463_v61  ;;  %v2468_v41 = vor.u32 %v2467_v56, %v2466_v62 }
 0x1a4   : > { %vm2469_vm4 = vcmp.lt.s32.totalorder %v2450_v49, 1  ;;  %vm2636_vm5 = vcmp.lt.s32.totalorder %v5473_v5, 2  ;;  %vm775_vm6 = vcmp.lt.s32.totalorder %v5224_v37, 0  ;;  %v841_v52 = vclz %v4056_v28 }
 0x1a5   : > { %vm2470_vm7 = vcmp.lt.s32.totalorder %v2450_v49, 2  ;;  %vm2471_vm8 = vcmp.lt.s32.totalorder %v2450_v49, 3  ;;  %vm2472_vm9 = vcmp.lt.s32.totalorder %v2450_v49, 4  ;;  %vm2633_vm10 = vweird.f32 %v5215_v32 }
 0x1a6   : > { %v2474_v2 = vsel %vm2472_vm9, %v2462_v44, 2102212464  ;;  %v2477_v18 = vsel %vm2469_vm4, %v2456_v4, %v2459_v19  ;;  %v2478_v54 = vsel %vm2472_vm9, %v2465_v24, 920167782  ;;  %v2481_v43 = vsel %vm2469_vm4, %v2459_v19, %v2462_v44 }
 0x1a7   : > { %v4057_v13 = vadd.s32 4294967294, %v841_v52  ;;  %v2473_v46 = vsel %vm2469_vm4, %v2453_v53, %v2456_v4  ;;  %v2479_v30 = vsel %vm2471_vm8, %v2462_v44, %v2478_v54  ;;  %v2482_v57 = vsel %vm2472_vm9, %v2468_v41, 1326507024 }
 0x1a8   : > { %v2475_v36 = vsel %vm2471_vm8, %v2459_v19, %v2474_v2  ;;  %v2480_v1 = vsel %vm2470_vm7, %v2477_v18, %v2479_v30  ;;  %v2483_v22 = vsel %vm2471_vm8, %v2465_v24, %v2482_v57  ;;  %vm1096_vm11 = vcmp.gt.s32.totalorder %v1095_v40, 0 }
 0x1a9   : > { %v4508_v39 = vpop.eup %4507  ;;  %vm4058_vm12 = vcmp.lt.s32.totalorder %v4057_v13, 0  ;;  %v2484_v50 = vsel %vm2470_vm7, %v2481_v43, %v2483_v22  ;;  %v5517_v45 = vmul.u32.u64.low %v5495_v47, %v2480_v1  ;;  %v5518_v7 = vmul.u32.u64.high %v5495_v47, %v2480_v1, %v5517_v45 }
 0x1aa   : > { %v4510_v12 = vpop.eup %4509  ;;  %v2641_v10 = vxor.u32 2147483648, %v4508_v39  ;;  %v844_v20 = vsel %vm4058_vm12, 0, %v4057_v13  ;;  %v5522_v48 = vmul.u32.u64.low %v5495_v47, %v2484_v50  ;;  %v5523_v26 = vmul.u32.u64.high %v5495_v47, %v2484_v50, %v5522_v48 }
 0x1ab   : > { %v2638_v42 = vxor.u32 2147483648, %v4510_v12  ;;  %v845_v6 = vsub.s32 32, %v844_v20  ;;  %v849_v63 = vsub.s32 4294967266, %v844_v20  ;;  %v2476_v4 = vsel %vm2470_vm7, %v2473_v46, %v2475_v36 }
 0x1ac   : > { %v2642_v19 = vsel %vm2640_vm2, %v2641_v10, %v4510_v12  ;;  %v846_v44 = vshll.u32 %v5489_v3, %v844_v20  ;;  %v1093_v61 = vor.u32 8388608, %v5507_v23  ;;  %v1097_v9 = vsel %vm1096_vm11, %v1095_v40, 0 }
 0x1ad   : > { %v2639_v62 = vsel %vm2637_vm3, %v4508_v39, %v2638_v42  ;;  %v847_v56 = vshrl.u32 %v829_v60, %v845_v6  ;;  %v850_v28 = vadd.s32 127, %v849_v63  ;;  %v2495_v53 = vadd.s32 1, %v5518_v7 }
 0x1ae   : > { %v2643_v49 = vsel %vm2636_vm5, %v2639_v62, %v2642_v19  ;;  %v860_v24 = vsel %vm775_vm6, %v859_v34, %v5475_v0  ;;  %v2492_v3 = vmul.u32 %v5495_v47, %v2476_v4  ;;  %vm2494_vm13 = vc.u32 %v5523_v26, %v5517_v45 }
 0x1af   : > { %v2644_v23 = vsel %vm2633_vm10, nan, %v2643_v49  ;;  %v848_v40 = vor.u32 %v847_v56, %v846_v44  ;;  %v851_v60 = vshll.u32 %v850_v28, 23  ;;  %v2496_v41 = vsel %vm2494_vm13, %v2495_v53, %v5518_v7 }
 0x1b0   : > { %3912 = vst [vmem:[%s5180_s6 + $0x98] sm:$0xff] %v2644_v23  ;;  %vm5550_vm14 = vcmp.le.f32.partialorder %v773_v15, 0.7853982  ;;  %v2497_v0 = vadd.s32 %v2496_v41, %v2492_v3  ;;  %v1099_v34 = vand.u32 31, %v1097_v9  ;;  %v5556_v2 = vshll.u32 %v1093_v61, 8 }
 0x1b1   : > { %v852_v47 = vor.u32 4788187, %v851_v60  ;;  %v862_v52 = vsel %vm5550_vm14, 0, %v860_v24  ;;  %v855_v32 = vcvt.s32.f32 %v848_v40  ;;  %v5558_v54 = vshrl.u32 %v1097_v9, 5 }
 0x1b2   : > { %v2498_v18 = vadd.s32 536870912, %v2497_v0  ;;  %v1100_v43 = vsub.s32 32, %v1099_v34  ;;  %v1102_v46 = vshll.u32 %v4684_v21, %v1099_v34  ;;  %v1105_v15 = vshll.u32 %v4685_v25, %v1099_v34 }
 0x1b3   : > { %v853_v13 = vand.u32 2147483647, %v852_v47  ;;  %v1108_v30 = vshll.u32 %v4686_v27, %v1099_v34  ;;  %v1111_v22 = vshll.u32 %v4687_v29, %v1099_v34  ;;  %v866_v10 = vadd.s32 3, %v862_v52 }
 0x1b4   : > { %v2499_v57 = vshrl.u32 %v2498_v18, 30  ;;  %v1103_v36 = vshrl.u32 %v4685_v25, %v1100_v43  ;;  %v1106_v1 = vshrl.u32 %v4686_v27, %v1100_v43  ;;  %v1109_v50 = vshrl.u32 %v4687_v29, %v1100_v43 }
 0x1b5   : > { %v856_v39 = vmul.f32 %v855_v32, %v853_v13  ;;  %v1112_v7 = vshrl.u32 %v4688_v31, %v1100_v43  ;;  %v1115_v12 = vshrl.u32 %v4689_v38, %v1100_v43  ;;  %v1114_v19 = vshll.u32 %v4688_v31, %v1099_v34  ;;  %v5607_v32 = vpop.f32.mrb[7].mxu1 }
 0x1b6   : > { %v2500_v20 = vshll.u32 %v2499_v57, 30  ;;  %v1104_v48 = vor.u32 %v1103_v36, %v1102_v46  ;;  %v1107_v42 = vor.u32 %v1106_v1, %v1105_v15  ;;  %v1110_v63 = vor.u32 %v1109_v50, %v1108_v30 }
 0x1b7   : > { %v857_v6 = vxor.u32 2147483648, %v856_v39  ;;  %v1113_v4 = vor.u32 %v1112_v7, %v1111_v22  ;;  %vm1117_vm15 = vcmp.lt.s32.totalorder %v5558_v54, 1  ;;  %vm1120_vm0 = vcmp.lt.s32.totalorder %v5558_v54, 4 }
 0x1b8   : > { %v5570_v44 = vsub.s32 %v2497_v0, %v2500_v20  ;;  %v5576_v61 = vadd.f32 %v5394_v33, %v5056_v55  ;;  %v1116_v62 = vor.u32 %v1115_v12, %v1114_v19  ;;  %v1125_v56 = vsel %vm1117_vm15, %v1104_v48, %v1107_v42 }
 0x1b9   : > { %v858_v9 = vsel %vm775_vm6, %v857_v6, %v856_v39  ;;  %v1126_v28 = vsel %vm1120_vm0, %v1113_v4, 920167782  ;;  %vm1118_vm1 = vcmp.lt.s32.totalorder %v5558_v54, 2  ;;  %vm1119_vm2 = vcmp.lt.s32.totalorder %v5558_v54, 3 }
 0x1ba   : > { %v861_v53 = vsel %vm5550_vm14, %v5224_v37, %v858_v9  ;;  %v2503_v49 = vsub.s32 0, %v5570_v44  ;;  %v2523_v55 = vsub.s32 4, %v2499_v57  ;;  %v1101_v24 = vshrl.u32 %v4684_v21, %v1100_v43 }
 0x1bb   : > { %4511 = vcosq.f32 %v861_v53  ;;  %v1127_v3 = vsel %vm1119_vm2, %v1110_v63, %v1126_v28  ;;  %v1122_v40 = vsel %vm1120_vm0, %v1110_v63, 2102212464  ;;  %v1129_v41 = vsel %vm1117_vm15, %v1107_v42, %v1110_v63 }
 0x1bc   : > { %4513 = vsinq.f32 %v861_v53  ;;  %v4120_v23 = vmin.u32 %v2503_v49, %v5570_v44  ;;  %v1128_v60 = vsel %vm1118_vm1, %v1125_v56, %v1127_v3  ;;  %v1130_v5 = vsel %vm1120_vm0, %v1116_v62, 1326507024 }
 0x1bd   : > { %v5603_v0 = vmul.u32.u64.low %v5556_v2, %v1128_v60  ;;  %v5604_v34 = vmul.u32.u64.high %v5556_v2, %v1128_v60, %v5603_v0  ;;  %v867_v47 = vand.u32 3, %v866_v10  ;;  %v1121_v18 = vsel %vm1117_vm15, %v1101_v24, %v1104_v48 }
 0x1be   : > { %v2505_v52 = vclz %v4120_v23  ;;  %v1123_v43 = vsel %vm1119_vm2, %v1107_v42, %v1122_v40  ;;  %v1131_v13 = vsel %vm1119_vm2, %v1113_v4, %v1130_v5  ;;  %v2752_v46 = vand.u32 2139095040, %v5576_v61 }
 0x1bf   : > { %vm5618_vm3 = vcmp.le.f32.partialorder %v2437_v16, 0.7853982  ;;  %vm2439_vm4 = vcmp.lt.s32.totalorder %v5398_v17, 0  ;;  %v1132_v36 = vsel %vm1118_vm1, %v1129_v41, %v1131_v13  ;;  %v2749_v50 = vand.u32 2147483647, %v5576_v61 }
 0x1c0   : > { %v4121_v30 = vadd.s32 4294967294, %v2505_v52  ;;  %v2524_v1 = vsel %vm2439_vm4, %v2523_v55, %v2499_v57  ;;  %v5628_v22 = vmul.u32.u64.low %v5556_v2, %v1132_v36  ;;  %v5629_v39 = vmul.u32.u64.high %v5556_v2, %v1132_v36, %v5628_v22 }
 0x1c1   : > { %vm865_vm5 = vweird.f32 %v5224_v37  ;;  %v1124_v16 = vsel %vm1118_vm1, %v1121_v18, %v1123_v43  ;;  %v1143_v7 = vadd.s32 1, %v5604_v34  ;;  %v2753_v12 = vshrl.u32 %v2752_v46, 23 }
 0x1c2   : > { %vm4122_vm6 = vcmp.lt.s32.totalorder %v4121_v30, 0  ;;  %vm868_vm7 = vcmp.lt.s32.totalorder %v867_v47, 2  ;;  %vm872_vm8 = vcmp.eq.s32.totalorder %v867_v47, 2  ;;  %v2493_v57 = vadd.s32 %v5517_v45, %v5523_v26 }
 0x1c3   : > { %v2508_v10 = vsel %vm4122_vm6, 0, %v4121_v30  ;;  %v2526_v42 = vsel %vm5618_vm3, 0, %v2524_v1  ;;  %v4131_v6 = vadd.s32 4294967169, %v2753_v12  ;;  %v1140_v54 = vmul.u32 %v5556_v2, %v1124_v16 }
 0x1c4   : > { %v2509_v20 = vsub.s32 32, %v2508_v10  ;;  %v2513_v48 = vsub.s32 4294967266, %v2508_v10  ;;  %v2510_v4 = vshll.u32 %v5570_v44, %v2508_v10  ;;  %vm1142_vm9 = vc.u32 %v5629_v39, %v5603_v0 }
 0x1c5   : > { %v4512_v63 = vpop.eup %4511  ;;  %v2756_v19 = vand.u32 8388607, %v2749_v50  ;;  %v1144_v56 = vsel %vm1142_vm9, %v1143_v7, %v5604_v34  ;;  %v2759_v49 = vadd.s32 1, %v4131_v6  ;;  %v5649_v44 = vadd.f32 %v5394_v33, %v5189_v14 }
 0x1c6   : > { %v4514_v9 = vpop.eup %4513  ;;  %v873_v45 = vxor.u32 2147483648, %v4512_v63  ;;  %v2511_v26 = vshrl.u32 %v2493_v57, %v2509_v20  ;;  %v2514_v62 = vadd.s32 127, %v2513_v48  ;;  %v1145_v53 = vadd.s32 %v1144_v56, %v1140_v54 }
 0x1c7   : > { %v870_v28 = vxor.u32 2147483648, %v4514_v9  ;;  %vm869_vm10 = vcmp.eq.s32.totalorder %v867_v47, 0  ;;  %v2530_v23 = vadd.s32 3, %v2526_v42  ;;  %vm2760_vm11 = vcmp.gt.s32.totalorder %v2759_v49, 0 }
 0x1c8   : > { %v874_v2 = vsel %vm872_vm8, %v873_v45, %v4514_v9  ;;  %v2512_v55 = vor.u32 %v2511_v26, %v2510_v4  ;;  %v2515_v24 = vshll.u32 %v2514_v62, 23  ;;  %v1146_v40 = vadd.s32 536870912, %v1145_v53 }
 0x1c9   : > { %v871_v3 = vsel %vm869_vm10, %v4512_v63, %v870_v28  ;;  %v2757_v5 = vor.u32 8388608, %v2756_v19  ;;  %v2761_v34 = vsel %vm2760_vm11, %v2759_v49, 0  ;;  %v984_v43 = vand.u32 2139095040, %v5649_v44 }
 0x1ca   : > { %v875_v60 = vsel %vm868_vm7, %v871_v3, %v874_v2  ;;  %v2516_v41 = vor.u32 4788187, %v2515_v24  ;;  %v1147_v14 = vshrl.u32 %v1146_v40, 30  ;;  %v2763_v18 = vand.u32 31, %v2761_v34 }
 0x1cb   : > { %v876_v52 = vsel %vm865_vm5, nan, %v875_v60  ;;  %v2519_v46 = vcvt.s32.f32 %v2512_v55  ;;  %vm1087_vm12 = vcmp.lt.s32.totalorder %v5402_v58, 0  ;;  %v5658_v30 = vand.u32 3, %v2530_v23 }
 0x1cc   : > { %3895 = vst [vmem:[%s5180_s6 + $0x10] sm:$0xff] %v876_v52  ;;  %v2517_v13 = vand.u32 2147483647, %v2516_v41  ;;  %vm5662_vm13 = vcmp.le.f32.partialorder %v1085_v51, 0.7853982  ;;  %v1148_v36 = vshll.u32 %v1147_v14, 30  ;;  %v1141_v16 = vadd.s32 %v5603_v0, %v5629_v39 }
 0x1cd   : > { %v2764_v37 = vsub.s32 32, %v2763_v18  ;;  %v981_v1 = vand.u32 2147483647, %v5649_v44  ;;  %v1171_v7 = vsub.s32 4, %v1147_v14  ;;  %v5669_v12 = vshll.u32 %v2757_v5, 8 }
 0x1ce   : > { %v2520_v22 = vmul.f32 %v2519_v46, %v2517_v13  ;;  %v5671_v57 = vsub.s32 %v1145_v53, %v1148_v36  ;;  %v5673_v10 = vshrl.u32 %v2761_v34, 5  ;;  %v985_v20 = vshrl.u32 %v984_v43, 23 }
 0x1cf   : > { %v2767_v51 = vshrl.u32 %v4685_v25, %v2764_v37  ;;  %v2766_v42 = vshll.u32 %v4684_v21, %v2763_v18  ;;  %v2770_v6 = vshrl.u32 %v4686_v27, %v2764_v37  ;;  %v2773_v63 = vshrl.u32 %v4687_v29, %v2764_v37 }
 0x1d0   : > { %v2521_v48 = vxor.u32 2147483648, %v2520_v22  ;;  %v1151_v4 = vsub.s32 0, %v5671_v57  ;;  %v2769_v0 = vshll.u32 %v4685_v25, %v2763_v18  ;;  %v2772_v39 = vshll.u32 %v4686_v27, %v2763_v18 }
 0x1d1   : > { %v2776_v54 = vshrl.u32 %v4688_v31, %v2764_v37  ;;  %v1172_v9 = vsel %vm1087_vm12, %v1171_v7, %v1147_v14  ;;  %v2768_v45 = vor.u32 %v2767_v51, %v2766_v42  ;;  %v2775_v26 = vshll.u32 %v4687_v29, %v2763_v18 }
 0x1d2   : > { %v2522_v19 = vsel %vm2439_vm4, %v2521_v48, %v2520_v22  ;;  %v4068_v56 = vmin.u32 %v1151_v4, %v5671_v57  ;;  %v2771_v28 = vor.u32 %v2770_v6, %v2769_v0  ;;  %v2774_v53 = vor.u32 %v2773_v63, %v2772_v39 }
 0x1d3   : > { %v2525_v62 = vsel %vm5618_vm3, %v5398_v17, %v2522_v19  ;;  %v2777_v49 = vor.u32 %v2776_v54, %v2775_v26  ;;  %v2778_v2 = vshll.u32 %v4688_v31, %v2763_v18  ;;  %v2779_v55 = vshrl.u32 %v4689_v38, %v2764_v37  ;;  %v5727_v19 = vpop.f32.mrb[8].mxu0 }
 0x1d4   : > { %4515 = vcosq.f32 %v2525_v62  ;;  %v1153_v24 = vclz %v4068_v56  ;;  %v4063_v3 = vadd.s32 4294967169, %v985_v20  ;;  %v5696_v23 = vand.u32 8388607, %v981_v1 }
 0x1d5   : > { %4517 = vsinq.f32 %v2525_v62  ;;  %v1174_v15 = vsel %vm5662_vm13, 0, %v1172_v9  ;;  %v2765_v40 = vshrl.u32 %v4684_v21, %v2764_v37  ;;  %v2780_v60 = vor.u32 %v2779_v55, %v2778_v2 }
 0x1d6   : > { %vm2781_vm14 = vcmp.lt.s32.totalorder %v5673_v10, 1  ;;  %v4069_v41 = vadd.s32 4294967294, %v1153_v24  ;;  %vm2783_vm15 = vcmp.lt.s32.totalorder %v5673_v10, 3  ;;  %vm2784_vm0 = vcmp.lt.s32.totalorder %v5673_v10, 4 }
 0x1d7   : > { %v2789_v5 = vsel %vm2781_vm14, %v2768_v45, %v2771_v28  ;;  %v2786_v34 = vsel %vm2784_vm0, %v2774_v53, 2102212464  ;;  %v2790_v52 = vsel %vm2784_vm0, %v2777_v49, 920167782  ;;  %v2793_v14 = vsel %vm2781_vm14, %v2771_v28, %v2774_v53 }
 0x1d8   : > { %v2794_v18 = vsel %vm2784_vm0, %v2780_v60, 1326507024  ;;  %vm4070_vm1 = vcmp.lt.s32.totalorder %v4069_v41, 0  ;;  %vm2782_vm2 = vcmp.lt.s32.totalorder %v5673_v10, 2  ;;  %v2791_v43 = vsel %vm2783_vm15, %v2774_v53, %v2790_v52 }
 0x1d9   : > { %v2795_v13 = vsel %vm2783_vm15, %v2777_v49, %v2794_v18  ;;  %vm2532_vm3 = vcmp.lt.s32.totalorder %v5658_v30, 2  ;;  %v1156_v46 = vsel %vm4070_vm1, 0, %v4069_v41  ;;  %v2785_v36 = vsel %vm2781_vm14, %v2765_v40, %v2768_v45 }
 0x1da   : > { %v2792_v37 = vsel %vm2782_vm2, %v2789_v5, %v2791_v43  ;;  %v2796_v22 = vsel %vm2782_vm2, %v2793_v14, %v2795_v13  ;;  %vm2529_vm4 = vweird.f32 %v5398_v17  ;;  %v1157_v7 = vsub.s32 32, %v1156_v46 }
 0x1db   : > { %v1161_v51 = vsub.s32 4294967266, %v1156_v46  ;;  %v2787_v20 = vsel %vm2783_vm15, %v2771_v28, %v2786_v34  ;;  %v991_v48 = vadd.s32 1, %v4063_v3  ;;  %v1158_v0 = vshll.u32 %v5671_v57, %v1156_v46 }
 0x1dc   : > { %v5718_v42 = vmul.u32.u64.low %v5669_v12, %v2796_v22  ;;  %v5719_v6 = vmul.u32.u64.high %v5669_v12, %v2796_v22, %v5718_v42  ;;  %v5722_v63 = vmul.u32.u64.low %v5669_v12, %v2792_v37  ;;  %v5723_v4 = vmul.u32.u64.high %v5669_v12, %v2792_v37, %v5722_v63 }
 0x1dd   : > { %v1159_v39 = vshrl.u32 %v1141_v16, %v1157_v7  ;;  %v1162_v54 = vadd.s32 127, %v1161_v51  ;;  %vm992_vm5 = vcmp.gt.s32.totalorder %v991_v48, 0  ;;  %vm2533_vm6 = vcmp.eq.s32.totalorder %v5658_v30, 0 }
 0x1de   : > { %v4516_v9 = vpop.eup %4515  ;;  %vm2536_vm7 = vcmp.eq.s32.totalorder %v5658_v30, 2  ;;  %v2788_v45 = vsel %vm2782_vm2, %v2785_v36, %v2787_v20  ;;  %v993_v26 = vsel %vm992_vm5, %v991_v48, 0  ;;  %v989_v57 = vor.u32 8388608, %v5696_v23 }
 0x1df   : > { %v4518_v62 = vpop.eup %4517  ;;  %v2537_v56 = vxor.u32 2147483648, %v4516_v9  ;;  %v1160_v28 = vor.u32 %v1159_v39, %v1158_v0  ;;  %v1163_v53 = vshll.u32 %v1162_v54, 23  ;;  %v1178_v49 = vadd.s32 3, %v1174_v15 }
 0x1e0   : > { %v2534_v16 = vxor.u32 2147483648, %v4518_v62  ;;  %vm2806_vm8 = vc.u32 %v5719_v6, %v5722_v63  ;;  %v2807_v2 = vadd.s32 1, %v5723_v4  ;;  %v2804_v10 = vmul.u32 %v5669_v12, %v2788_v45 }
 0x1e1   : > { %v2538_v55 = vsel %vm2536_vm7, %v2537_v56, %v4518_v62  ;;  %v1164_v24 = vor.u32 4788187, %v1163_v53  ;;  %v995_v3 = vand.u32 31, %v993_v26  ;;  %v1167_v60 = vcvt.s32.f32 %v1160_v28 }
 0x1e2   : > { %v2535_v40 = vsel %vm2533_vm6, %v4516_v9, %v2534_v16  ;;  %v2808_v41 = vsel %vm2806_vm8, %v2807_v2, %v5723_v4  ;;  %v5743_v23 = vadd.f32 %v5394_v33, %v5256_v8  ;;  %v5749_v14 = vand.u32 3, %v1178_v49 }
 0x1e3   : > { %v2539_v15 = vsel %vm2532_vm3, %v2535_v40, %v2538_v55  ;;  %v1165_v5 = vand.u32 2147483647, %v1164_v24  ;;  %v2809_v34 = vadd.s32 %v2808_v41, %v2804_v10  ;;  %v996_v52 = vsub.s32 32, %v995_v3 }
 0x1e4   : > { %v2540_v12 = vsel %vm2529_vm4, nan, %v2539_v15  ;;  %v994_v18 = vshrl.u32 %v993_v26, 5  ;;  %v998_v43 = vshll.u32 %v4684_v21, %v995_v3  ;;  %v1001_v36 = vshll.u32 %v4685_v25, %v995_v3 }
 0x1e5   : > { %3911 = vst [vmem:[%s5180_s6 + $0x90] sm:$0xff] %v2540_v12  ;;  %v1168_v13 = vmul.f32 %v1167_v60, %v1165_v5  ;;  %v2810_v46 = vadd.s32 536870912, %v2809_v34  ;;  %v999_v8 = vshrl.u32 %v4685_v25, %v996_v52  ;;  %v1002_v30 = vshrl.u32 %v4686_v27, %v996_v52 }
 0x1e6   : > { %v1004_v37 = vshll.u32 %v4686_v27, %v995_v3  ;;  %v1005_v22 = vshrl.u32 %v4687_v29, %v996_v52  ;;  %v1008_v17 = vshrl.u32 %v4688_v31, %v996_v52  ;;  %v1007_v48 = vshll.u32 %v4687_v29, %v995_v3 }
 0x1e7   : > { %v1169_v7 = vxor.u32 2147483648, %v1168_v13  ;;  %v2811_v51 = vshrl.u32 %v2810_v46, 30  ;;  %v1000_v20 = vor.u32 %v999_v8, %v998_v43  ;;  %v1003_v42 = vor.u32 %v1002_v30, %v1001_v36 }
 0x1e8   : > { %v1006_v4 = vor.u32 %v1005_v22, %v1004_v37  ;;  %v1010_v0 = vshll.u32 %v4688_v31, %v995_v3  ;;  %v1011_v39 = vshrl.u32 %v4689_v38, %v996_v52  ;;  %v1009_v45 = vor.u32 %v1008_v17, %v1007_v48 }
 0x1e9   : > { %v1170_v54 = vsel %vm1087_vm12, %v1169_v7, %v1168_v13  ;;  %v2812_v9 = vshll.u32 %v2811_v51, 30  ;;  %v5764_v26 = vshll.u32 %v989_v57, 8  ;;  %vm1013_vm9 = vcmp.lt.s32.totalorder %v994_v18, 1 }
 0x1ea   : > { %v1173_v62 = vsel %vm5662_vm13, %v5402_v58, %v1170_v54  ;;  %v1012_v56 = vor.u32 %v1011_v39, %v1010_v0  ;;  %v2648_v28 = vand.u32 2139095040, %v5743_v23  ;;  %vm1014_vm10 = vcmp.lt.s32.totalorder %v994_v18, 2 }
 0x1eb   : > { %4519 = vcosq.f32 %v1173_v62  ;;  %v5770_v53 = vsub.s32 %v2809_v34, %v2812_v9  ;;  %vm1016_vm11 = vcmp.lt.s32.totalorder %v994_v18, 4  ;;  %v997_v16 = vshrl.u32 %v4684_v21, %v996_v52 }
 0x1ec   : > { %4521 = vsinq.f32 %v1173_v62  ;;  %v1018_v49 = vsel %vm1016_vm11, %v1006_v4, 2102212464  ;;  %v1021_v57 = vsel %vm1013_vm9, %v1000_v20, %v1003_v42  ;;  %v2835_v55 = vsub.s32 4, %v2811_v51 }
 0x1ed   : > { %v2815_v2 = vsub.s32 0, %v5770_v53  ;;  %vm1015_vm12 = vcmp.lt.s32.totalorder %v994_v18, 3  ;;  %v1022_v47 = vsel %vm1016_vm11, %v1009_v45, 920167782  ;;  %v1017_v24 = vsel %vm1013_vm9, %v997_v16, %v1000_v20  ;;  %v5804_v18 = vpop.f32.mrb[8].mxu1 }
 0x1ee   : > { %v1023_v10 = vsel %vm1015_vm12, %v1006_v4, %v1022_v47  ;;  %v1025_v3 = vsel %vm1013_vm9, %v1003_v42, %v1006_v4  ;;  %v1026_v40 = vsel %vm1016_vm11, %v1012_v56, 1326507024  ;;  %v1019_v41 = vsel %vm1015_vm12, %v1003_v42, %v1018_v49 }
 0x1ef   : > { %v4132_v60 = vmin.u32 %v2815_v2, %v5770_v53  ;;  %v1024_v15 = vsel %vm1014_vm10, %v1021_v57, %v1023_v10  ;;  %v1027_v5 = vsel %vm1015_vm12, %v1009_v45, %v1026_v40  ;;  %vm2751_vm13 = vcmp.lt.s32.totalorder %v5576_v61, 0 }
 0x1f0   : > { %v1028_v34 = vsel %vm1014_vm10, %v1025_v3, %v1027_v5  ;;  %v5782_v52 = vmul.u32.u64.low %v5764_v26, %v1024_v15  ;;  %v5783_v12 = vmul.u32.u64.high %v5764_v26, %v1024_v15, %v5782_v52  ;;  %v2836_v13 = vsel %vm2751_vm13, %v2835_v55, %v2811_v51 }
 0x1f1   : > { %v2817_v43 = vclz %v4132_v60  ;;  %v2645_v46 = vand.u32 2147483647, %v5743_v23  ;;  %v1020_v8 = vsel %vm1014_vm10, %v1017_v24, %v1019_v41  ;;  %v2649_v37 = vshrl.u32 %v2648_v28, 23 }
 0x1f2   : > { %v5790_v36 = vmul.u32.u64.low %v5764_v26, %v1028_v34  ;;  %v5791_v30 = vmul.u32.u64.high %v5764_v26, %v1028_v34, %v5790_v36  ;;  %vm1180_vm14 = vcmp.lt.s32.totalorder %v5749_v14, 2  ;;  %vm5796_vm15 = vcmp.le.f32.partialorder %v2749_v50, 0.7853982 }
 0x1f3   : > { %v4133_v17 = vadd.s32 4294967294, %v2817_v43  ;;  %v5802_v7 = vadd.f32 %v5394_v33, %v5383_v11  ;;  %vm1181_vm0 = vcmp.eq.s32.totalorder %v5749_v14, 0  ;;  %vm1184_vm1 = vcmp.eq.s32.totalorder %v5749_v14, 2 }
 0x1f4   : > { %v1039_v51 = vadd.s32 1, %v5783_v12  ;;  %v4127_v20 = vadd.s32 4294967169, %v2649_v37  ;;  %v2805_v50 = vadd.s32 %v5722_v63, %v5719_v6  ;;  %v2838_v42 = vsel %vm5796_vm15, 0, %v2836_v13 }
 0x1f5   : > { %v4520_v48 = vpop.eup %4519  ;;  %vm4134_vm2 = vcmp.lt.s32.totalorder %v4133_v17, 0  ;;  %v1036_v11 = vmul.u32 %v5764_v26, %v1020_v8  ;;  %vm1038_vm3 = vc.u32 %v5791_v30, %v5782_v52  ;;  %v2652_v39 = vand.u32 8388607, %v2645_v46 }
 0x1f6   : > { %v4522_v33 = vpop.eup %4521  ;;  %v1185_v4 = vxor.u32 2147483648, %v4520_v48  ;;  %v2820_v0 = vsel %vm4134_vm2, 0, %v4133_v17  ;;  %v1296_v62 = vand.u32 2139095040, %v5802_v7  ;;  %v1040_v26 = vsel %vm1038_vm3, %v1039_v51, %v5783_v12 }
 0x1f7   : > { %v1182_v54 = vxor.u32 2147483648, %v4522_v33  ;;  %v2821_v9 = vsub.s32 32, %v2820_v0  ;;  %v2825_v45 = vsub.s32 4294967266, %v2820_v0  ;;  %v2822_v63 = vshll.u32 %v5770_v53, %v2820_v0 }
 0x1f8   : > { %v1186_v6 = vsel %vm1184_vm1, %v1185_v4, %v4522_v33  ;;  %v2655_v56 = vadd.s32 1, %v4127_v20  ;;  %v1041_v57 = vadd.s32 %v1040_v26, %v1036_v11  ;;  %vm1177_vm4 = vweird.f32 %v5402_v58 }
 0x1f9   : > { %v1183_v28 = vsel %vm1181_vm0, %v4520_v48, %v1182_v54  ;;  %v2823_v16 = vshrl.u32 %v2805_v50, %v2821_v9  ;;  %v2826_v49 = vadd.s32 127, %v2825_v45  ;;  %v2842_v55 = vadd.s32 3, %v2838_v42 }
 0x1fa   : > { %v1187_v2 = vsel %vm1180_vm14, %v1183_v28, %v1186_v6  ;;  %vm2656_vm5 = vcmp.gt.s32.totalorder %v2655_v56, 0  ;;  %v1042_v53 = vadd.s32 536870912, %v1041_v57  ;;  %v2653_v3 = vor.u32 8388608, %v2652_v39 }
 0x1fb   : > { %v1188_v47 = vsel %vm1177_vm4, nan, %v1187_v2  ;;  %v2824_v24 = vor.u32 %v2823_v16, %v2822_v63  ;;  %v2827_v10 = vshll.u32 %v2826_v49, 23  ;;  %v2657_v40 = vsel %vm2656_vm5, %v2655_v56, 0 }
 0x1fc   : > { %3898 = vst [vmem:[%s5180_s6 + $0x28] sm:$0xff] %v1188_v47  ;;  %v1043_v41 = vshrl.u32 %v1042_v53, 30  ;;  %v1297_v15 = vshrl.u32 %v1296_v62, 23  ;;  %v2659_v5 = vand.u32 31, %v2657_v40  ;;  %v5828_v43 = vand.u32 3, %v2842_v55 }
 0x1fd   : > { %v2828_v60 = vor.u32 4788187, %v2827_v10  ;;  %v2831_v12 = vcvt.s32.f32 %v2824_v24  ;;  %vm983_vm6 = vcmp.lt.s32.totalorder %v5649_v44, 0  ;;  %v5832_v14 = vadd.s32 %v5782_v52, %v5791_v30 }
 0x1fe   : > { %v1044_v58 = vshll.u32 %v1043_v41, 30  ;;  %v2660_v13 = vsub.s32 32, %v2659_v5  ;;  %v5834_v8 = vshll.u32 %v2653_v3, 8  ;;  %v1293_v36 = vand.u32 2147483647, %v5802_v7 }
 0x1ff   : > { %v2829_v34 = vand.u32 2147483647, %v2828_v60  ;;  %v5839_v51 = vshrl.u32 %v2657_v40, 5  ;;  %v4075_v20 = vadd.s32 4294967169, %v1297_v15  ;;  %v1067_v48 = vsub.s32 4, %v1043_v41 }
 0x200   : > { %v5837_v17 = vsub.s32 %v1041_v57, %v1044_v58  ;;  %v2662_v50 = vshll.u32 %v4684_v21, %v2659_v5  ;;  %v2663_v42 = vshrl.u32 %v4685_v25, %v2660_v13  ;;  %v2666_v11 = vshrl.u32 %v4686_v27, %v2660_v13  ;;  %v5886_v58 = vpop.f32.mrb[9].mxu0 }
 0x201   : > { %v2832_v37 = vmul.f32 %v2831_v12, %v2829_v34  ;;  %vm5846_vm7 = vcmp.le.f32.partialorder %v981_v1, 0.7853982  ;;  %v2665_v4 = vshll.u32 %v4685_v25, %v2659_v5  ;;  %v2669_v0 = vshrl.u32 %v4687_v29, %v2660_v13 }
 0x202   : > { %v1047_v33 = vsub.s32 0, %v5837_v17  ;;  %v2664_v39 = vor.u32 %v2663_v42, %v2662_v50  ;;  %v2668_v54 = vshll.u32 %v4686_v27, %v2659_v5  ;;  %v2671_v9 = vshll.u32 %v4687_v29, %v2659_v5 }
 0x203   : > { %v2833_v52 = vxor.u32 2147483648, %v2832_v37  ;;  %v2672_v45 = vshrl.u32 %v4688_v31, %v2660_v13  ;;  %v2667_v6 = vor.u32 %v2666_v11, %v2665_v4  ;;  %v2674_v63 = vshll.u32 %v4688_v31, %v2659_v5 }
 0x204   : > { %v4064_v1 = vmin.u32 %v1047_v33, %v5837_v17  ;;  %v2670_v56 = vor.u32 %v2669_v0, %v2668_v54  ;;  %v2675_v16 = vshrl.u32 %v4689_v38, %v2660_v13  ;;  %vm2677_vm8 = vcmp.lt.s32.totalorder %v5839_v51, 1 }
 0x205   : > { %v2834_v62 = vsel %vm2751_vm13, %v2833_v52, %v2832_v37  ;;  %v2673_v28 = vor.u32 %v2672_v45, %v2671_v9  ;;  %v1303_v57 = vadd.s32 1, %v4075_v20  ;;  %v1068_v2 = vsel %vm983_vm6, %v1067_v48, %v1043_v41 }
 0x206   : > { %v2837_v26 = vsel %vm5796_vm15, %v5576_v61, %v2834_v62  ;;  %v1049_v49 = vclz %v4064_v1  ;;  %v2661_v55 = vshrl.u32 %v4684_v21, %v2660_v13  ;;  %v2676_v47 = vor.u32 %v2675_v16, %v2674_v63 }
 0x207   : > { %4523 = vcosq.f32 %v2837_v26  ;;  %vm2679_vm9 = vcmp.lt.s32.totalorder %v5839_v51, 3  ;;  %vm2680_vm10 = vcmp.lt.s32.totalorder %v5839_v51, 4  ;;  %v2685_v22 = vsel %vm2677_vm8, %v2664_v39, %v2667_v6 }
 0x208   : > { %4525 = vsinq.f32 %v2837_v26  ;;  %v4065_v24 = vadd.s32 4294967294, %v1049_v49  ;;  %v2682_v10 = vsel %vm2680_vm10, %v2670_v56, 2102212464  ;;  %v2686_v53 = vsel %vm2680_vm10, %v2673_v28, 920167782 }
 0x209   : > { %v2689_v3 = vsel %vm2677_vm8, %v2667_v6, %v2670_v56  ;;  %v2690_v40 = vsel %vm2680_vm10, %v2676_v47, 1326507024  ;;  %vm2678_vm12 = vcmp.lt.s32.totalorder %v5839_v51, 2  ;;  %v2687_v60 = vsel %vm2679_vm9, %v2670_v56, %v2686_v53  ;;  %v5916_v51 = vld [vmem:[%s7596_s2] ss:$0 sm:$0xff] }
 0x20a   : > { %vm4066_vm11 = vcmp.lt.s32.totalorder %v4065_v24, 0  ;;  %v2691_v41 = vsel %vm2679_vm9, %v2673_v28, %v2690_v40  ;;  %vm2845_vm13 = vcmp.eq.s32.totalorder %v5828_v43, 0  ;;  %v1070_v5 = vsel %vm5846_vm7, 0, %v1068_v2 }
 0x20b   : > { %v1052_v15 = vsel %vm4066_vm11, 0, %v4065_v24  ;;  %v2688_v34 = vsel %vm2678_vm12, %v2685_v22, %v2687_v60  ;;  %v2692_v12 = vsel %vm2678_vm12, %v2689_v3, %v2691_v41  ;;  %vm2844_vm14 = vcmp.lt.s32.totalorder %v5828_v43, 2 }
 0x20c   : > { %v1053_v13 = vsub.s32 32, %v1052_v15  ;;  %v1057_v37 = vsub.s32 4294967266, %v1052_v15  ;;  %v2681_v20 = vsel %vm2677_vm8, %v2661_v55, %v2664_v39  ;;  %v2683_v48 = vsel %vm2679_vm9, %v2667_v6, %v2682_v10 }
 0x20d   : > { %vm2841_vm15 = vweird.f32 %v5576_v61  ;;  %v5895_v50 = vmul.u32.u64.low %v5834_v8, %v2692_v12  ;;  %v5896_v42 = vmul.u32.u64.high %v5834_v8, %v2692_v12, %v5895_v50  ;;  %v1054_v33 = vshll.u32 %v5837_v17, %v1052_v15 }
 0x20e   : > { %v5899_v11 = vmul.u32.u64.low %v5834_v8, %v2688_v34  ;;  %v5900_v52 = vmul.u32.u64.high %v5834_v8, %v2688_v34, %v5899_v11  ;;  %v1055_v4 = vshrl.u32 %v5832_v14, %v1053_v13  ;;  %v1058_v0 = vadd.s32 127, %v1057_v37 }
 0x20f   : > { %vm1304_vm0 = vcmp.gt.s32.totalorder %v1303_v57, 0  ;;  %v1074_v39 = vadd.s32 3, %v1070_v5  ;;  %v2684_v54 = vsel %vm2678_vm12, %v2681_v20, %v2683_v48  ;;  %v1300_v9 = vand.u32 8388607, %v1293_v36 }
 0x210   : > { %v1305_v45 = vsel %vm1304_vm0, %v1303_v57, 0  ;;  %vm2848_vm1 = vcmp.eq.s32.totalorder %v5828_v43, 2  ;;  %v1056_v1 = vor.u32 %v1055_v4, %v1054_v33  ;;  %v1059_v6 = vshll.u32 %v1058_v0, 23 }
 0x211   : > { %v4524_v62 = vpop.eup %4523  ;;  %v1307_v63 = vand.u32 31, %v1305_v45  ;;  %vm2702_vm2 = vc.u32 %v5896_v42, %v5899_v11  ;;  %v2703_v14 = vadd.s32 1, %v5900_v52  ;;  %v5920_v56 = vadd.f32 %v5916_v51, %v5432_v35 }
 0x212   : > { %v4526_v26 = vpop.eup %4525  ;;  %v2849_v17 = vxor.u32 2147483648, %v4524_v62  ;;  %v1060_v16 = vor.u32 4788187, %v1059_v6  ;;  %v2700_v49 = vmul.u32 %v5834_v8, %v2684_v54  ;;  %v5923_v55 = vand.u32 3, %v1074_v39 }
 0x213   : > { %v2846_v28 = vxor.u32 2147483648, %v4526_v26  ;;  %v1308_v57 = vsub.s32 32, %v1307_v63  ;;  %v2704_v47 = vsel %vm2702_vm2, %v2703_v14, %v5900_v52  ;;  %v1301_v24 = vor.u32 8388608, %v1300_v9 }
 0x214   : > { %v2850_v2 = vsel %vm2848_vm1, %v2849_v17, %v4526_v26  ;;  %v1061_v10 = vand.u32 2147483647, %v1060_v16  ;;  %v1063_v53 = vcvt.s32.f32 %v1056_v1  ;;  %v2705_v3 = vadd.s32 %v2704_v47, %v2700_v49 }
 0x215   : > { %v2847_v22 = vsel %vm2845_vm13, %v4524_v62, %v2846_v28  ;;  %v1310_v40 = vshll.u32 %v4684_v21, %v1307_v63  ;;  %v1311_v8 = vshrl.u32 %v4685_v25, %v1308_v57  ;;  %v1314_v60 = vshrl.u32 %v4686_v27, %v1308_v57 }
 0x216   : > { %v2851_v35 = vsel %vm2844_vm14, %v2847_v22, %v2850_v2  ;;  %v1064_v15 = vmul.f32 %v1063_v53, %v1061_v10  ;;  %v2706_v5 = vadd.s32 536870912, %v2705_v3  ;;  %v1317_v34 = vshrl.u32 %v4687_v29, %v1308_v57 }
 0x217   : > { %v2852_v41 = vsel %vm2841_vm15, nan, %v2851_v35  ;;  %v1306_v12 = vshrl.u32 %v1305_v45, 5  ;;  %v1313_v13 = vshll.u32 %v4685_v25, %v1307_v63  ;;  %v1316_v43 = vshll.u32 %v4686_v27, %v1307_v63 }
 0x218   : > { %3914 = vst [vmem:[%s5180_s6 + $0xa8] sm:$0xff] %v2852_v41  ;;  %v1320_v37 = vshrl.u32 %v4688_v31, %v1308_v57  ;;  %v1065_v20 = vxor.u32 2147483648, %v1064_v15  ;;  %v2707_v48 = vshrl.u32 %v2706_v5, 30  ;;  %v1312_v50 = vor.u32 %v1311_v8, %v1310_v40 }
 0x219   : > { %v1319_v52 = vshll.u32 %v4687_v29, %v1307_v63  ;;  %v1315_v33 = vor.u32 %v1314_v60, %v1313_v13  ;;  %v1318_v61 = vor.u32 %v1317_v34, %v1316_v43  ;;  %v1322_v4 = vshll.u32 %v4688_v31, %v1307_v63  ;;  %v5962_v60 = vpop.f32.mrb[9].mxu1 }
 0x21a   : > { %v1323_v0 = vshrl.u32 %v4689_v38, %v1308_v57  ;;  %v1066_v39 = vsel %vm983_vm6, %v1065_v20, %v1064_v15  ;;  %v2708_v54 = vshll.u32 %v2707_v48, 30  ;;  %v5945_v45 = vshll.u32 %v1301_v24, 8 }
 0x21b   : > { %v1321_v9 = vor.u32 %v1320_v37, %v1319_v52  ;;  %v1069_v62 = vsel %vm5846_vm7, %v5649_v44, %v1066_v39  ;;  %v1309_v1 = vshrl.u32 %v4684_v21, %v1308_v57  ;;  %v2960_v26 = vand.u32 2139095040, %v5920_v56 }
 0x21c   : > { %v1324_v6 = vor.u32 %v1323_v0, %v1322_v4  ;;  %4527 = vcosq.f32 %v1069_v62  ;;  %v5952_v63 = vsub.s32 %v2705_v3, %v2708_v54  ;;  %vm1325_vm3 = vcmp.lt.s32.totalorder %v1306_v12, 1 }
 0x21d   : > { %vm1328_vm4 = vcmp.lt.s32.totalorder %v1306_v12, 4  ;;  %4529 = vsinq.f32 %v1069_v62  ;;  %vm1326_vm5 = vcmp.lt.s32.totalorder %v1306_v12, 2  ;;  %v1333_v14 = vsel %vm1325_vm3, %v1312_v50, %v1315_v33 }
 0x21e   : > { %v1330_v17 = vsel %vm1328_vm4, %v1318_v61, 2102212464  ;;  %v2711_v28 = vsub.s32 0, %v5952_v63  ;;  %v2731_v16 = vsub.s32 4, %v2707_v48  ;;  %vm1327_vm6 = vcmp.lt.s32.totalorder %v1306_v12, 3 }
 0x21f   : > { %v1334_v30 = vsel %vm1328_vm4, %v1321_v9, 920167782  ;;  %v1329_v49 = vsel %vm1325_vm3, %v1309_v1, %v1312_v50  ;;  %v1337_v57 = vsel %vm1325_vm3, %v1315_v33, %v1318_v61  ;;  %v1338_v47 = vsel %vm1328_vm4, %v1324_v6, 1326507024 }
 0x220   : > { %v1335_v2 = vsel %vm1327_vm6, %v1318_v61, %v1334_v30  ;;  %v4128_v24 = vmin.u32 %v2711_v28, %v5952_v63  ;;  %v1331_v22 = vsel %vm1327_vm6, %v1315_v33, %v1330_v17  ;;  %v1339_v53 = vsel %vm1327_vm6, %v1321_v9, %v1338_v47 }
 0x221   : > { %v1336_v10 = vsel %vm1326_vm5, %v1333_v14, %v1335_v2  ;;  %v1340_v3 = vsel %vm1326_vm5, %v1337_v57, %v1339_v53  ;;  %v2961_v8 = vshrl.u32 %v2960_v26, 23  ;;  %vm5966_vm7 = vcmp.le.f32.partialorder %v2645_v46, 0.7853982 }
 0x222   : > { %v5959_v35 = vmul.u32.u64.low %v5945_v45, %v1336_v10  ;;  %v5960_v40 = vmul.u32.u64.high %v5945_v45, %v1336_v10, %v5959_v35  ;;  %vm2647_vm8 = vcmp.lt.s32.totalorder %v5743_v23, 0  ;;  %v2713_v15 = vclz %v4128_v24 }
 0x223   : > { %vm1073_vm9 = vweird.f32 %v5649_v44  ;;  %v2732_v5 = vsel %vm2647_vm8, %v2731_v16, %v2707_v48  ;;  %v5975_v34 = vmul.u32.u64.low %v5945_v45, %v1340_v3  ;;  %v5976_v13 = vmul.u32.u64.high %v5945_v45, %v1340_v3, %v5975_v34 }
 0x224   : > { %v4139_v43 = vadd.s32 4294967169, %v2961_v8  ;;  %v4129_v37 = vadd.s32 4294967294, %v2713_v15  ;;  %v1332_v20 = vsel %vm1326_vm5, %v1329_v49, %v1331_v22  ;;  %v2957_v46 = vand.u32 2147483647, %v5920_v56 }
 0x225   : > { %v5982_v50 = vadd.f32 %v5916_v51, %v5525_v59  ;;  %vm1076_vm10 = vcmp.lt.s32.totalorder %v5923_v55, 2  ;;  %vm1077_vm11 = vcmp.eq.s32.totalorder %v5923_v55, 0  ;;  %v1351_v48 = vadd.s32 1, %v5960_v40 }
 0x226   : > { %v2967_v52 = vadd.s32 1, %v4139_v43  ;;  %v4528_v33 = vpop.eup %4527  ;;  %vm1080_vm12 = vcmp.eq.s32.totalorder %v5923_v55, 2  ;;  %v2701_v12 = vadd.s32 %v5899_v11, %v5896_v42  ;;  %vm4130_vm13 = vcmp.lt.s32.totalorder %v4129_v37, 0 }
 0x227   : > { %v2734_v61 = vsel %vm5966_vm7, 0, %v2732_v5  ;;  %v4530_v4 = vpop.eup %4529  ;;  %v1081_v59 = vxor.u32 2147483648, %v4528_v33  ;;  %v2716_v0 = vsel %vm4130_vm13, 0, %v4129_v37  ;;  %v1348_v39 = vmul.u32 %v5945_v45, %v1332_v20 }
 0x228   : > { %vm1350_vm14 = vc.u32 %v5976_v13, %v5959_v35  ;;  %v1078_v54 = vxor.u32 2147483648, %v4530_v4  ;;  %v2717_v9 = vsub.s32 32, %v2716_v0  ;;  %v2721_v62 = vsub.s32 4294967266, %v2716_v0 }
 0x229   : > { %v2964_v1 = vand.u32 8388607, %v2957_v46  ;;  %v1082_v6 = vsel %vm1080_vm12, %v1081_v59, %v4530_v4  ;;  %v2718_v42 = vshll.u32 %v5952_v63, %v2716_v0  ;;  %v1352_v11 = vsel %vm1350_vm14, %v1351_v48, %v5960_v40 }
 0x22a   : > { %vm2968_vm15 = vcmp.gt.s32.totalorder %v2967_v52, 0  ;;  %v1079_v26 = vsel %vm1077_vm11, %v4528_v33, %v1078_v54  ;;  %v2719_v17 = vshrl.u32 %v2701_v12, %v2717_v9  ;;  %v2722_v45 = vadd.s32 127, %v2721_v62 }
 0x22b   : > { %v1353_v14 = vadd.s32 %v1352_v11, %v1348_v39  ;;  %v1083_v28 = vsel %vm1076_vm10, %v1079_v26, %v1082_v6  ;;  %v2738_v16 = vadd.s32 3, %v2734_v61  ;;  %v2969_v30 = vsel %vm2968_vm15, %v2967_v52, 0 }
 0x22c   : > { %v1189_v49 = vand.u32 2147483647, %v5982_v50  ;;  %v1084_v2 = vsel %vm1073_vm9, nan, %v1083_v28  ;;  %v2720_v63 = vor.u32 %v2719_v17, %v2718_v42  ;;  %v2723_v57 = vshll.u32 %v2722_v45, 23 }
 0x22d   : > { %v1354_v47 = vadd.s32 536870912, %v1353_v14  ;;  %3897 = vst [vmem:[%s5180_s6 + $0x20] sm:$0xff] %v1084_v2  ;;  %v2965_v24 = vor.u32 8388608, %v2964_v1  ;;  %v2971_v22 = vand.u32 31, %v2969_v30  ;;  %v6008_v3 = vand.u32 3, %v2738_v16 }
 0x22e   : > { %v2724_v10 = vor.u32 4788187, %v2723_v57  ;;  %v1192_v40 = vand.u32 2139095040, %v5982_v50  ;;  %v6013_v8 = vand.u32 8388607, %v1189_v49  ;;  %v2727_v15 = vcvt.s32.f32 %v2720_v63 }
 0x22f   : > { %v6006_v53 = vshrl.u32 %v1354_v47, 30  ;;  %v2972_v55 = vsub.s32 32, %v2971_v22  ;;  %v6016_v5 = vadd.s32 %v5959_v35, %v5976_v13  ;;  %v6022_v48 = vshll.u32 %v2965_v24, 8 }
 0x230   : > { %v2725_v44 = vand.u32 2147483647, %v2724_v10  ;;  %v2974_v12 = vshll.u32 %v4684_v21, %v2971_v22  ;;  %v2970_v4 = vshrl.u32 %v2969_v30, 5  ;;  %v2977_v35 = vshll.u32 %v4685_v25, %v2971_v22 }
 0x231   : > { %v1356_v34 = vshll.u32 %v6006_v53, 30  ;;  %v2975_v43 = vshrl.u32 %v4685_v25, %v2972_v55  ;;  %v2978_v37 = vshrl.u32 %v4686_v27, %v2972_v55  ;;  %v2981_v20 = vshrl.u32 %v4687_v29, %v2972_v55 }
 0x232   : > { %v2728_v52 = vmul.f32 %v2727_v15, %v2725_v44  ;;  %v2984_v61 = vshrl.u32 %v4688_v31, %v2972_v55  ;;  %v2980_v13 = vshll.u32 %v4686_v27, %v2971_v22  ;;  %v1193_v59 = vshrl.u32 %v1192_v40, 23 }
 0x233   : > { %v6024_v33 = vsub.s32 %v1353_v14, %v1356_v34  ;;  %v2976_v54 = vor.u32 %v2975_v43, %v2974_v12  ;;  %v2983_v9 = vshll.u32 %v4687_v29, %v2971_v22  ;;  %v2979_v62 = vor.u32 %v2978_v37, %v2977_v35 }
 0x234   : > { %v2729_v0 = vxor.u32 2147483648, %v2728_v52  ;;  %v2982_v1 = vor.u32 %v2981_v20, %v2980_v13  ;;  %v2986_v6 = vshll.u32 %v4688_v31, %v2971_v22  ;;  %v2987_v42 = vshrl.u32 %v4689_v38, %v2972_v55 }
 0x235   : > { %v1359_v39 = vsub.s32 0, %v6024_v33  ;;  %v2985_v17 = vor.u32 %v2984_v61, %v2983_v9  ;;  %v1197_v45 = vor.u32 8388608, %v6013_v8  ;;  %v2973_v28 = vshrl.u32 %v4684_v21, %v2972_v55 }
 0x236   : > { %v2730_v11 = vsel %vm2647_vm8, %v2729_v0, %v2728_v52  ;;  %v2988_v16 = vor.u32 %v2987_v42, %v2986_v6  ;;  %v4071_v30 = vadd.s32 4294967169, %v1193_v59  ;;  %vm2989_vm0 = vcmp.lt.s32.totalorder %v2970_v4, 1 }
 0x237   : > { %v4076_v26 = vmin.u32 %v1359_v39, %v6024_v33  ;;  %v2733_v14 = vsel %vm5966_vm7, %v5743_v23, %v2730_v11  ;;  %vm2992_vm1 = vcmp.lt.s32.totalorder %v2970_v4, 4  ;;  %vm1295_vm2 = vcmp.lt.s32.totalorder %v5802_v7, 0  ;;  %v6057_v39 = vpop.f32.mrb[10].mxu0 }
 0x238   : > { %4531 = vcosq.f32 %v2733_v14  ;;  %vm2990_vm3 = vcmp.lt.s32.totalorder %v2970_v4, 2  ;;  %v2994_v63 = vsel %vm2992_vm1, %v2982_v1, 2102212464  ;;  %v2997_v57 = vsel %vm2989_vm0, %v2976_v54, %v2979_v62 }
 0x239   : > { %v1361_v2 = vclz %v4076_v26  ;;  %4533 = vsinq.f32 %v2733_v14  ;;  %vm2991_vm4 = vcmp.lt.s32.totalorder %v2970_v4, 3  ;;  %v2998_v24 = vsel %vm2992_vm1, %v2985_v17, 920167782 }
 0x23a   : > { %v3001_v22 = vsel %vm2989_vm0, %v2979_v62, %v2982_v1  ;;  %v2993_v41 = vsel %vm2989_vm0, %v2973_v28, %v2976_v54  ;;  %v2999_v10 = vsel %vm2991_vm4, %v2982_v1, %v2998_v24  ;;  %v3002_v40 = vsel %vm2992_vm1, %v2988_v16, 1326507024 }
 0x23b   : > { %v4077_v47 = vadd.s32 4294967294, %v1361_v2  ;;  %v1199_v55 = vadd.s32 1, %v4071_v30  ;;  %v2995_v8 = vsel %vm2991_vm4, %v2979_v62, %v2994_v63  ;;  %v3000_v44 = vsel %vm2990_vm3, %v2997_v57, %v2999_v10 }
 0x23c   : > { %v3003_v15 = vsel %vm2991_vm4, %v2985_v17, %v3002_v40  ;;  %v6046_v37 = vmul.u32.u64.low %v6022_v48, %v3000_v44  ;;  %v6047_v20 = vmul.u32.u64.high %v6022_v48, %v3000_v44, %v6046_v37  ;;  %v1379_v61 = vsub.s32 4, %v6006_v53 }
 0x23d   : > { %vm4078_vm5 = vcmp.lt.s32.totalorder %v4077_v47, 0  ;;  %v3004_v43 = vsel %vm2990_vm3, %v3001_v22, %v3003_v15  ;;  %vm1200_vm6 = vcmp.gt.s32.totalorder %v1199_v55, 0  ;;  %vm2737_vm7 = vweird.f32 %v5743_v23 }
 0x23e   : > { %v1364_v34 = vsel %vm4078_vm5, 0, %v4077_v47  ;;  %v2996_v35 = vsel %vm2990_vm3, %v2993_v41, %v2995_v8  ;;  %v6054_v13 = vmul.u32.u64.low %v6022_v48, %v3004_v43  ;;  %v6055_v59 = vmul.u32.u64.high %v6022_v48, %v3004_v43, %v6054_v13 }
 0x23f   : > { %v1365_v52 = vsub.s32 32, %v1364_v34  ;;  %v1369_v12 = vsub.s32 4294967266, %v1364_v34  ;;  %v1201_v0 = vsel %vm1200_vm6, %v1199_v55, 0  ;;  %v1366_v54 = vshll.u32 %v6024_v33, %v1364_v34 }
 0x240   : > { %v1203_v1 = vand.u32 31, %v1201_v0  ;;  %vm2740_vm8 = vcmp.lt.s32.totalorder %v6008_v3, 2  ;;  %vm2741_vm9 = vcmp.eq.s32.totalorder %v6008_v3, 0  ;;  %vm6065_vm10 = vcmp.le.f32.partialorder %v1293_v36, 0.7853982 }
 0x241   : > { %v1367_v9 = vshrl.u32 %v6016_v5, %v1365_v52  ;;  %v1370_v62 = vadd.s32 127, %v1369_v12  ;;  %v3015_v6 = vadd.s32 1, %v6047_v20  ;;  %vm2744_vm11 = vcmp.eq.s32.totalorder %v6008_v3, 2 }
 0x242   : > { %v4532_v42 = vpop.eup %4531  ;;  %v1380_v5 = vsel %vm1295_vm2, %v1379_v61, %v6006_v53  ;;  %v3012_v14 = vmul.u32 %v6022_v48, %v2996_v35  ;;  %vm3014_vm12 = vc.u32 %v6055_v59, %v6046_v37  ;;  %v1204_v36 = vsub.s32 32, %v1203_v1 }
 0x243   : > { %v1368_v33 = vor.u32 %v1367_v9, %v1366_v54  ;;  %v1371_v11 = vshll.u32 %v1370_v62, 23  ;;  %v4534_v26 = vpop.eup %4533  ;;  %v2745_v17 = vxor.u32 2147483648, %v4532_v42  ;;  %v3016_v30 = vsel %vm3014_vm12, %v3015_v6, %v6047_v20 }
 0x244   : > { %v2742_v28 = vxor.u32 2147483648, %v4534_v26  ;;  %v6078_v2 = vshll.u32 %v1197_v45, 8  ;;  %v1382_v57 = vsel %vm6065_vm10, 0, %v1380_v5  ;;  %v3017_v53 = vadd.s32 %v3016_v30, %v3012_v14 }
 0x245   : > { %v1372_v16 = vor.u32 4788187, %v1371_v11  ;;  %v2746_v63 = vsel %vm2744_vm11, %v2745_v17, %v4534_v26  ;;  %v6084_v47 = vadd.f32 %v5916_v51, %v5607_v32  ;;  %v1375_v22 = vcvt.s32.f32 %v1368_v33 }
 0x246   : > { %v2743_v48 = vsel %vm2741_vm9, %v4532_v42, %v2742_v28  ;;  %v6088_v41 = vshrl.u32 %v1201_v0, 5  ;;  %v3018_v10 = vadd.s32 536870912, %v3017_v53  ;;  %v1207_v40 = vshrl.u32 %v4685_v25, %v1204_v36 }
 0x247   : > { %v1373_v24 = vand.u32 2147483647, %v1372_v16  ;;  %v2747_v45 = vsel %vm2740_vm8, %v2743_v48, %v2746_v63  ;;  %v1210_v55 = vshrl.u32 %v4686_v27, %v1204_v36  ;;  %v1206_v44 = vshll.u32 %v4684_v21, %v1203_v1 }
 0x248   : > { %v2748_v8 = vsel %vm2737_vm7, nan, %v2747_v45  ;;  %v1213_v15 = vshrl.u32 %v4687_v29, %v1204_v36  ;;  %v3019_v34 = vshrl.u32 %v3018_v10, 30  ;;  %v1209_v43 = vshll.u32 %v4685_v25, %v1203_v1 }
 0x249   : > { %v1376_v32 = vmul.f32 %v1375_v22, %v1373_v24  ;;  %3913 = vst [vmem:[%s5180_s6 + $0xa0] sm:$0xff] %v2748_v8  ;;  %v1212_v3 = vshll.u32 %v4686_v27, %v1203_v1  ;;  %v1216_v20 = vshrl.u32 %v4688_v31, %v1204_v36  ;;  %v1215_v12 = vshll.u32 %v4687_v29, %v1203_v1 }
 0x24a   : > { %v1218_v61 = vshll.u32 %v4688_v31, %v1203_v1  ;;  %v1219_v23 = vshrl.u32 %v4689_v38, %v1204_v36  ;;  %v1386_v35 = vadd.s32 3, %v1382_v57  ;;  %v3020_v13 = vshll.u32 %v3019_v34, 30 }
 0x24b   : > { %v1377_v52 = vxor.u32 2147483648, %v1376_v32  ;;  %v1208_v0 = vor.u32 %v1207_v40, %v1206_v44  ;;  %v1211_v54 = vor.u32 %v1210_v55, %v1209_v43  ;;  %v1214_v62 = vor.u32 %v1213_v15, %v1212_v3 }
 0x24c   : > { %v1217_v6 = vor.u32 %v1216_v20, %v1215_v12  ;;  %v1220_v42 = vor.u32 %v1219_v23, %v1218_v61  ;;  %v6110_v11 = vsub.s32 %v3017_v53, %v3020_v13  ;;  %v1205_v1 = vshrl.u32 %v4684_v21, %v1204_v36 }
 0x24d   : > { %v1378_v9 = vsel %vm1295_vm2, %v1377_v52, %v1376_v32  ;;  %v2856_v5 = vand.u32 2139095040, %v6084_v47  ;;  %vm1221_vm13 = vcmp.lt.s32.totalorder %v6088_v41, 1  ;;  %vm1222_vm14 = vcmp.lt.s32.totalorder %v6088_v41, 2 }
 0x24e   : > { %v1381_v33 = vsel %vm6065_vm10, %v5802_v7, %v1378_v9  ;;  %vm1223_vm15 = vcmp.lt.s32.totalorder %v6088_v41, 3  ;;  %v3023_v26 = vsub.s32 0, %v6110_v11  ;;  %vm1224_vm0 = vcmp.lt.s32.totalorder %v6088_v41, 4 }
 0x24f   : > { %4535 = vcosq.f32 %v1381_v33  ;;  %v1229_v4 = vsel %vm1221_vm13, %v1208_v0, %v1211_v54  ;;  %v1226_v17 = vsel %vm1224_vm0, %v1214_v62, 2102212464  ;;  %v1230_v14 = vsel %vm1224_vm0, %v1217_v6, 920167782 }
 0x250   : > { %4537 = vsinq.f32 %v1381_v33  ;;  %v1233_v36 = vsel %vm1221_vm13, %v1211_v54, %v1214_v62  ;;  %v1234_v28 = vsel %vm1224_vm0, %v1220_v42, 1326507024  ;;  %v4140_v16 = vmin.u32 %v3023_v26, %v6110_v11 }
 0x251   : > { %v3043_v30 = vsub.s32 4, %v3019_v34  ;;  %v1231_v63 = vsel %vm1223_vm15, %v1214_v62, %v1230_v14  ;;  %v1235_v57 = vsel %vm1223_vm15, %v1217_v6, %v1234_v28  ;;  %v1387_v53 = vand.u32 3, %v1386_v35 }
 0x252   : > { %v1232_v48 = vsel %vm1222_vm14, %v1229_v4, %v1231_v63  ;;  %v1236_v24 = vsel %vm1222_vm14, %v1233_v36, %v1235_v57  ;;  %v2857_v22 = vshrl.u32 %v2856_v5, 23  ;;  %vm2959_vm1 = vcmp.lt.s32.totalorder %v5920_v56, 0 }
 0x253   : > { %v3025_v45 = vclz %v4140_v16  ;;  %v1225_v10 = vsel %vm1221_vm13, %v1205_v1, %v1208_v0  ;;  %v1227_v40 = vsel %vm1223_vm15, %v1211_v54, %v1226_v17  ;;  %vm1385_vm2 = vweird.f32 %v5802_v7 }
 0x254   : > { %v6138_v55 = vmul.u32.u64.low %v6078_v2, %v1236_v24  ;;  %v6139_v8 = vmul.u32.u64.high %v6078_v2, %v1236_v24, %v6138_v55  ;;  %v6142_v32 = vmul.u32.u64.low %v6078_v2, %v1232_v48  ;;  %v6143_v44 = vmul.u32.u64.high %v6078_v2, %v1232_v48, %v6142_v32 }
 0x255   : > { %vm6149_vm3 = vcmp.le.f32.partialorder %v2957_v46, 0.7853982  ;;  %v4141_v43 = vadd.s32 4294967294, %v3025_v45  ;;  %v3044_v3 = vsel %vm2959_vm1, %v3043_v30, %v3019_v34  ;;  %v4135_v20 = vadd.s32 4294967169, %v2857_v22 }
 0x256   : > { %vm1388_vm4 = vcmp.lt.s32.totalorder %v1387_v53, 2  ;;  %vm1389_vm5 = vcmp.eq.s32.totalorder %v1387_v53, 0  ;;  %vm1392_vm6 = vcmp.eq.s32.totalorder %v1387_v53, 2  ;;  %v1228_v52 = vsel %vm1222_vm14, %v1225_v10, %v1227_v40 }
 0x257   : > { %v3013_v12 = vadd.s32 %v6046_v37, %v6055_v59  ;;  %vm4142_vm7 = vcmp.lt.s32.totalorder %v4141_v43, 0  ;;  %v2853_v46 = vand.u32 2147483647, %v6084_v47  ;;  %v2863_v61 = vadd.s32 1, %v4135_v20 }
 0x258   : > { %v3028_v35 = vsel %vm4142_vm7, 0, %v4141_v43  ;;  %v3046_v13 = vsel %vm6149_vm3, 0, %v3044_v3  ;;  %vm1246_vm8 = vc.u32 %v6139_v8, %v6142_v32  ;;  %v1247_v34 = vadd.s32 1, %v6143_v44  ;;  %v6188_v43 = vpop.f32.mrb[10].mxu1 }
 0x259   : > { %v4536_v23 = vpop.eup %4535  ;;  %v3029_v54 = vsub.s32 32, %v3028_v35  ;;  %v3033_v9 = vsub.s32 4294967266, %v3028_v35  ;;  %v1244_v37 = vmul.u32 %v6078_v2, %v1228_v52  ;;  %v3030_v62 = vshll.u32 %v6110_v11, %v3028_v35 }
 0x25a   : > { %v4538_v0 = vpop.eup %4537  ;;  %v1393_v41 = vxor.u32 2147483648, %v4536_v23  ;;  %v1248_v6 = vsel %vm1246_vm8, %v1247_v34, %v6143_v44  ;;  %vm2864_vm9 = vcmp.gt.s32.totalorder %v2863_v61, 0  ;;  %v3050_v4 = vadd.s32 3, %v3046_v13 }
 0x25b   : > { %v1390_v59 = vxor.u32 2147483648, %v4538_v0  ;;  %v3031_v33 = vshrl.u32 %v3013_v12, %v3029_v54  ;;  %v3034_v1 = vadd.s32 127, %v3033_v9  ;;  %v1249_v5 = vadd.s32 %v1248_v6, %v1244_v37 }
 0x25c   : > { %v1394_v42 = vsel %vm1392_vm6, %v1393_v41, %v4538_v0  ;;  %v2860_v17 = vand.u32 8388607, %v2853_v46  ;;  %v2865_v14 = vsel %vm2864_vm9, %v2863_v61, 0  ;;  %v6178_v10 = vand.u32 3, %v3050_v4 }
 0x25d   : > { %v1391_v26 = vsel %vm1389_vm5, %v4536_v23, %v1390_v59  ;;  %v3032_v36 = vor.u32 %v3031_v33, %v3030_v62  ;;  %v3035_v11 = vshll.u32 %v3034_v1, 23  ;;  %v1250_v28 = vadd.s32 536870912, %v1249_v5 }
 0x25e   : > { %v1395_v2 = vsel %vm1388_vm4, %v1391_v26, %v1394_v42  ;;  %v2867_v30 = vand.u32 31, %v2865_v14  ;;  %v2861_v48 = vor.u32 8388608, %v2860_v17  ;;  %v6186_v44 = vadd.f32 %v5916_v51, %v5727_v19 }
 0x25f   : > { %v1396_v16 = vsel %vm1385_vm2, nan, %v1395_v2  ;;  %v3036_v63 = vor.u32 4788187, %v3035_v11  ;;  %v6176_v57 = vshrl.u32 %v1250_v28, 30  ;;  %v3039_v45 = vcvt.s32.f32 %v3032_v36 }
 0x260   : > { %3900 = vst [vmem:[%s5180_s6 + $0x38] sm:$0xff] %v1396_v16  ;;  %v2868_v24 = vsub.s32 32, %v2867_v30  ;;  %v2870_v52 = vshll.u32 %v4684_v21, %v2867_v30  ;;  %v2866_v61 = vshrl.u32 %v2865_v14, 5  ;;  %v2873_v23 = vshll.u32 %v4685_v25, %v2867_v30 }
 0x261   : > { %v3037_v22 = vand.u32 2147483647, %v3036_v63  ;;  %v1252_v53 = vshll.u32 %v6176_v57, 30  ;;  %v2876_v35 = vshll.u32 %v4686_v27, %v2867_v30  ;;  %v6196_v13 = vshll.u32 %v2861_v48, 8 }
 0x262   : > { %v2871_v40 = vshrl.u32 %v4685_v25, %v2868_v24  ;;  %v2874_v55 = vshrl.u32 %v4686_v27, %v2868_v24  ;;  %v2877_v7 = vshrl.u32 %v4687_v29, %v2868_v24  ;;  %v2880_v12 = vshrl.u32 %v4688_v31, %v2868_v24 }
 0x263   : > { %v3040_v3 = vmul.f32 %v3039_v45, %v3037_v22  ;;  %v6190_v20 = vsub.s32 %v1249_v5, %v1252_v53  ;;  %v2879_v41 = vshll.u32 %v4687_v29, %v2867_v30  ;;  %v2882_v37 = vshll.u32 %v4688_v31, %v2867_v30 }
 0x264   : > { %v2872_v0 = vor.u32 %v2871_v40, %v2870_v52  ;;  %v2875_v54 = vor.u32 %v2874_v55, %v2873_v23  ;;  %v2878_v9 = vor.u32 %v2877_v7, %v2876_v35  ;;  %v2883_v59 = vshrl.u32 %v4689_v38, %v2868_v24 }
 0x265   : > { %v3041_v34 = vxor.u32 2147483648, %v3040_v3  ;;  %v1255_v19 = vsub.s32 0, %v6190_v20  ;;  %vm1191_vm10 = vcmp.lt.s32.totalorder %v5982_v50, 0  ;;  %v2881_v42 = vor.u32 %v2880_v12, %v2879_v41 }
 0x266   : > { %v1504_v33 = vand.u32 2139095040, %v6186_v44  ;;  %v1275_v5 = vsub.s32 4, %v6176_v57  ;;  %v2869_v26 = vshrl.u32 %v4684_v21, %v2868_v24  ;;  %v2884_v4 = vor.u32 %v2883_v59, %v2882_v37 }
 0x267   : > { %v3042_v62 = vsel %vm2959_vm1, %v3041_v34, %v3040_v3  ;;  %v4072_v6 = vmin.u32 %v1255_v19, %v6190_v20  ;;  %vm2885_vm11 = vcmp.lt.s32.totalorder %v2866_v61, 1  ;;  %vm2888_vm12 = vcmp.lt.s32.totalorder %v2866_v61, 4 }
 0x268   : > { %v3045_v1 = vsel %vm6149_vm3, %v5920_v56, %v3042_v62  ;;  %vm6214_vm13 = vcmp.le.f32.partialorder %v1189_v49, 0.7853982  ;;  %vm2886_vm14 = vcmp.lt.s32.totalorder %v2866_v61, 2  ;;  %v2890_v2 = vsel %vm2888_vm12, %v2878_v9, 2102212464 }
 0x269   : > { %4539 = vcosq.f32 %v3045_v1  ;;  %v1257_v17 = vclz %v4072_v6  ;;  %v2893_v15 = vsel %vm2885_vm11, %v2872_v0, %v2875_v54  ;;  %vm2887_vm15 = vcmp.lt.s32.totalorder %v2866_v61, 3 }
 0x26a   : > { %4541 = vsinq.f32 %v3045_v1  ;;  %v2894_v11 = vsel %vm2888_vm12, %v2881_v42, 920167782  ;;  %v2897_v28 = vsel %vm2885_vm11, %v2875_v54, %v2878_v9  ;;  %v2889_v16 = vsel %vm2885_vm11, %v2869_v26, %v2872_v0 }
 0x26b   : > { %v4073_v36 = vadd.s32 4294967294, %v1257_v17  ;;  %v2895_v30 = vsel %vm2887_vm15, %v2878_v9, %v2894_v11  ;;  %v2898_v63 = vsel %vm2888_vm12, %v2884_v4, 1326507024  ;;  %v1505_v48 = vshrl.u32 %v1504_v33, 23 }
 0x26c   : > { %v2891_v24 = vsel %vm2887_vm15, %v2875_v54, %v2890_v2  ;;  %v2896_v22 = vsel %vm2886_vm14, %v2893_v15, %v2895_v30  ;;  %v2899_v45 = vsel %vm2887_vm15, %v2881_v42, %v2898_v63  ;;  %vm3053_vm1 = vcmp.eq.s32.totalorder %v6178_v10, 0 }
 0x26d   : > { %vm4074_vm0 = vcmp.lt.s32.totalorder %v4073_v36, 0  ;;  %v2900_v53 = vsel %vm2886_vm14, %v2897_v28, %v2899_v45  ;;  %v6222_v40 = vmul.u32.u64.low %v6196_v13, %v2896_v22  ;;  %v6223_v55 = vmul.u32.u64.high %v6196_v13, %v2896_v22, %v6222_v40 }
 0x26e   : > { %v1260_v49 = vsel %vm4074_vm0, 0, %v4073_v36  ;;  %vm3052_vm2 = vcmp.lt.s32.totalorder %v6178_v10, 2  ;;  %v1245_v7 = vadd.s32 %v6142_v32, %v6139_v8  ;;  %v4083_v12 = vadd.s32 4294967169, %v1505_v48  ;;  %v6239_v32 = vpop.f32.mrb[11].mxu0 }
 0x26f   : > { %v1261_v3 = vsub.s32 32, %v1260_v49  ;;  %v1265_v52 = vsub.s32 4294967266, %v1260_v49  ;;  %vm3049_vm3 = vweird.f32 %v5920_v56  ;;  %v1276_v23 = vsel %vm1191_vm10, %v1275_v5, %v6176_v57 }
 0x270   : > { %v2892_v35 = vsel %vm2886_vm14, %v2889_v16, %v2891_v24  ;;  %v6235_v34 = vmul.u32.u64.low %v6196_v13, %v2900_v53  ;;  %v6236_v19 = vmul.u32.u64.high %v6196_v13, %v2900_v53, %v6235_v34  ;;  %v1262_v0 = vshll.u32 %v6190_v20, %v1260_v49 }
 0x271   : > { %v1263_v41 = vshrl.u32 %v1245_v7, %v1261_v3  ;;  %v1266_v54 = vadd.s32 127, %v1265_v52  ;;  %v1511_v8 = vadd.s32 1, %v4083_v12  ;;  %vm3056_vm4 = vcmp.eq.s32.totalorder %v6178_v10, 2 }
 0x272   : > { %v2911_v9 = vadd.s32 1, %v6223_v55  ;;  %v1501_v37 = vand.u32 2147483647, %v6186_v44  ;;  %v6246_v57 = vadd.f32 %v5916_v51, %v5804_v18  ;;  %v1278_v20 = vsel %vm6214_vm13, 0, %v1276_v23 }
 0x273   : > { %v4540_v61 = vpop.eup %4539  ;;  %v1264_v59 = vor.u32 %v1263_v41, %v1262_v0  ;;  %v1267_v62 = vshll.u32 %v1266_v54, 23  ;;  %vm1512_vm5 = vcmp.gt.s32.totalorder %v1511_v8, 0  ;;  %v2908_v33 = vmul.u32 %v6196_v13, %v2892_v35 }
 0x274   : > { %v4542_v6 = vpop.eup %4541  ;;  %v3057_v42 = vxor.u32 2147483648, %v4540_v61  ;;  %vm2910_vm6 = vc.u32 %v6236_v19, %v6222_v40  ;;  %v1513_v1 = vsel %vm1512_vm5, %v1511_v8, 0  ;;  %v6256_v4 = vadd.f32 %v5916_v51, %v5886_v58 }
 0x275   : > { %v3054_v5 = vxor.u32 2147483648, %v4542_v6  ;;  %v1268_v26 = vor.u32 4788187, %v1267_v62  ;;  %v2912_v18 = vsel %vm2910_vm6, %v2911_v9, %v6223_v55  ;;  %v1508_v13 = vand.u32 8388607, %v1501_v37 }
 0x276   : > { %v3058_v17 = vsel %vm3056_vm4, %v3057_v42, %v4542_v6  ;;  %v2913_v2 = vadd.s32 %v2912_v18, %v2908_v33  ;;  %v1515_v15 = vand.u32 31, %v1513_v1  ;;  %v1271_v28 = vcvt.s32.f32 %v1264_v59 }
 0x277   : > { %v3055_v36 = vsel %vm3053_vm1, %v4540_v61, %v3054_v5  ;;  %v1269_v11 = vand.u32 2147483647, %v1268_v26  ;;  %v1282_v16 = vadd.s32 3, %v1278_v20  ;;  %v3168_v63 = vand.u32 2139095040, %v6246_v57 }
 0x278   : > { %v3059_v30 = vsel %vm3052_vm2, %v3055_v36, %v3058_v17  ;;  %v2914_v58 = vadd.s32 536870912, %v2913_v2  ;;  %v1516_v51 = vsub.s32 32, %v1515_v15  ;;  %v1518_v22 = vshll.u32 %v4684_v21, %v1515_v15 }
 0x279   : > { %v3060_v48 = vsel %vm3049_vm3, nan, %v3059_v30  ;;  %v1272_v24 = vmul.f32 %v1271_v28, %v1269_v11  ;;  %v1521_v45 = vshll.u32 %v4685_v25, %v1515_v15  ;;  %v1524_v10 = vshll.u32 %v4686_v27, %v1515_v15  ;;  %v6301_v28 = vpop.f32.mrb[11].mxu1 }
 0x27a   : > { %3916 = vst [vmem:[%s5180_s6 + $0xb8] sm:$0xff] %v3060_v48  ;;  %v2915_v49 = vshrl.u32 %v2914_v58, 30  ;;  %v1519_v53 = vshrl.u32 %v4685_v25, %v1516_v51  ;;  %v1522_v55 = vshrl.u32 %v4686_v27, %v1516_v51  ;;  %v1525_v3 = vshrl.u32 %v4687_v29, %v1516_v51 }
 0x27b   : > { %v1273_v7 = vxor.u32 2147483648, %v1272_v24  ;;  %v1527_v52 = vshll.u32 %v4687_v29, %v1515_v15  ;;  %v1528_v56 = vshrl.u32 %v4688_v31, %v1516_v51  ;;  %v6278_v12 = vand.u32 3, %v1282_v16 }
 0x27c   : > { %vm2855_vm7 = vcmp.lt.s32.totalorder %v6084_v47, 0  ;;  %v2916_v23 = vshll.u32 %v2915_v49, 30  ;;  %v1514_v35 = vshrl.u32 %v1513_v1, 5  ;;  %v1520_v34 = vor.u32 %v1519_v53, %v1518_v22 }
 0x27d   : > { %v1274_v0 = vsel %vm1191_vm10, %v1273_v7, %v1272_v24  ;;  %v1523_v41 = vor.u32 %v1522_v55, %v1521_v45  ;;  %v1526_v54 = vor.u32 %v1525_v3, %v1524_v10  ;;  %v1529_v8 = vor.u32 %v1528_v56, %v1527_v52 }
 0x27e   : > { %v1277_v9 = vsel %vm6214_vm13, %v5982_v50, %v1274_v0  ;;  %v6286_v61 = vsub.s32 %v2913_v2, %v2916_v23  ;;  %v1530_v59 = vshll.u32 %v4688_v31, %v1515_v15  ;;  %v1531_v62 = vshrl.u32 %v4689_v38, %v1516_v51 }
 0x27f   : > { %4543 = vcosq.f32 %v1277_v9  ;;  %v1509_v20 = vor.u32 8388608, %v1508_v13  ;;  %v3165_v6 = vand.u32 2147483647, %v6246_v57  ;;  %v3169_v42 = vshrl.u32 %v3168_v63, 23 }
 0x280   : > { %4545 = vsinq.f32 %v1277_v9  ;;  %vm6293_vm8 = vcmp.le.f32.partialorder %v2853_v46, 0.7853982  ;;  %v2919_v14 = vsub.s32 0, %v6286_v61  ;;  %v1517_v1 = vshrl.u32 %v4684_v21, %v1516_v51 }
 0x281   : > { %v1532_v5 = vor.u32 %v1531_v62, %v1530_v59  ;;  %v2939_v26 = vsub.s32 4, %v2915_v49  ;;  %vm1533_vm9 = vcmp.lt.s32.totalorder %v1514_v35, 1  ;;  %vm1535_vm10 = vcmp.lt.s32.totalorder %v1514_v35, 3 }
 0x282   : > { %vm1536_vm11 = vcmp.lt.s32.totalorder %v1514_v35, 4  ;;  %v4136_v18 = vmin.u32 %v2919_v14, %v6286_v61  ;;  %v1541_v2 = vsel %vm1533_vm9, %v1520_v34, %v1523_v41  ;;  %v1545_v46 = vsel %vm1533_vm9, %v1523_v41, %v1526_v54 }
 0x283   : > { %v1538_v17 = vsel %vm1536_vm11, %v1526_v54, 2102212464  ;;  %v1542_v13 = vsel %vm1536_vm11, %v1529_v8, 920167782  ;;  %v1546_v36 = vsel %vm1536_vm11, %v1532_v5, 1326507024  ;;  %v1537_v30 = vsel %vm1533_vm9, %v1517_v1, %v1520_v34 }
 0x284   : > { %v1543_v15 = vsel %vm1535_vm10, %v1526_v54, %v1542_v13  ;;  %v1549_v11 = vshll.u32 %v1509_v20, 8  ;;  %v2921_v16 = vclz %v4136_v18  ;;  %vm1534_vm12 = vcmp.lt.s32.totalorder %v1514_v35, 2 }
 0x285   : > { %v1539_v58 = vsel %vm1535_vm10, %v1523_v41, %v1538_v17  ;;  %v2940_v51 = vsel %vm2855_vm7, %v2939_v26, %v2915_v49  ;;  %v1544_v63 = vsel %vm1534_vm12, %v1541_v2, %v1543_v15  ;;  %v1547_v48 = vsel %vm1535_vm10, %v1529_v8, %v1546_v36 }
 0x286   : > { %v4147_v24 = vadd.s32 4294967169, %v3169_v42  ;;  %vm1281_vm13 = vweird.f32 %v5982_v50  ;;  %v4137_v22 = vadd.s32 4294967294, %v2921_v16  ;;  %v1548_v45 = vsel %vm1534_vm12, %v1545_v46, %v1547_v48 }
 0x287   : > { %v6308_v53 = vmul.u32.u64.low %v1549_v11, %v1544_v63  ;;  %v6309_v55 = vmul.u32.u64.high %v1549_v11, %v1544_v63, %v6308_v53  ;;  %vm1284_vm14 = vcmp.lt.s32.totalorder %v6278_v12, 2  ;;  %v1540_v10 = vsel %vm1534_vm12, %v1537_v30, %v1539_v58 }
 0x288   : > { %v6313_v7 = vmul.u32.u64.low %v1549_v11, %v1548_v45  ;;  %v6314_v3 = vmul.u32.u64.high %v1549_v11, %v1548_v45, %v6313_v7  ;;  %vm1285_vm15 = vcmp.eq.s32.totalorder %v6278_v12, 0  ;;  %vm1288_vm0 = vcmp.eq.s32.totalorder %v6278_v12, 2 }
 0x289   : > { %vm4138_vm1 = vcmp.lt.s32.totalorder %v4137_v22, 0  ;;  %v3175_v49 = vadd.s32 1, %v4147_v24  ;;  %v4544_v52 = vpop.eup %4543  ;;  %v2909_v56 = vadd.s32 %v6222_v40, %v6236_v19  ;;  %v2942_v35 = vsel %vm6293_vm8, 0, %v2940_v51 }
 0x28a   : > { %v2924_v23 = vsel %vm4138_vm1, 0, %v4137_v22  ;;  %v3172_v34 = vand.u32 8388607, %v3165_v6  ;;  %v4546_v0 = vpop.eup %4545  ;;  %v1289_v41 = vxor.u32 2147483648, %v4544_v52  ;;  %v1556_v9 = vmul.u32 %v1549_v11, %v1540_v10 }
 0x28b   : > { %v2925_v54 = vsub.s32 32, %v2924_v23  ;;  %v2929_v8 = vsub.s32 4294967266, %v2924_v23  ;;  %v1286_v59 = vxor.u32 2147483648, %v4546_v0  ;;  %v2926_v62 = vshll.u32 %v6286_v61, %v2924_v23 }
 0x28c   : > { %vm1558_vm2 = vc.u32 %v6314_v3, %v6308_v53  ;;  %v1559_v40 = vadd.s32 1, %v6309_v55  ;;  %v1290_v19 = vsel %vm1288_vm0, %v1289_v41, %v4546_v0  ;;  %vm3176_vm3 = vcmp.gt.s32.totalorder %v3175_v49, 0 }
 0x28d   : > { %v2927_v20 = vshrl.u32 %v2909_v56, %v2925_v54  ;;  %v2930_v42 = vadd.s32 127, %v2929_v8  ;;  %v1287_v14 = vsel %vm1285_vm15, %v4544_v52, %v1286_v59  ;;  %v2946_v1 = vadd.s32 3, %v2942_v35 }
 0x28e   : > { %v1560_v5 = vsel %vm1558_vm2, %v1559_v40, %v6309_v55  ;;  %v3177_v26 = vsel %vm3176_vm3, %v3175_v49, 0  ;;  %v1291_v61 = vsel %vm1284_vm14, %v1287_v14, %v1290_v19  ;;  %v3173_v16 = vor.u32 8388608, %v3172_v34 }
 0x28f   : > { %v2928_v18 = vor.u32 %v2927_v20, %v2926_v62  ;;  %v2931_v17 = vshll.u32 %v2930_v42, 23  ;;  %v1561_v2 = vadd.s32 %v1560_v5, %v1556_v9  ;;  %v1292_v13 = vsel %vm1281_vm13, nan, %v1291_v61 }
 0x290   : > { %v3179_v15 = vand.u32 31, %v3177_v26  ;;  %3899 = vst [vmem:[%s5180_s6 + $0x30] sm:$0xff] %v1292_v13  ;;  %v6338_v11 = vand.u32 3, %v2946_v1  ;;  %v1400_v12 = vand.u32 2139095040, %v6256_v4  ;;  %v3178_v48 = vshrl.u32 %v3177_v26, 5 }
 0x291   : > { %v2932_v46 = vor.u32 4788187, %v2931_v17  ;;  %v1562_v36 = vadd.s32 536870912, %v1561_v2  ;;  %v2935_v51 = vcvt.s32.f32 %v2928_v18  ;;  %v1397_v41 = vand.u32 2147483647, %v6256_v4 }
 0x292   : > { %v3180_v30 = vsub.s32 32, %v3179_v15  ;;  %v3188_v10 = vshll.u32 %v4686_v27, %v3179_v15  ;;  %v3182_v49 = vshll.u32 %v4684_v21, %v3179_v15  ;;  %v3185_v52 = vshll.u32 %v4685_v25, %v3179_v15 }
 0x293   : > { %v2933_v58 = vand.u32 2147483647, %v2932_v46  ;;  %v6340_v63 = vshrl.u32 %v1562_v36, 30  ;;  %v3191_v56 = vshll.u32 %v4687_v29, %v3179_v15  ;;  %v3194_v59 = vshll.u32 %v4688_v31, %v3179_v15 }
 0x294   : > { %v3183_v24 = vshrl.u32 %v4685_v25, %v3180_v30  ;;  %v3186_v50 = vshrl.u32 %v4686_v27, %v3180_v30  ;;  %v3189_v22 = vshrl.u32 %v4687_v29, %v3180_v30  ;;  %v3192_v7 = vshrl.u32 %v4688_v31, %v3180_v30 }
 0x295   : > { %v2936_v45 = vmul.f32 %v2935_v51, %v2933_v58  ;;  %v1564_v55 = vshll.u32 %v6340_v63, 30  ;;  %v3195_v23 = vshrl.u32 %v4689_v38, %v3180_v30  ;;  %v6360_v19 = vshll.u32 %v3173_v16, 8 }
 0x296   : > { %v3190_v0 = vor.u32 %v3189_v22, %v3188_v10  ;;  %v3184_v54 = vor.u32 %v3183_v24, %v3182_v49  ;;  %v3187_v8 = vor.u32 %v3186_v50, %v3185_v52  ;;  %v3193_v9 = vor.u32 %v3192_v7, %v3191_v56 }
 0x297   : > { %v2937_v35 = vxor.u32 2147483648, %v2936_v45  ;;  %v6353_v34 = vsub.s32 %v1561_v2, %v1564_v55  ;;  %v1401_v20 = vshrl.u32 %v1400_v12, 23  ;;  %v3181_v14 = vshrl.u32 %v4684_v21, %v3180_v30 }
 0x298   : > { %v3196_v1 = vor.u32 %v3195_v23, %v3194_v59  ;;  %vm3200_vm4 = vcmp.lt.s32.totalorder %v3178_v48, 4  ;;  %vm3197_vm5 = vcmp.lt.s32.totalorder %v3178_v48, 1  ;;  %vm3199_vm6 = vcmp.lt.s32.totalorder %v3178_v48, 3 }
 0x299   : > { %v2938_v62 = vsel %vm2855_vm7, %v2937_v35, %v2936_v45  ;;  %v1567_v40 = vsub.s32 0, %v6353_v34  ;;  %v3202_v26 = vsel %vm3200_vm4, %v3190_v0, 2102212464  ;;  %v3205_v61 = vsel %vm3197_vm5, %v3184_v54, %v3187_v8 }
 0x29a   : > { %v2941_v42 = vsel %vm6293_vm8, %v6084_v47, %v2938_v62  ;;  %v3206_v18 = vsel %vm3200_vm4, %v3193_v9, 920167782  ;;  %vm6371_vm7 = vcmp.le.f32.partialorder %v1501_v37, 0.7853982  ;;  %v3201_v2 = vsel %vm3197_vm5, %v3181_v14, %v3184_v54 }
 0x29b   : > { %4547 = vcosq.f32 %v2941_v42  ;;  %v4084_v5 = vmin.u32 %v1567_v40, %v6353_v34  ;;  %v3203_v13 = vsel %vm3199_vm6, %v3187_v8, %v3202_v26  ;;  %v3209_v15 = vsel %vm3197_vm5, %v3187_v8, %v3190_v0 }
 0x29c   : > { %4549 = vsinq.f32 %v2941_v42  ;;  %vm3198_vm8 = vcmp.lt.s32.totalorder %v3178_v48, 2  ;;  %v3207_v46 = vsel %vm3199_vm6, %v3190_v0, %v3206_v18  ;;  %v3210_v36 = vsel %vm3200_vm4, %v3196_v1, 1326507024 }
 0x29d   : > { %v1569_v17 = vclz %v4084_v5  ;;  %v4079_v16 = vadd.s32 4294967169, %v1401_v20  ;;  %v1587_v58 = vsub.s32 4, %v6340_v63  ;;  %v3208_v51 = vsel %vm3198_vm8, %v3205_v61, %v3207_v46  ;;  %v6404_v20 = vpop.f32.mrb[12].mxu0  ;;  %v6412_v61 = vld [vmem:[%s7596_s2] ss:$0 sm:$0xff] }
 0x29e   : > { %v3211_v12 = vsel %vm3199_vm6, %v3193_v9, %v3210_v36  ;;  %v3204_v24 = vsel %vm3198_vm8, %v3201_v2, %v3203_v13  ;;  %v6378_v37 = vmul.u32.u64.low %v6360_v19, %v3208_v51  ;;  %v6379_v22 = vmul.u32.u64.high %v6360_v19, %v3208_v51, %v6378_v37 }
 0x29f   : > { %v4085_v30 = vadd.s32 4294967294, %v1569_v17  ;;  %v3212_v50 = vsel %vm3198_vm8, %v3209_v15, %v3211_v12  ;;  %v1407_v48 = vadd.s32 1, %v4079_v16  ;;  %vm2945_vm10 = vweird.f32 %v6084_v47 }
 0x2a0   : > { %v6383_v45 = vmul.u32.u64.low %v6360_v19, %v3212_v50  ;;  %v6384_v55 = vmul.u32.u64.high %v6360_v19, %v3212_v50, %v6383_v45  ;;  %vm2952_vm11 = vcmp.eq.s32.totalorder %v6338_v11, 2  ;;  %vm1503_vm12 = vcmp.lt.s32.totalorder %v6186_v44, 0 }
 0x2a1   : > { %vm4086_vm9 = vcmp.lt.s32.totalorder %v4085_v30, 0  ;;  %v1557_v10 = vadd.s32 %v6308_v53, %v6314_v3  ;;  %v1588_v56 = vsel %vm1503_vm12, %v1587_v58, %v6340_v63  ;;  %vm1408_vm13 = vcmp.gt.s32.totalorder %v1407_v48, 0 }
 0x2a2   : > { %v1572_v7 = vsel %vm4086_vm9, 0, %v4085_v30  ;;  %v3220_v23 = vmul.u32 %v6360_v19, %v3204_v24  ;;  %v3223_v35 = vadd.s32 1, %v6379_v22  ;;  %v1404_v0 = vand.u32 8388607, %v1397_v41 }
 0x2a3   : > { %v1573_v49 = vsub.s32 32, %v1572_v7  ;;  %v1577_v52 = vsub.s32 4294967266, %v1572_v7  ;;  %v1409_v54 = vsel %vm1408_vm13, %v1407_v48, 0  ;;  %v1574_v9 = vshll.u32 %v6353_v34, %v1572_v7 }
 0x2a4   : > { %vm3222_vm14 = vc.u32 %v6384_v55, %v6378_v37  ;;  %v1590_v63 = vsel %vm6371_vm7, 0, %v1588_v56  ;;  %v1411_v19 = vand.u32 31, %v1409_v54  ;;  %vm2949_vm15 = vcmp.eq.s32.totalorder %v6338_v11, 0 }
 0x2a5   : > { %v4548_v8 = vpop.eup %4547  ;;  %v1575_v53 = vshrl.u32 %v1557_v10, %v1573_v49  ;;  %v1578_v3 = vadd.s32 127, %v1577_v52  ;;  %v3224_v40 = vsel %vm3222_vm14, %v3223_v35, %v6379_v22  ;;  %v6416_v18 = vadd.f32 %v6412_v61, %v5962_v60 }
 0x2a6   : > { %v4550_v59 = vpop.eup %4549  ;;  %v2953_v62 = vxor.u32 2147483648, %v4548_v8  ;;  %v3225_v5 = vadd.s32 %v3224_v40, %v3220_v23  ;;  %v1412_v26 = vsub.s32 32, %v1411_v19  ;;  %vm2948_vm0 = vcmp.lt.s32.totalorder %v6338_v11, 2 }
 0x2a7   : > { %v2950_v42 = vxor.u32 2147483648, %v4550_v59  ;;  %v1576_v14 = vor.u32 %v1575_v53, %v1574_v9  ;;  %v1579_v1 = vshll.u32 %v1578_v3, 23  ;;  %v1594_v46 = vadd.s32 3, %v1590_v63 }
 0x2a8   : > { %v2954_v34 = vsel %vm2952_vm11, %v2953_v62, %v4550_v59  ;;  %v3226_v13 = vadd.s32 536870912, %v3225_v5  ;;  %v1405_v36 = vor.u32 8388608, %v1404_v0  ;;  %v6421_v16 = vadd.f32 %v6412_v61, %v6057_v39 }
 0x2a9   : > { %v2951_v17 = vsel %vm2949_vm15, %v4548_v8, %v2950_v42  ;;  %v1580_v2 = vor.u32 4788187, %v1579_v1  ;;  %v1583_v51 = vcvt.s32.f32 %v1576_v14  ;;  %v1410_v60 = vshrl.u32 %v1409_v54, 5 }
 0x2aa   : > { %v2955_v15 = vsel %vm2948_vm0, %v2951_v17, %v2954_v34  ;;  %v3227_v12 = vshrl.u32 %v3226_v13, 30  ;;  %v1415_v11 = vshrl.u32 %v4685_v25, %v1412_v26  ;;  %v1418_v24 = vshrl.u32 %v4686_v27, %v1412_v26 }
 0x2ab   : > { %v2956_v30 = vsel %vm2945_vm10, nan, %v2955_v15  ;;  %v1581_v58 = vand.u32 2147483647, %v1580_v2  ;;  %v1421_v50 = vshrl.u32 %v4687_v29, %v1412_v26  ;;  %v1420_v48 = vshll.u32 %v4686_v27, %v1411_v19 }
 0x2ac   : > { %3915 = vst [vmem:[%s5180_s6 + $0xb0] sm:$0xff] %v2956_v30  ;;  %v3228_v45 = vshll.u32 %v3227_v12, 30  ;;  %v1424_v39 = vshrl.u32 %v4688_v31, %v1412_v26  ;;  %vm3167_vm1 = vcmp.lt.s32.totalorder %v6246_v57, 0  ;;  %v1414_v47 = vshll.u32 %v4684_v21, %v1411_v19 }
 0x2ad   : > { %v1584_v22 = vmul.f32 %v1583_v51, %v1581_v58  ;;  %v1417_v10 = vshll.u32 %v4685_v25, %v1411_v19  ;;  %v1423_v7 = vshll.u32 %v4687_v29, %v1411_v19  ;;  %v1427_v49 = vshrl.u32 %v4689_v38, %v1412_v26 }
 0x2ae   : > { %v6436_v56 = vand.u32 3, %v1594_v46  ;;  %v6438_v23 = vsub.s32 %v3225_v5, %v3228_v45  ;;  %v1422_v35 = vor.u32 %v1421_v50, %v1420_v48  ;;  %v1416_v0 = vor.u32 %v1415_v11, %v1414_v47  ;;  %v6459_v46 = vpop.f32.mrb[12].mxu1 }
 0x2af   : > { %v1585_v52 = vxor.u32 2147483648, %v1584_v22  ;;  %v1419_v54 = vor.u32 %v1418_v24, %v1417_v10  ;;  %v1425_v8 = vor.u32 %v1424_v39, %v1423_v7  ;;  %v1426_v9 = vshll.u32 %v4688_v31, %v1411_v19 }
 0x2b0   : > { %v3231_v3 = vsub.s32 0, %v6438_v23  ;;  %v1413_v59 = vshrl.u32 %v4684_v21, %v1412_v26  ;;  %v1445_v62 = vshll.u32 %v1405_v36, 8  ;;  %v3251_v40 = vsub.s32 4, %v3227_v12 }
 0x2b1   : > { %v1586_v53 = vsel %vm1503_vm12, %v1585_v52, %v1584_v22  ;;  %v1428_v42 = vor.u32 %v1427_v49, %v1426_v9  ;;  %vm1432_vm2 = vcmp.lt.s32.totalorder %v1410_v60, 4  ;;  %vm6450_vm3 = vcmp.le.f32.partialorder %v3165_v6, 0.7853982 }
 0x2b2   : > { %v1589_v63 = vsel %vm6371_vm7, %v6186_v44, %v1586_v53  ;;  %v4148_v14 = vmin.u32 %v3231_v3, %v6438_v23  ;;  %vm1429_vm4 = vcmp.lt.s32.totalorder %v1410_v60, 1  ;;  %v1434_v1 = vsel %vm1432_vm2, %v1422_v35, 2102212464 }
 0x2b3   : > { %4551 = vcosq.f32 %v1589_v63  ;;  %vm1430_vm5 = vcmp.lt.s32.totalorder %v1410_v60, 2  ;;  %v1437_v5 = vsel %vm1429_vm4, %v1416_v0, %v1419_v54  ;;  %v1438_v33 = vsel %vm1432_vm2, %v1425_v8, 920167782 }
 0x2b4   : > { %4553 = vsinq.f32 %v1589_v63  ;;  %v3233_v34 = vclz %v4148_v14  ;;  %vm1431_vm6 = vcmp.lt.s32.totalorder %v1410_v60, 3  ;;  %v1433_v26 = vsel %vm1429_vm4, %v1413_v59, %v1416_v0 }
 0x2b5   : > { %v1441_v17 = vsel %vm1429_vm4, %v1419_v54, %v1422_v35  ;;  %v1435_v2 = vsel %vm1431_vm6, %v1419_v54, %v1434_v1  ;;  %v1439_v13 = vsel %vm1431_vm6, %v1422_v35, %v1438_v33  ;;  %v1442_v6 = vsel %vm1432_vm2, %v1428_v42, 1326507024 }
 0x2b6   : > { %v3064_v15 = vand.u32 2139095040, %v6416_v18  ;;  %v4149_v36 = vadd.s32 4294967294, %v3233_v34  ;;  %v3252_v30 = vsel %vm3167_vm1, %v3251_v40, %v3227_v12  ;;  %v1440_v58 = vsel %vm1430_vm5, %v1437_v5, %v1439_v13 }
 0x2b7   : > { %v1443_v51 = vsel %vm1431_vm6, %v1425_v8, %v1442_v6  ;;  %v6465_v24 = vmul.u32.u64.low %v1445_v62, %v1440_v58  ;;  %v6466_v50 = vmul.u32.u64.high %v1445_v62, %v1440_v58, %v6465_v24  ;;  %v1436_v45 = vsel %vm1430_vm5, %v1433_v26, %v1435_v2 }
 0x2b8   : > { %v1444_v11 = vsel %vm1430_vm5, %v1441_v17, %v1443_v51  ;;  %v3065_v22 = vshrl.u32 %v3064_v15, 23  ;;  %vm4150_vm7 = vcmp.lt.s32.totalorder %v4149_v36, 0  ;;  %vm1596_vm8 = vcmp.lt.s32.totalorder %v6436_v56, 2 }
 0x2b9   : > { %v6470_v48 = vmul.u32.u64.low %v1445_v62, %v1444_v11  ;;  %v6471_v39 = vmul.u32.u64.high %v1445_v62, %v1444_v11, %v6470_v48  ;;  %vm1597_vm9 = vcmp.eq.s32.totalorder %v6436_v56, 0  ;;  %v3236_v12 = vsel %vm4150_vm7, 0, %v4149_v36 }
 0x2ba   : > { %v4143_v47 = vadd.s32 4294967169, %v3065_v22  ;;  %v3221_v10 = vadd.s32 %v6378_v37, %v6384_v55  ;;  %v3237_v7 = vsub.s32 32, %v3236_v12  ;;  %v3241_v49 = vsub.s32 4294967266, %v3236_v12 }
 0x2bb   : > { %v3061_v52 = vand.u32 2147483647, %v6416_v18  ;;  %v3254_v60 = vsel %vm6450_vm3, 0, %v3252_v30  ;;  %v1452_v35 = vmul.u32 %v1445_v62, %v1436_v45  ;;  %v1455_v0 = vadd.s32 1, %v6466_v50 }
 0x2bc   : > { %v3071_v54 = vadd.s32 1, %v4143_v47  ;;  %v3238_v9 = vshll.u32 %v6438_v23, %v3236_v12  ;;  %v3239_v53 = vshrl.u32 %v3221_v10, %v3237_v7  ;;  %v3242_v3 = vadd.s32 127, %v3241_v49 }
 0x2bd   : > { %v4552_v8 = vpop.eup %4551  ;;  %vm1454_vm10 = vc.u32 %v6471_v39, %v6465_v24  ;;  %vm1600_vm11 = vcmp.eq.s32.totalorder %v6436_v56, 2  ;;  %v3258_v1 = vadd.s32 3, %v3254_v60  ;;  %v3068_v23 = vand.u32 8388607, %v3061_v52 }
 0x2be   : > { %v4554_v37 = vpop.eup %4553  ;;  %v1601_v55 = vxor.u32 2147483648, %v4552_v8  ;;  %v1456_v59 = vsel %vm1454_vm10, %v1455_v0, %v6466_v50  ;;  %vm3072_vm12 = vcmp.gt.s32.totalorder %v3071_v54, 0  ;;  %v3240_v62 = vor.u32 %v3239_v53, %v3238_v9 }
 0x2bf   : > { %v1598_v63 = vxor.u32 2147483648, %v4554_v37  ;;  %v3243_v40 = vshll.u32 %v3242_v3, 23  ;;  %v1457_v42 = vadd.s32 %v1456_v59, %v1452_v35  ;;  %v3073_v5 = vsel %vm3072_vm12, %v3071_v54, 0 }
 0x2c0   : > { %v1602_v14 = vsel %vm1600_vm11, %v1601_v55, %v4554_v37  ;;  %v1712_v17 = vand.u32 2139095040, %v6421_v16  ;;  %vm1593_vm13 = vweird.f32 %v6186_v44  ;;  %v3075_v13 = vand.u32 31, %v3073_v5 }
 0x2c1   : > { %v1599_v33 = vsel %vm1597_vm9, %v4552_v8, %v1598_v63  ;;  %v3244_v34 = vor.u32 4788187, %v3243_v40  ;;  %v1458_v26 = vadd.s32 536870912, %v1457_v42  ;;  %v3247_v36 = vcvt.s32.f32 %v3240_v62 }
 0x2c2   : > { %v1603_v2 = vsel %vm1596_vm8, %v1599_v33, %v1602_v14  ;;  %v6497_v58 = vand.u32 3, %v3258_v1  ;;  %v3069_v51 = vor.u32 8388608, %v3068_v23  ;;  %v3076_v11 = vsub.s32 32, %v3075_v13 }
 0x2c3   : > { %v1604_v6 = vsel %vm1593_vm13, nan, %v1603_v2  ;;  %v3245_v15 = vand.u32 2147483647, %v3244_v34  ;;  %v6494_v30 = vshrl.u32 %v1458_v26, 30  ;;  %v1709_v50 = vand.u32 2147483647, %v6421_v16 }
 0x2c4   : > { %3902 = vst [vmem:[%s5180_s6 + $0x48] sm:$0xff] %v1604_v6  ;;  %v3078_v44 = vshll.u32 %v4684_v21, %v3075_v13  ;;  %v1713_v56 = vshrl.u32 %v1712_v17, 23  ;;  %v3079_v48 = vshrl.u32 %v4685_v25, %v3076_v11  ;;  %v3081_v12 = vshll.u32 %v4685_v25, %v3075_v13 }
 0x2c5   : > { %v3248_v22 = vmul.f32 %v3247_v36, %v3245_v15  ;;  %v1460_v45 = vshll.u32 %v6494_v30, 30  ;;  %v3082_v47 = vshrl.u32 %v4686_v27, %v3076_v11  ;;  %v3085_v10 = vshrl.u32 %v4687_v29, %v3076_v11 }
 0x2c6   : > { %v3084_v60 = vshll.u32 %v4686_v27, %v3075_v13  ;;  %v3088_v35 = vshrl.u32 %v4688_v31, %v3076_v11  ;;  %v3074_v0 = vshrl.u32 %v3073_v5, 5  ;;  %v3080_v54 = vor.u32 %v3079_v48, %v3078_v44 }
 0x2c7   : > { %v3249_v7 = vxor.u32 2147483648, %v3248_v22  ;;  %v6506_v49 = vsub.s32 %v1457_v42, %v1460_v45  ;;  %v3087_v8 = vshll.u32 %v4687_v29, %v3075_v13  ;;  %v6511_v9 = vshll.u32 %v3069_v51, 8 }
 0x2c8   : > { %v3083_v37 = vor.u32 %v3082_v47, %v3081_v12  ;;  %v3086_v55 = vor.u32 %v3085_v10, %v3084_v60  ;;  %vm1399_vm14 = vcmp.lt.s32.totalorder %v6256_v4, 0  ;;  %v3090_v62 = vshll.u32 %v4688_v31, %v3075_v13  ;;  %v6552_v60 = vpop.f32.mrb[13].mxu0 }
 0x2c9   : > { %v3250_v53 = vsel %vm3167_vm1, %v3249_v7, %v3248_v22  ;;  %v1463_v3 = vsub.s32 0, %v6506_v49  ;;  %v3089_v63 = vor.u32 %v3088_v35, %v3087_v8  ;;  %v3091_v40 = vshrl.u32 %v4689_v38, %v3076_v11 }
 0x2ca   : > { %v3253_v59 = vsel %vm6450_vm3, %v6246_v57, %v3250_v53  ;;  %v1453_v42 = vadd.s32 %v6465_v24, %v6471_v39  ;;  %v4091_v1 = vadd.s32 4294967169, %v1713_v56  ;;  %v1483_v23 = vsub.s32 4, %v6494_v30 }
 0x2cb   : > { %4555 = vcosq.f32 %v3253_v59  ;;  %v4080_v14 = vmin.u32 %v1463_v3, %v6506_v49  ;;  %v3077_v19 = vshrl.u32 %v4684_v21, %v3076_v11  ;;  %v3092_v5 = vor.u32 %v3091_v40, %v3090_v62 }
 0x2cc   : > { %4557 = vsinq.f32 %v3253_v59  ;;  %vm6529_vm15 = vcmp.le.f32.partialorder %v1397_v41, 0.7853982  ;;  %vm3093_vm0 = vcmp.lt.s32.totalorder %v3074_v0, 1  ;;  %vm3094_vm1 = vcmp.lt.s32.totalorder %v3074_v0, 2 }
 0x2cd   : > { %v1465_v34 = vclz %v4080_v14  ;;  %vm3096_vm2 = vcmp.lt.s32.totalorder %v3074_v0, 4  ;;  %vm3095_vm3 = vcmp.lt.s32.totalorder %v3074_v0, 3  ;;  %v3101_v39 = vsel %vm3093_vm0, %v3080_v54, %v3083_v37 }
 0x2ce   : > { %v3098_v24 = vsel %vm3096_vm2, %v3086_v55, 2102212464  ;;  %v3102_v26 = vsel %vm3096_vm2, %v3089_v63, 920167782  ;;  %vm3264_vm4 = vcmp.eq.s32.totalorder %v6497_v58, 2  ;;  %v3097_v2 = vsel %vm3093_vm0, %v3077_v19, %v3080_v54 }
 0x2cf   : > { %v4081_v17 = vadd.s32 4294967294, %v1465_v34  ;;  %v3103_v13 = vsel %vm3095_vm3, %v3086_v55, %v3102_v26  ;;  %v3105_v6 = vsel %vm3093_vm0, %v3083_v37, %v3086_v55  ;;  %vm3261_vm5 = vcmp.eq.s32.totalorder %v6497_v58, 0 }
 0x2d0   : > { %v3099_v41 = vsel %vm3095_vm3, %v3083_v37, %v3098_v24  ;;  %v3104_v15 = vsel %vm3094_vm1, %v3101_v39, %v3103_v13  ;;  %v3106_v36 = vsel %vm3096_vm2, %v3092_v5, 1326507024  ;;  %v1719_v51 = vadd.s32 1, %v4091_v1 }
 0x2d1   : > { %vm3260_vm6 = vcmp.lt.s32.totalorder %v6497_v58, 2  ;;  %vm4082_vm7 = vcmp.lt.s32.totalorder %v4081_v17, 0  ;;  %v3107_v11 = vsel %vm3095_vm3, %v3089_v63, %v3106_v36  ;;  %vm3257_vm8 = vweird.f32 %v6246_v57 }
 0x2d2   : > { %v6541_v22 = vmul.u32.u64.low %v6511_v9, %v3104_v15  ;;  %v6542_v45 = vmul.u32.u64.high %v6511_v9, %v3104_v15, %v6541_v22  ;;  %v1468_v44 = vsel %vm4082_vm7, 0, %v4081_v17  ;;  %v3108_v56 = vsel %vm3094_vm1, %v3105_v6, %v3107_v11 }
 0x2d3   : > { %v1716_v48 = vand.u32 8388607, %v1709_v50  ;;  %vm1720_vm9 = vcmp.gt.s32.totalorder %v1719_v51, 0  ;;  %v1469_v12 = vsub.s32 32, %v1468_v44  ;;  %v1473_v47 = vsub.s32 4294967266, %v1468_v44 }
 0x2d4   : > { %v1484_v10 = vsel %vm1399_vm14, %v1483_v23, %v6494_v30  ;;  %v1721_v7 = vsel %vm1720_vm9, %v1719_v51, 0  ;;  %v3100_v35 = vsel %vm3094_vm1, %v3097_v2, %v3099_v41  ;;  %v1470_v37 = vshll.u32 %v6506_v49, %v1468_v44 }
 0x2d5   : > { %v6556_v54 = vmul.u32.u64.low %v6511_v9, %v3108_v56  ;;  %v6557_v8 = vmul.u32.u64.high %v6511_v9, %v3108_v56, %v6556_v54  ;;  %v1723_v53 = vand.u32 31, %v1721_v7  ;;  %v4556_v3 = vpop.eup %4555  ;;  %v1471_v55 = vshrl.u32 %v1453_v42, %v1469_v12 }
 0x2d6   : > { %v1474_v59 = vadd.s32 127, %v1473_v47  ;;  %v3119_v63 = vadd.s32 1, %v6542_v45  ;;  %v4558_v62 = vpop.eup %4557  ;;  %v3265_v40 = vxor.u32 2147483648, %v4556_v3  ;;  %v1486_v30 = vsel %vm6529_vm15, 0, %v1484_v10 }
 0x2d7   : > { %v1717_v14 = vor.u32 8388608, %v1716_v48  ;;  %v1724_v0 = vsub.s32 32, %v1723_v53  ;;  %v3262_v1 = vxor.u32 2147483648, %v4558_v62  ;;  %v1472_v23 = vor.u32 %v1471_v55, %v1470_v37 }
 0x2d8   : > { %v1475_v19 = vshll.u32 %v1474_v59, 23  ;;  %v3116_v5 = vmul.u32 %v6511_v9, %v3100_v35  ;;  %v3266_v34 = vsel %vm3264_vm4, %v3265_v40, %v4558_v62  ;;  %vm3118_vm10 = vc.u32 %v6557_v8, %v6541_v22 }
 0x2d9   : > { %v6568_v49 = vshrl.u32 %v1721_v7, 5  ;;  %v1726_v42 = vshll.u32 %v4684_v21, %v1723_v53  ;;  %v3263_v24 = vsel %vm3261_vm5, %v4556_v3, %v3262_v1  ;;  %v3120_v26 = vsel %vm3118_vm10, %v3119_v63, %v6542_v45 }
 0x2da   : > { %v1476_v39 = vor.u32 4788187, %v1475_v19  ;;  %v1729_v17 = vshll.u32 %v4685_v25, %v1723_v53  ;;  %v3267_v9 = vsel %vm3260_vm6, %v3263_v24, %v3266_v34  ;;  %v3121_v2 = vadd.s32 %v3120_v26, %v3116_v5 }
 0x2db   : > { %v1727_v13 = vshrl.u32 %v4685_v25, %v1724_v0  ;;  %v1730_v6 = vshrl.u32 %v4686_v27, %v1724_v0  ;;  %v3268_v41 = vsel %vm3257_vm8, nan, %v3267_v9  ;;  %v1479_v36 = vcvt.s32.f32 %v1472_v23 }
 0x2dc   : > { %v1477_v15 = vand.u32 2147483647, %v1476_v39  ;;  %v1733_v51 = vshrl.u32 %v4687_v29, %v1724_v0  ;;  %3918 = vst [vmem:[%s5180_s6 + $0xc8] sm:$0xff] %v3268_v41  ;;  %v3122_v11 = vadd.s32 536870912, %v3121_v2  ;;  %v1732_v45 = vshll.u32 %v4686_v27, %v1723_v53  ;;  %v6635_v41 = vpop.f32.mrb[13].mxu1 }
 0x2dd   : > { %v1735_v44 = vshll.u32 %v4687_v29, %v1723_v53  ;;  %v1736_v58 = vshrl.u32 %v4688_v31, %v1724_v0  ;;  %v1728_v48 = vor.u32 %v1727_v13, %v1726_v42  ;;  %v1731_v12 = vor.u32 %v1730_v6, %v1729_v17 }
 0x2de   : > { %v1480_v56 = vmul.f32 %v1479_v36, %v1477_v15  ;;  %v1739_v47 = vshrl.u32 %v4689_v38, %v1724_v0  ;;  %v3123_v10 = vshrl.u32 %v3122_v11, 30  ;;  %v1490_v35 = vadd.s32 3, %v1486_v30 }
 0x2df   : > { %v1737_v57 = vor.u32 %v1736_v58, %v1735_v44  ;;  %v1734_v54 = vor.u32 %v1733_v51, %v1732_v45  ;;  %v1738_v3 = vshll.u32 %v4688_v31, %v1723_v53  ;;  %vm1741_vm11 = vcmp.lt.s32.totalorder %v6568_v49, 1 }
 0x2e0   : > { %v1481_v7 = vxor.u32 2147483648, %v1480_v56  ;;  %v3124_v37 = vshll.u32 %v3123_v10, 30  ;;  %vm1744_vm12 = vcmp.lt.s32.totalorder %v6568_v49, 4  ;;  %v6590_v55 = vshll.u32 %v1717_v14, 8 }
 0x2e1   : > { %v1740_v63 = vor.u32 %v1739_v47, %v1738_v3  ;;  %v1749_v62 = vsel %vm1741_vm11, %v1728_v48, %v1731_v12  ;;  %v1750_v40 = vsel %vm1744_vm12, %v1737_v57, 920167782  ;;  %v1725_v1 = vshrl.u32 %v4684_v21, %v1724_v0 }
 0x2e2   : > { %v1482_v59 = vsel %vm1399_vm14, %v1481_v7, %v1480_v56  ;;  %v6601_v30 = vsub.s32 %v3121_v2, %v3124_v37  ;;  %vm1743_vm13 = vcmp.lt.s32.totalorder %v6568_v49, 3  ;;  %vm1742_vm14 = vcmp.lt.s32.totalorder %v6568_v49, 2 }
 0x2e3   : > { %v1485_v53 = vsel %vm6529_vm15, %v6256_v4, %v1482_v59  ;;  %v1746_v14 = vsel %vm1744_vm12, %v1734_v54, 2102212464  ;;  %v1751_v23 = vsel %vm1743_vm13, %v1734_v54, %v1750_v40  ;;  %v1753_v0 = vsel %vm1741_vm11, %v1731_v12, %v1734_v54 }
 0x2e4   : > { %4559 = vcosq.f32 %v1485_v53  ;;  %v3127_v19 = vsub.s32 0, %v6601_v30  ;;  %v1752_v33 = vsel %vm1742_vm14, %v1749_v62, %v1751_v23  ;;  %v3147_v5 = vsub.s32 4, %v3123_v10 }
 0x2e5   : > { %4561 = vsinq.f32 %v1485_v53  ;;  %v1754_v34 = vsel %vm1744_vm12, %v1740_v63, 1326507024  ;;  %v6618_v42 = vmul.u32.u64.low %v6590_v55, %v1752_v33  ;;  %v6619_v24 = vmul.u32.u64.high %v6590_v55, %v1752_v33, %v6618_v42 }
 0x2e6   : > { %v1491_v39 = vand.u32 3, %v1490_v35  ;;  %v4144_v26 = vmin.u32 %v3127_v19, %v6601_v30  ;;  %v1755_v17 = vsel %vm1743_vm13, %v1737_v57, %v1754_v34  ;;  %v1745_v9 = vsel %vm1741_vm11, %v1725_v1, %v1728_v48 }
 0x2e7   : > { %v1747_v2 = vsel %vm1743_vm13, %v1731_v12, %v1746_v14  ;;  %v1756_v13 = vsel %vm1742_vm14, %v1753_v0, %v1755_v17  ;;  %v6633_v6 = vadd.f32 %v6412_v61, %v6188_v43  ;;  %vm3063_vm15 = vcmp.lt.s32.totalorder %v6416_v18, 0 }
 0x2e8   : > { %v3129_v15 = vclz %v4144_v26  ;;  %v3148_v36 = vsel %vm3063_vm15, %v3147_v5, %v3123_v10  ;;  %v6641_v51 = vmul.u32.u64.low %v6590_v55, %v1756_v13  ;;  %v6642_v11 = vmul.u32.u64.high %v6590_v55, %v1756_v13, %v6641_v51 }
 0x2e9   : > { %vm1489_vm0 = vweird.f32 %v6256_v4  ;;  %v1748_v44 = vsel %vm1742_vm14, %v1745_v9, %v1747_v2  ;;  %v3376_v43 = vand.u32 2139095040, %v6633_v6  ;;  %v6650_v58 = vadd.f32 %v6412_v61, %v6239_v32 }
 0x2ea   : > { %v4145_v45 = vadd.s32 4294967294, %v3129_v15  ;;  %vm1493_vm1 = vcmp.eq.s32.totalorder %v1491_v39, 0  ;;  %vm1496_vm2 = vcmp.eq.s32.totalorder %v1491_v39, 2  ;;  %vm6654_vm3 = vcmp.le.f32.partialorder %v3061_v52, 0.7853982 }
 0x2eb   : > { %v1767_v48 = vadd.s32 1, %v6619_v24  ;;  %v3117_v49 = vadd.s32 %v6541_v22, %v6557_v8  ;;  %v3150_v12 = vsel %vm6654_vm3, 0, %v3148_v36  ;;  %v3377_v47 = vshrl.u32 %v3376_v43, 23 }
 0x2ec   : > { %vm4146_vm4 = vcmp.lt.s32.totalorder %v4145_v45, 0  ;;  %v1764_v57 = vmul.u32 %v6590_v55, %v1748_v44  ;;  %vm1766_vm5 = vc.u32 %v6642_v11, %v6618_v42  ;;  %v3373_v52 = vand.u32 2147483647, %v6633_v6 }
 0x2ed   : > { %v3132_v10 = vsel %vm4146_vm4, 0, %v4145_v45  ;;  %v1608_v22 = vand.u32 2139095040, %v6650_v58  ;;  %v1768_v59 = vsel %vm1766_vm5, %v1767_v48, %v6619_v24  ;;  %v4155_v63 = vadd.s32 4294967169, %v3377_v47 }
 0x2ee   : > { %v4560_v32 = vpop.eup %4559  ;;  %v3133_v54 = vsub.s32 32, %v3132_v10  ;;  %v3137_v3 = vsub.s32 4294967266, %v3132_v10  ;;  %v3134_v37 = vshll.u32 %v6601_v30, %v3132_v10  ;;  %v1769_v53 = vadd.s32 %v1768_v59, %v1764_v57 }
 0x2ef   : > { %v4562_v7 = vpop.eup %4561  ;;  %v1497_v35 = vxor.u32 2147483648, %v4560_v32  ;;  %vm1492_vm6 = vcmp.lt.s32.totalorder %v1491_v39, 2  ;;  %v3154_v14 = vadd.s32 3, %v3150_v12  ;;  %v3383_v23 = vadd.s32 1, %v4155_v63 }
 0x2f0   : > { %v1494_v8 = vxor.u32 2147483648, %v4562_v7  ;;  %v3135_v62 = vshrl.u32 %v3117_v49, %v3133_v54  ;;  %v3138_v40 = vadd.s32 127, %v3137_v3  ;;  %v1770_v5 = vadd.s32 536870912, %v1769_v53 }
 0x2f1   : > { %v1498_v55 = vsel %vm1496_vm2, %v1497_v35, %v4562_v7  ;;  %v3380_v34 = vand.u32 8388607, %v3373_v52  ;;  %vm3384_vm7 = vcmp.gt.s32.totalorder %v3383_v23, 0  ;;  %v1609_v9 = vshrl.u32 %v1608_v22, 23 }
 0x2f2   : > { %v1495_v1 = vsel %vm1493_vm1, %v4560_v32, %v1494_v8  ;;  %v3136_v33 = vor.u32 %v3135_v62, %v3134_v37  ;;  %v3139_v0 = vshll.u32 %v3138_v40, 23  ;;  %v1771_v26 = vshrl.u32 %v1770_v5, 30 }
 0x2f3   : > { %v1499_v19 = vsel %vm1492_vm6, %v1495_v1, %v1498_v55  ;;  %v3385_v17 = vsel %vm3384_vm7, %v3383_v23, 0  ;;  %v6677_v39 = vand.u32 3, %v3154_v14  ;;  %vm1711_vm8 = vcmp.lt.s32.totalorder %v6421_v16, 0 }
 0x2f4   : > { %v1500_v30 = vsel %vm1489_vm0, nan, %v1499_v19  ;;  %v3140_v24 = vor.u32 4788187, %v3139_v0  ;;  %v3387_v2 = vand.u32 31, %v3385_v17  ;;  %v3143_v15 = vcvt.s32.f32 %v3136_v33 }
 0x2f5   : > { %3901 = vst [vmem:[%s5180_s6 + $0x40] sm:$0xff] %v1500_v30  ;;  %v1772_v36 = vshll.u32 %v1771_v26, 30  ;;  %v6682_v4 = vadd.f32 %v6412_v61, %v6301_v28  ;;  %v1765_v51 = vadd.s32 %v6618_v42, %v6642_v11  ;;  %v3381_v45 = vor.u32 8388608, %v3380_v34 }
 0x2f6   : > { %v3141_v13 = vand.u32 2147483647, %v3140_v24  ;;  %v3388_v44 = vsub.s32 32, %v3387_v2  ;;  %v1605_v43 = vand.u32 2147483647, %v6650_v58  ;;  %v6689_v12 = vshrl.u32 %v3385_v17, 5 }
 0x2f7   : > { %v6687_v49 = vsub.s32 %v1769_v53, %v1772_v36  ;;  %v4087_v47 = vadd.s32 4294967169, %v1609_v9  ;;  %v1795_v32 = vsub.s32 4, %v1771_v26  ;;  %v3390_v10 = vshll.u32 %v4684_v21, %v3387_v2 }
 0x2f8   : > { %v3144_v48 = vmul.f32 %v3143_v15, %v3141_v13  ;;  %v3391_v57 = vshrl.u32 %v4685_v25, %v3388_v44  ;;  %v3394_v28 = vshrl.u32 %v4686_v27, %v3388_v44  ;;  %v3393_v11 = vshll.u32 %v4685_v25, %v3387_v2 }
 0x2f9   : > { %v1775_v42 = vsub.s32 0, %v6687_v49  ;;  %v3397_v35 = vshrl.u32 %v4687_v29, %v3388_v44  ;;  %v3396_v3 = vshll.u32 %v4686_v27, %v3387_v2  ;;  %v3399_v22 = vshll.u32 %v4687_v29, %v3387_v2 }
 0x2fa   : > { %v3145_v7 = vxor.u32 2147483648, %v3144_v48  ;;  %v3392_v54 = vor.u32 %v3391_v57, %v3390_v10  ;;  %v3400_v8 = vshrl.u32 %v4688_v31, %v3388_v44  ;;  %v3395_v63 = vor.u32 %v3394_v28, %v3393_v11 }
 0x2fb   : > { %v4092_v59 = vmin.u32 %v1775_v42, %v6687_v49  ;;  %v3402_v55 = vshll.u32 %v4688_v31, %v3387_v2  ;;  %v3398_v40 = vor.u32 %v3397_v35, %v3396_v3  ;;  %v3403_v1 = vshrl.u32 %v4689_v38, %v3388_v44  ;;  %v6745_v35 = vpop.f32.mrb[14].mxu0 }
 0x2fc   : > { %v3146_v37 = vsel %vm3063_vm15, %v3145_v7, %v3144_v48  ;;  %v3401_v53 = vor.u32 %v3400_v8, %v3399_v22  ;;  %v6708_v23 = vshll.u32 %v3381_v45, 8  ;;  %v1615_v19 = vadd.s32 1, %v4087_v47 }
 0x2fd   : > { %v3149_v62 = vsel %vm6654_vm3, %v6416_v18, %v3146_v37  ;;  %v1777_v14 = vclz %v4092_v59  ;;  %vm6712_vm9 = vcmp.le.f32.partialorder %v1709_v50, 0.7853982  ;;  %v1796_v56 = vsel %vm1711_vm8, %v1795_v32, %v1771_v26 }
 0x2fe   : > { %4563 = vcosq.f32 %v3149_v62  ;;  %v3389_v0 = vshrl.u32 %v4684_v21, %v3388_v44  ;;  %v3404_v5 = vor.u32 %v3403_v1, %v3402_v55  ;;  %vm3405_vm10 = vcmp.lt.s32.totalorder %v6689_v12, 1 }
 0x2ff   : > { %4565 = vsinq.f32 %v3149_v62  ;;  %v4093_v30 = vadd.s32 4294967294, %v1777_v14  ;;  %vm3407_vm11 = vcmp.lt.s32.totalorder %v6689_v12, 3  ;;  %vm3408_vm12 = vcmp.lt.s32.totalorder %v6689_v12, 4 }
 0x300   : > { %v3410_v34 = vsel %vm3408_vm12, %v3398_v40, 2102212464  ;;  %v3413_v24 = vsel %vm3405_vm10, %v3392_v54, %v3395_v63  ;;  %v3414_v17 = vsel %vm3408_vm12, %v3401_v53, 920167782  ;;  %v3417_v50 = vsel %vm3405_vm10, %v3395_v63, %v3398_v40 }
 0x301   : > { %vm4094_vm13 = vcmp.lt.s32.totalorder %v4093_v30, 0  ;;  %vm3406_vm14 = vcmp.lt.s32.totalorder %v6689_v12, 2  ;;  %v3415_v26 = vsel %vm3407_vm11, %v3398_v40, %v3414_v17  ;;  %v3418_v9 = vsel %vm3408_vm12, %v3404_v5, 1326507024 }
 0x302   : > { %v1780_v2 = vsel %vm4094_vm13, 0, %v4093_v30  ;;  %v3409_v13 = vsel %vm3405_vm10, %v3389_v0, %v3392_v54  ;;  %v3416_v15 = vsel %vm3406_vm14, %v3413_v24, %v3415_v26  ;;  %v3419_v36 = vsel %vm3407_vm11, %v3401_v53, %v3418_v9 }
 0x303   : > { %vm3156_vm15 = vcmp.lt.s32.totalorder %v6677_v39, 2  ;;  %v1781_v45 = vsub.s32 32, %v1780_v2  ;;  %v1785_v44 = vsub.s32 4294967266, %v1780_v2  ;;  %v3411_v48 = vsel %vm3407_vm11, %v3395_v63, %v3410_v34 }
 0x304   : > { %v3420_v47 = vsel %vm3406_vm14, %v3417_v50, %v3419_v36  ;;  %vm3153_vm0 = vweird.f32 %v6416_v18  ;;  %v6740_v57 = vmul.u32.u64.low %v6708_v23, %v3416_v15  ;;  %v6741_v28 = vmul.u32.u64.high %v6708_v23, %v3416_v15, %v6740_v57 }
 0x305   : > { %v6736_v32 = vmul.u32.u64.low %v6708_v23, %v3420_v47  ;;  %v6737_v10 = vmul.u32.u64.high %v6708_v23, %v3420_v47, %v6736_v32  ;;  %v1782_v7 = vshll.u32 %v6687_v49, %v1780_v2  ;;  %v1783_v42 = vshrl.u32 %v1765_v51, %v1781_v45 }
 0x306   : > { %v1786_v11 = vadd.s32 127, %v1785_v44  ;;  %vm1616_vm1 = vcmp.gt.s32.totalorder %v1615_v19, 0  ;;  %vm3157_vm2 = vcmp.eq.s32.totalorder %v6677_v39, 0  ;;  %v3412_v54 = vsel %vm3406_vm14, %v3409_v13, %v3411_v48 }
 0x307   : > { %v1612_v3 = vand.u32 8388607, %v1605_v43  ;;  %v1617_v22 = vsel %vm1616_vm1, %v1615_v19, 0  ;;  %v1784_v37 = vor.u32 %v1783_v42, %v1782_v7  ;;  %v1798_v49 = vsel %vm6712_vm9, 0, %v1796_v56 }
 0x308   : > { %v4564_v8 = vpop.eup %4563  ;;  %v1787_v59 = vshll.u32 %v1786_v11, 23  ;;  %v1619_v51 = vand.u32 31, %v1617_v22  ;;  %vm3160_vm3 = vcmp.eq.s32.totalorder %v6677_v39, 2  ;;  %vm3430_vm4 = vc.u32 %v6737_v10, %v6740_v57 }
 0x309   : > { %v4566_v63 = vpop.eup %4565  ;;  %v3161_v55 = vxor.u32 2147483648, %v4564_v8  ;;  %v3431_v12 = vadd.s32 1, %v6741_v28  ;;  %v3428_v53 = vmul.u32 %v6708_v23, %v3412_v54  ;;  %v1802_v19 = vadd.s32 3, %v1798_v49 }
 0x30a   : > { %v3158_v62 = vxor.u32 2147483648, %v4566_v63  ;;  %v1788_v40 = vor.u32 4788187, %v1787_v59  ;;  %v1620_v1 = vsub.s32 32, %v1619_v51  ;;  %v1613_v0 = vor.u32 8388608, %v1612_v3 }
 0x30b   : > { %v3162_v14 = vsel %vm3160_vm3, %v3161_v55, %v4566_v63  ;;  %v3432_v56 = vsel %vm3430_vm4, %v3431_v12, %v6741_v28  ;;  %v1791_v34 = vcvt.s32.f32 %v1784_v37  ;;  %v1622_v50 = vshll.u32 %v4684_v21, %v1619_v51 }
 0x30c   : > { %v3159_v5 = vsel %vm3157_vm2, %v4564_v8, %v3158_v62  ;;  %v1789_v30 = vand.u32 2147483647, %v1788_v40  ;;  %v3433_v24 = vadd.s32 %v3432_v56, %v3428_v53  ;;  %v1623_v23 = vshrl.u32 %v4685_v25, %v1620_v1 }
 0x30d   : > { %v3163_v17 = vsel %vm3156_vm15, %v3159_v5, %v3162_v14  ;;  %v1626_v26 = vshrl.u32 %v4686_v27, %v1620_v1  ;;  %v1629_v15 = vshrl.u32 %v4687_v29, %v1620_v1  ;;  %v1618_v36 = vshrl.u32 %v1617_v22, 5 }
 0x30e   : > { %v3164_v9 = vsel %vm3153_vm0, nan, %v3163_v17  ;;  %v1792_v2 = vmul.f32 %v1791_v34, %v1789_v30  ;;  %v3434_v13 = vadd.s32 536870912, %v3433_v24  ;;  %v1625_v45 = vshll.u32 %v4685_v25, %v1619_v51 }
 0x30f   : > { %3917 = vst [vmem:[%s5180_s6 + $0xc0] sm:$0xff] %v3164_v9  ;;  %v1628_v39 = vshll.u32 %v4686_v27, %v1619_v51  ;;  %v1632_v44 = vshrl.u32 %v4688_v31, %v1620_v1  ;;  %v1624_v32 = vor.u32 %v1623_v23, %v1622_v50  ;;  %v1631_v28 = vshll.u32 %v4687_v29, %v1619_v51 }
 0x310   : > { %v1793_v48 = vxor.u32 2147483648, %v1792_v2  ;;  %v3435_v47 = vshrl.u32 %v3434_v13, 30  ;;  %vm3375_vm5 = vcmp.lt.s32.totalorder %v6633_v6, 0  ;;  %v1627_v18 = vor.u32 %v1626_v26, %v1625_v45 }
 0x311   : > { %v1630_v7 = vor.u32 %v1629_v15, %v1628_v39  ;;  %v1634_v42 = vshll.u32 %v4688_v31, %v1619_v51  ;;  %v1635_v11 = vshrl.u32 %v4689_v38, %v1620_v1  ;;  %v6780_v3 = vand.u32 3, %v1802_v19 }
 0x312   : > { %v1794_v54 = vsel %vm1711_vm8, %v1793_v48, %v1792_v2  ;;  %v3436_v22 = vshll.u32 %v3435_v47, 30  ;;  %v1633_v8 = vor.u32 %v1632_v44, %v1631_v28  ;;  %v1621_v59 = vshrl.u32 %v4684_v21, %v1620_v1 }
 0x313   : > { %v1797_v37 = vsel %vm6712_vm9, %v6421_v16, %v1794_v54  ;;  %v1636_v49 = vor.u32 %v1635_v11, %v1634_v42  ;;  %v6786_v63 = vshll.u32 %v1613_v0, 8  ;;  %vm1637_vm6 = vcmp.lt.s32.totalorder %v1618_v36, 1 }
 0x314   : > { %4567 = vcosq.f32 %v1797_v37  ;;  %v6788_v51 = vsub.s32 %v3433_v24, %v3436_v22  ;;  %vm1640_vm7 = vcmp.lt.s32.totalorder %v1618_v36, 4  ;;  %vm1638_vm8 = vcmp.lt.s32.totalorder %v1618_v36, 2 }
 0x315   : > { %4569 = vsinq.f32 %v1797_v37  ;;  %v1642_v55 = vsel %vm1640_vm7, %v1630_v7, 2102212464  ;;  %v1645_v12 = vsel %vm1637_vm6, %v1624_v32, %v1627_v18  ;;  %v3459_v40 = vsub.s32 4, %v3435_v47 }
 0x316   : > { %v3439_v62 = vsub.s32 0, %v6788_v51  ;;  %vm1639_vm10 = vcmp.lt.s32.totalorder %v1618_v36, 3  ;;  %v1646_v33 = vsel %vm1640_vm7, %v1633_v8, 920167782  ;;  %v1641_v53 = vsel %vm1637_vm6, %v1621_v59, %v1624_v32  ;;  %v6818_v36 = vpop.f32.mrb[14].mxu1 }
 0x317   : > { %v1647_v14 = vsel %vm1639_vm10, %v1630_v7, %v1646_v33  ;;  %v1649_v1 = vsel %vm1637_vm6, %v1627_v18, %v1630_v7  ;;  %v1650_v19 = vsel %vm1640_vm7, %v1636_v49, 1326507024  ;;  %v1643_v0 = vsel %vm1639_vm10, %v1627_v18, %v1642_v55 }
 0x318   : > { %v4156_v56 = vmin.u32 %v3439_v62, %v6788_v51  ;;  %v1648_v5 = vsel %vm1638_vm8, %v1645_v12, %v1647_v14  ;;  %v1651_v30 = vsel %vm1639_vm10, %v1633_v8, %v1650_v19  ;;  %v3272_v50 = vand.u32 2139095040, %v6682_v4 }
 0x319   : > { %v1652_v34 = vsel %vm1638_vm8, %v1649_v1, %v1651_v30  ;;  %v6795_v24 = vmul.u32.u64.low %v6786_v63, %v1648_v5  ;;  %v6796_v17 = vmul.u32.u64.high %v6786_v63, %v1648_v5, %v6795_v24  ;;  %v3460_v26 = vsel %vm3375_vm5, %v3459_v40, %v3435_v47 }
 0x31a   : > { %v3441_v23 = vclz %v4156_v56  ;;  %v3269_v9 = vand.u32 2147483647, %v6682_v4  ;;  %v1644_v2 = vsel %vm1638_vm8, %v1641_v53, %v1643_v0  ;;  %v3273_v45 = vshrl.u32 %v3272_v50, 23 }
 0x31b   : > { %v6804_v13 = vmul.u32.u64.low %v6786_v63, %v1652_v34  ;;  %v6805_v15 = vmul.u32.u64.high %v6786_v63, %v1652_v34, %v6804_v13  ;;  %vm1804_vm9 = vcmp.lt.s32.totalorder %v6780_v3, 2  ;;  %vm6810_vm11 = vcmp.le.f32.partialorder %v3373_v52, 0.7853982 }
 0x31c   : > { %v4157_v44 = vadd.s32 4294967294, %v3441_v23  ;;  %v6816_v48 = vadd.f32 %v6412_v61, %v6404_v20  ;;  %vm1805_vm12 = vcmp.eq.s32.totalorder %v6780_v3, 0  ;;  %vm1808_vm13 = vcmp.eq.s32.totalorder %v6780_v3, 2 }
 0x31d   : > { %v1663_v47 = vadd.s32 1, %v6796_v17  ;;  %v4151_v32 = vadd.s32 4294967169, %v3273_v45  ;;  %v3429_v52 = vadd.s32 %v6740_v57, %v6737_v10  ;;  %v3462_v18 = vsel %vm6810_vm11, 0, %v3460_v26 }
 0x31e   : > { %v4568_v28 = vpop.eup %4567  ;;  %vm4158_vm14 = vcmp.lt.s32.totalorder %v4157_v44, 0  ;;  %v1660_v20 = vmul.u32 %v6786_v63, %v1644_v2  ;;  %vm1662_vm15 = vc.u32 %v6805_v15, %v6795_v24  ;;  %v3276_v11 = vand.u32 8388607, %v3269_v9 }
 0x31f   : > { %v4570_v61 = vpop.eup %4569  ;;  %v1809_v7 = vxor.u32 2147483648, %v4568_v28  ;;  %v3444_v42 = vsel %vm4158_vm14, 0, %v4157_v44  ;;  %v1920_v37 = vand.u32 2139095040, %v6816_v48  ;;  %v1664_v59 = vsel %vm1662_vm15, %v1663_v47, %v6796_v17 }
 0x320   : > { %v1806_v54 = vxor.u32 2147483648, %v4570_v61  ;;  %v3445_v22 = vsub.s32 32, %v3444_v42  ;;  %v3449_v8 = vsub.s32 4294967266, %v3444_v42  ;;  %v3446_v57 = vshll.u32 %v6788_v51, %v3444_v42 }
 0x321   : > { %v1810_v10 = vsel %vm1808_vm13, %v1809_v7, %v4570_v61  ;;  %v3279_v49 = vadd.s32 1, %v4151_v32  ;;  %v1665_v62 = vadd.s32 %v1664_v59, %v1660_v20  ;;  %vm1801_vm0 = vweird.f32 %v6421_v16 }
 0x322   : > { %v1807_v63 = vsel %vm1805_vm12, %v4568_v28, %v1806_v54  ;;  %v3447_v55 = vshrl.u32 %v3429_v52, %v3445_v22  ;;  %v3450_v12 = vadd.s32 127, %v3449_v8  ;;  %v3466_v33 = vadd.s32 3, %v3462_v18 }
 0x323   : > { %v1811_v40 = vsel %vm1804_vm9, %v1807_v63, %v1810_v10  ;;  %vm3280_vm1 = vcmp.gt.s32.totalorder %v3279_v49, 0  ;;  %v1666_v51 = vadd.s32 536870912, %v1665_v62  ;;  %v3277_v19 = vor.u32 8388608, %v3276_v11 }
 0x324   : > { %v1812_v53 = vsel %vm1801_vm0, nan, %v1811_v40  ;;  %v3448_v14 = vor.u32 %v3447_v55, %v3446_v57  ;;  %v3451_v1 = vshll.u32 %v3450_v12, 23  ;;  %v3281_v56 = vsel %vm3280_vm1, %v3279_v49, 0 }
 0x325   : > { %3904 = vst [vmem:[%s5180_s6 + $0x58] sm:$0xff] %v1812_v53  ;;  %v1667_v5 = vshrl.u32 %v1666_v51, 30  ;;  %v1921_v30 = vshrl.u32 %v1920_v37, 23  ;;  %v3283_v34 = vand.u32 31, %v3281_v56  ;;  %v6842_v23 = vand.u32 3, %v3466_v33 }
 0x326   : > { %v3452_v0 = vor.u32 4788187, %v3451_v1  ;;  %v3455_v50 = vcvt.s32.f32 %v3448_v14  ;;  %vm1607_vm2 = vcmp.lt.s32.totalorder %v6650_v58, 0  ;;  %v6846_v3 = vadd.s32 %v6795_v24, %v6805_v15 }
 0x327   : > { %v1668_v16 = vshll.u32 %v1667_v5, 30  ;;  %v3284_v26 = vsub.s32 32, %v3283_v34  ;;  %v6848_v2 = vshll.u32 %v3277_v19, 8  ;;  %v1917_v13 = vand.u32 2147483647, %v6816_v48 }
 0x328   : > { %v3453_v17 = vand.u32 2147483647, %v3452_v0  ;;  %v6853_v47 = vshrl.u32 %v3281_v56, 5  ;;  %v4099_v32 = vadd.s32 4294967169, %v1921_v30  ;;  %v1691_v28 = vsub.s32 4, %v1667_v5 }
 0x329   : > { %v6851_v44 = vsub.s32 %v1665_v62, %v1668_v16  ;;  %v3286_v52 = vshll.u32 %v4684_v21, %v3283_v34  ;;  %v3287_v18 = vshrl.u32 %v4685_v25, %v3284_v26  ;;  %v3290_v20 = vshrl.u32 %v4686_v27, %v3284_v26  ;;  %v6900_v16 = vpop.f32.mrb[15].mxu0 }
 0x32a   : > { %v3456_v45 = vmul.f32 %v3455_v50, %v3453_v17  ;;  %vm6860_vm3 = vcmp.le.f32.partialorder %v1605_v43, 0.7853982  ;;  %v3289_v7 = vshll.u32 %v4685_v25, %v3283_v34  ;;  %v3293_v42 = vshrl.u32 %v4687_v29, %v3284_v26 }
 0x32b   : > { %v1671_v61 = vsub.s32 0, %v6851_v44  ;;  %v3288_v11 = vor.u32 %v3287_v18, %v3286_v52  ;;  %v3292_v54 = vshll.u32 %v4686_v27, %v3283_v34  ;;  %v3295_v22 = vshll.u32 %v4687_v29, %v3283_v34 }
 0x32c   : > { %v3457_v24 = vxor.u32 2147483648, %v3456_v45  ;;  %v3296_v8 = vshrl.u32 %v4688_v31, %v3284_v26  ;;  %v3291_v10 = vor.u32 %v3290_v20, %v3289_v7  ;;  %v3298_v57 = vshll.u32 %v4688_v31, %v3283_v34 }
 0x32d   : > { %v4088_v43 = vmin.u32 %v1671_v61, %v6851_v44  ;;  %v3294_v49 = vor.u32 %v3293_v42, %v3292_v54  ;;  %v3299_v55 = vshrl.u32 %v4689_v38, %v3284_v26  ;;  %vm3301_vm4 = vcmp.lt.s32.totalorder %v6853_v47, 1 }
 0x32e   : > { %v3458_v37 = vsel %vm3375_vm5, %v3457_v24, %v3456_v45  ;;  %v3297_v63 = vor.u32 %v3296_v8, %v3295_v22  ;;  %v1927_v62 = vadd.s32 1, %v4099_v32  ;;  %v1692_v40 = vsel %vm1607_vm2, %v1691_v28, %v1667_v5 }
 0x32f   : > { %v3461_v59 = vsel %vm6810_vm11, %v6633_v6, %v3458_v37  ;;  %v1673_v12 = vclz %v4088_v43  ;;  %v3285_v33 = vshrl.u32 %v4684_v21, %v3284_v26  ;;  %v3300_v53 = vor.u32 %v3299_v55, %v3298_v57 }
 0x330   : > { %4571 = vcosq.f32 %v3461_v59  ;;  %vm3303_vm5 = vcmp.lt.s32.totalorder %v6853_v47, 3  ;;  %vm3304_vm6 = vcmp.lt.s32.totalorder %v6853_v47, 4  ;;  %v3309_v39 = vsel %vm3301_vm4, %v3288_v11, %v3291_v10 }
 0x331   : > { %4573 = vsinq.f32 %v3461_v59  ;;  %v4089_v14 = vadd.s32 4294967294, %v1673_v12  ;;  %v3306_v1 = vsel %vm3304_vm6, %v3294_v49, 2102212464  ;;  %v3310_v51 = vsel %vm3304_vm6, %v3297_v63, 920167782 }
 0x332   : > { %v3313_v19 = vsel %vm3301_vm4, %v3291_v10, %v3294_v49  ;;  %v3314_v56 = vsel %vm3304_vm6, %v3300_v53, 1326507024  ;;  %vm3302_vm8 = vcmp.lt.s32.totalorder %v6853_v47, 2  ;;  %v3311_v0 = vsel %vm3303_vm5, %v3294_v49, %v3310_v51  ;;  %v6930_v47 = vld [vmem:[%s7596_s2] ss:$0 sm:$0xff] }
 0x333   : > { %vm4090_vm7 = vcmp.lt.s32.totalorder %v4089_v14, 0  ;;  %v3315_v5 = vsel %vm3303_vm5, %v3297_v63, %v3314_v56  ;;  %vm3469_vm10 = vcmp.eq.s32.totalorder %v6842_v23, 0  ;;  %v1694_v34 = vsel %vm6860_vm3, 0, %v1692_v40 }
 0x334   : > { %v1676_v30 = vsel %vm4090_vm7, 0, %v4089_v14  ;;  %v3312_v17 = vsel %vm3302_vm8, %v3309_v39, %v3311_v0  ;;  %v3316_v50 = vsel %vm3302_vm8, %v3313_v19, %v3315_v5  ;;  %vm3468_vm9 = vcmp.lt.s32.totalorder %v6842_v23, 2 }
 0x335   : > { %v1677_v26 = vsub.s32 32, %v1676_v30  ;;  %v1681_v45 = vsub.s32 4294967266, %v1676_v30  ;;  %v3305_v32 = vsel %vm3301_vm4, %v3285_v33, %v3288_v11  ;;  %v3307_v28 = vsel %vm3303_vm5, %v3291_v10, %v3306_v1 }
 0x336   : > { %vm3465_vm11 = vweird.f32 %v6633_v6  ;;  %v6909_v52 = vmul.u32.u64.low %v6848_v2, %v3316_v50  ;;  %v6910_v18 = vmul.u32.u64.high %v6848_v2, %v3316_v50, %v6909_v52  ;;  %v1678_v61 = vshll.u32 %v6851_v44, %v1676_v30 }
 0x337   : > { %v6913_v20 = vmul.u32.u64.low %v6848_v2, %v3312_v17  ;;  %v6914_v24 = vmul.u32.u64.high %v6848_v2, %v3312_v17, %v6913_v20  ;;  %v1679_v7 = vshrl.u32 %v6846_v3, %v1677_v26  ;;  %v1682_v42 = vadd.s32 127, %v1681_v45 }
 0x338   : > { %vm1928_vm12 = vcmp.gt.s32.totalorder %v1927_v62, 0  ;;  %v1698_v11 = vadd.s32 3, %v1694_v34  ;;  %v3308_v54 = vsel %vm3302_vm8, %v3305_v32, %v3307_v28  ;;  %v1924_v22 = vand.u32 8388607, %v1917_v13 }
 0x339   : > { %v1929_v8 = vsel %vm1928_vm12, %v1927_v62, 0  ;;  %vm3472_vm13 = vcmp.eq.s32.totalorder %v6842_v23, 2  ;;  %v1680_v43 = vor.u32 %v1679_v7, %v1678_v61  ;;  %v1683_v10 = vshll.u32 %v1682_v42, 23 }
 0x33a   : > { %v4572_v37 = vpop.eup %4571  ;;  %v1931_v57 = vand.u32 31, %v1929_v8  ;;  %vm3326_vm14 = vc.u32 %v6910_v18, %v6913_v20  ;;  %v3327_v3 = vadd.s32 1, %v6914_v24  ;;  %v6934_v49 = vadd.f32 %v6930_v47, %v6459_v46 }
 0x33b   : > { %v4574_v59 = vpop.eup %4573  ;;  %v3473_v44 = vxor.u32 2147483648, %v4572_v37  ;;  %v1684_v55 = vor.u32 4788187, %v1683_v10  ;;  %v3324_v12 = vmul.u32 %v6848_v2, %v3308_v54  ;;  %v6937_v33 = vand.u32 3, %v1698_v11 }
 0x33c   : > { %v3470_v63 = vxor.u32 2147483648, %v4574_v59  ;;  %v1932_v62 = vsub.s32 32, %v1931_v57  ;;  %v3328_v53 = vsel %vm3326_vm14, %v3327_v3, %v6914_v24  ;;  %v1925_v14 = vor.u32 8388608, %v1924_v22 }
 0x33d   : > { %v3474_v40 = vsel %vm3472_vm13, %v3473_v44, %v4574_v59  ;;  %v1685_v1 = vand.u32 2147483647, %v1684_v55  ;;  %v1687_v51 = vcvt.s32.f32 %v1680_v43  ;;  %v3329_v19 = vadd.s32 %v3328_v53, %v3324_v12 }
 0x33e   : > { %v3471_v39 = vsel %vm3469_vm10, %v4572_v37, %v3470_v63  ;;  %v1934_v56 = vshll.u32 %v4684_v21, %v1931_v57  ;;  %v1935_v2 = vshrl.u32 %v4685_v25, %v1932_v62  ;;  %v1938_v0 = vshrl.u32 %v4686_v27, %v1932_v62 }
 0x33f   : > { %v3475_v46 = vsel %vm3468_vm9, %v3471_v39, %v3474_v40  ;;  %v1688_v30 = vmul.f32 %v1687_v51, %v1685_v1  ;;  %v3330_v34 = vadd.s32 536870912, %v3329_v19  ;;  %v1941_v17 = vshrl.u32 %v4687_v29, %v1932_v62 }
 0x340   : > { %v3476_v5 = vsel %vm3465_vm11, nan, %v3475_v46  ;;  %v1930_v50 = vshrl.u32 %v1929_v8, 5  ;;  %v1937_v26 = vshll.u32 %v4685_v25, %v1931_v57  ;;  %v1940_v23 = vshll.u32 %v4686_v27, %v1931_v57 }
 0x341   : > { %3920 = vst [vmem:[%s5180_s6 + $0xd8] sm:$0xff] %v3476_v5  ;;  %v1944_v45 = vshrl.u32 %v4688_v31, %v1932_v62  ;;  %v1689_v32 = vxor.u32 2147483648, %v1688_v30  ;;  %v3331_v28 = vshrl.u32 %v3330_v34, 30  ;;  %v1936_v52 = vor.u32 %v1935_v2, %v1934_v56 }
 0x342   : > { %v1943_v24 = vshll.u32 %v4687_v29, %v1931_v57  ;;  %v1939_v61 = vor.u32 %v1938_v0, %v1937_v26  ;;  %v1942_v6 = vor.u32 %v1941_v17, %v1940_v23  ;;  %v1946_v7 = vshll.u32 %v4688_v31, %v1931_v57  ;;  %v6976_v0 = vpop.f32.mrb[15].mxu1 }
 0x343   : > { %v1947_v42 = vshrl.u32 %v4689_v38, %v1932_v62  ;;  %v1690_v11 = vsel %vm1607_vm2, %v1689_v32, %v1688_v30  ;;  %v3332_v54 = vshll.u32 %v3331_v28, 30  ;;  %v6959_v8 = vshll.u32 %v1925_v14, 8 }
 0x344   : > { %v1945_v22 = vor.u32 %v1944_v45, %v1943_v24  ;;  %v1693_v37 = vsel %vm6860_vm3, %v6650_v58, %v1690_v11  ;;  %v1933_v43 = vshrl.u32 %v4684_v21, %v1932_v62  ;;  %v3584_v59 = vand.u32 2139095040, %v6934_v49 }
 0x345   : > { %v1948_v10 = vor.u32 %v1947_v42, %v1946_v7  ;;  %4575 = vcosq.f32 %v1693_v37  ;;  %v6966_v57 = vsub.s32 %v3329_v19, %v3332_v54  ;;  %vm1949_vm15 = vcmp.lt.s32.totalorder %v1930_v50, 1 }
 0x346   : > { %vm1952_vm0 = vcmp.lt.s32.totalorder %v1930_v50, 4  ;;  %4577 = vsinq.f32 %v1693_v37  ;;  %vm1950_vm1 = vcmp.lt.s32.totalorder %v1930_v50, 2  ;;  %v1957_v3 = vsel %vm1949_vm15, %v1936_v52, %v1939_v61 }
 0x347   : > { %v1954_v44 = vsel %vm1952_vm0, %v1942_v6, 2102212464  ;;  %v3335_v63 = vsub.s32 0, %v6966_v57  ;;  %v3355_v55 = vsub.s32 4, %v3331_v28  ;;  %vm1951_vm2 = vcmp.lt.s32.totalorder %v1930_v50, 3 }
 0x348   : > { %v1958_v15 = vsel %vm1952_vm0, %v1945_v22, 920167782  ;;  %v1953_v12 = vsel %vm1949_vm15, %v1933_v43, %v1936_v52  ;;  %v1961_v62 = vsel %vm1949_vm15, %v1939_v61, %v1942_v6  ;;  %v1962_v53 = vsel %vm1952_vm0, %v1948_v10, 1326507024 }
 0x349   : > { %v1959_v40 = vsel %vm1951_vm2, %v1942_v6, %v1958_v15  ;;  %v4152_v14 = vmin.u32 %v3335_v63, %v6966_v57  ;;  %v1955_v39 = vsel %vm1951_vm2, %v1939_v61, %v1954_v44  ;;  %v1963_v51 = vsel %vm1951_vm2, %v1945_v22, %v1962_v53 }
 0x34a   : > { %v1960_v1 = vsel %vm1950_vm1, %v1957_v3, %v1959_v40  ;;  %v1964_v19 = vsel %vm1950_vm1, %v1961_v62, %v1963_v51  ;;  %v3585_v2 = vshrl.u32 %v3584_v59, 23  ;;  %vm6980_vm3 = vcmp.le.f32.partialorder %v3269_v9, 0.7853982 }
 0x34b   : > { %v6973_v46 = vmul.u32.u64.low %v6959_v8, %v1960_v1  ;;  %v6974_v56 = vmul.u32.u64.high %v6959_v8, %v1960_v1, %v6973_v46  ;;  %vm3271_vm4 = vcmp.lt.s32.totalorder %v6682_v4, 0  ;;  %v3337_v30 = vclz %v4152_v14 }
 0x34c   : > { %vm1697_vm5 = vweird.f32 %v6650_v58  ;;  %v3356_v34 = vsel %vm3271_vm4, %v3355_v55, %v3331_v28  ;;  %v6989_v17 = vmul.u32.u64.low %v6959_v8, %v1964_v19  ;;  %v6990_v26 = vmul.u32.u64.high %v6959_v8, %v1964_v19, %v6989_v17 }
 0x34d   : > { %v4163_v23 = vadd.s32 4294967169, %v3585_v2  ;;  %v4153_v45 = vadd.s32 4294967294, %v3337_v30  ;;  %v1956_v32 = vsel %vm1950_vm1, %v1953_v12, %v1955_v39  ;;  %v3581_v9 = vand.u32 2147483647, %v6934_v49 }
 0x34e   : > { %v6996_v52 = vadd.f32 %v6930_v47, %v6552_v60  ;;  %vm1700_vm6 = vcmp.lt.s32.totalorder %v6937_v33, 2  ;;  %vm1701_vm7 = vcmp.eq.s32.totalorder %v6937_v33, 0  ;;  %v1975_v28 = vadd.s32 1, %v6974_v56 }
 0x34f   : > { %v3591_v24 = vadd.s32 1, %v4163_v23  ;;  %v4576_v61 = vpop.eup %4575  ;;  %vm1704_vm8 = vcmp.eq.s32.totalorder %v6937_v33, 2  ;;  %v3325_v50 = vadd.s32 %v6913_v20, %v6910_v18  ;;  %vm4154_vm10 = vcmp.lt.s32.totalorder %v4153_v45, 0 }
 0x350   : > { %v3358_v6 = vsel %vm6980_vm3, 0, %v3356_v34  ;;  %v4578_v7 = vpop.eup %4577  ;;  %v1705_v60 = vxor.u32 2147483648, %v4576_v61  ;;  %v3340_v42 = vsel %vm4154_vm10, 0, %v4153_v45  ;;  %v1972_v11 = vmul.u32 %v6959_v8, %v1956_v32 }
 0x351   : > { %vm1974_vm9 = vc.u32 %v6990_v26, %v6973_v46  ;;  %v1702_v54 = vxor.u32 2147483648, %v4578_v7  ;;  %v3341_v22 = vsub.s32 32, %v3340_v42  ;;  %v3345_v37 = vsub.s32 4294967266, %v3340_v42 }
 0x352   : > { %v3588_v43 = vand.u32 8388607, %v3581_v9  ;;  %v1706_v10 = vsel %vm1704_vm8, %v1705_v60, %v4578_v7  ;;  %v3342_v18 = vshll.u32 %v6966_v57, %v3340_v42  ;;  %v1976_v20 = vsel %vm1974_vm9, %v1975_v28, %v6974_v56 }
 0x353   : > { %vm3592_vm11 = vcmp.gt.s32.totalorder %v3591_v24, 0  ;;  %v1703_v59 = vsel %vm1701_vm7, %v4576_v61, %v1702_v54  ;;  %v3343_v44 = vshrl.u32 %v3325_v50, %v3341_v22  ;;  %v3346_v8 = vadd.s32 127, %v3345_v37 }
 0x354   : > { %v1977_v3 = vadd.s32 %v1976_v20, %v1972_v11  ;;  %v1707_v63 = vsel %vm1700_vm6, %v1703_v59, %v1706_v10  ;;  %v3362_v55 = vadd.s32 3, %v3358_v6  ;;  %v3593_v15 = vsel %vm3592_vm11, %v3591_v24, 0 }
 0x355   : > { %v1813_v12 = vand.u32 2147483647, %v6996_v52  ;;  %v1708_v40 = vsel %vm1697_vm5, nan, %v1707_v63  ;;  %v3344_v57 = vor.u32 %v3343_v44, %v3342_v18  ;;  %v3347_v62 = vshll.u32 %v3346_v8, 23 }
 0x356   : > { %v1978_v53 = vadd.s32 536870912, %v1977_v3  ;;  %3903 = vst [vmem:[%s5180_s6 + $0x50] sm:$0xff] %v1708_v40  ;;  %v3589_v14 = vor.u32 8388608, %v3588_v43  ;;  %v3595_v39 = vand.u32 31, %v3593_v15  ;;  %v7022_v19 = vand.u32 3, %v3362_v55 }
 0x357   : > { %v3348_v1 = vor.u32 4788187, %v3347_v62  ;;  %v1816_v56 = vand.u32 2139095040, %v6996_v52  ;;  %v7027_v2 = vand.u32 8388607, %v1813_v12  ;;  %v3351_v30 = vcvt.s32.f32 %v3344_v57 }
 0x358   : > { %v7020_v51 = vshrl.u32 %v1978_v53, 30  ;;  %v3596_v33 = vsub.s32 32, %v3595_v39  ;;  %v7030_v34 = vadd.s32 %v6973_v46, %v6990_v26  ;;  %v7036_v28 = vshll.u32 %v3589_v14, 8 }
 0x359   : > { %v3349_v58 = vand.u32 2147483647, %v3348_v1  ;;  %v3598_v50 = vshll.u32 %v4684_v21, %v3595_v39  ;;  %v3594_v7 = vshrl.u32 %v3593_v15, 5  ;;  %v3601_v46 = vshll.u32 %v4685_v25, %v3595_v39 }
 0x35a   : > { %v1980_v17 = vshll.u32 %v7020_v51, 30  ;;  %v3599_v23 = vshrl.u32 %v4685_v25, %v3596_v33  ;;  %v3602_v45 = vshrl.u32 %v4686_v27, %v3596_v33  ;;  %v3605_v32 = vshrl.u32 %v4687_v29, %v3596_v33 }
 0x35b   : > { %v3352_v24 = vmul.f32 %v3351_v30, %v3349_v58  ;;  %v3608_v6 = vshrl.u32 %v4688_v31, %v3596_v33  ;;  %v3604_v26 = vshll.u32 %v4686_v27, %v3595_v39  ;;  %v1817_v60 = vshrl.u32 %v1816_v56, 23 }
 0x35c   : > { %v7038_v61 = vsub.s32 %v1977_v3, %v1980_v17  ;;  %v3600_v54 = vor.u32 %v3599_v23, %v3598_v50  ;;  %v3607_v22 = vshll.u32 %v4687_v29, %v3595_v39  ;;  %v3603_v37 = vor.u32 %v3602_v45, %v3601_v46 }
 0x35d   : > { %v3353_v42 = vxor.u32 2147483648, %v3352_v24  ;;  %v3606_v43 = vor.u32 %v3605_v32, %v3604_v26  ;;  %v3610_v10 = vshll.u32 %v4688_v31, %v3595_v39  ;;  %v3611_v18 = vshrl.u32 %v4689_v38, %v3596_v33 }
 0x35e   : > { %v1983_v11 = vsub.s32 0, %v7038_v61  ;;  %v3609_v44 = vor.u32 %v3608_v6, %v3607_v22  ;;  %v1821_v8 = vor.u32 8388608, %v7027_v2  ;;  %v3597_v63 = vshrl.u32 %v4684_v21, %v3596_v33 }
 0x35f   : > { %v3354_v20 = vsel %vm3271_vm4, %v3353_v42, %v3352_v24  ;;  %v3612_v55 = vor.u32 %v3611_v18, %v3610_v10  ;;  %v4095_v15 = vadd.s32 4294967169, %v1817_v60  ;;  %vm3613_vm12 = vcmp.lt.s32.totalorder %v3594_v7, 1 }
 0x360   : > { %v4100_v59 = vmin.u32 %v1983_v11, %v7038_v61  ;;  %v3357_v3 = vsel %vm6980_vm3, %v6682_v4, %v3354_v20  ;;  %vm3616_vm13 = vcmp.lt.s32.totalorder %v3594_v7, 4  ;;  %vm1919_vm14 = vcmp.lt.s32.totalorder %v6816_v48, 0 }
 0x361   : > { %4579 = vcosq.f32 %v3357_v3  ;;  %vm3614_vm15 = vcmp.lt.s32.totalorder %v3594_v7, 2  ;;  %v3618_v57 = vsel %vm3616_vm13, %v3606_v43, 2102212464  ;;  %v3621_v62 = vsel %vm3613_vm12, %v3600_v54, %v3603_v37 }
 0x362   : > { %v1985_v40 = vclz %v4100_v59  ;;  %4581 = vsinq.f32 %v3357_v3  ;;  %vm3615_vm0 = vcmp.lt.s32.totalorder %v3594_v7, 3  ;;  %v3622_v14 = vsel %vm3616_vm13, %v3609_v44, 920167782 }
 0x363   : > { %v3625_v39 = vsel %vm3613_vm12, %v3603_v37, %v3606_v43  ;;  %v3617_v5 = vsel %vm3613_vm12, %v3597_v63, %v3600_v54  ;;  %v3623_v1 = vsel %vm3615_vm0, %v3606_v43, %v3622_v14  ;;  %v3626_v56 = vsel %vm3616_vm13, %v3612_v55, 1326507024 }
 0x364   : > { %v4101_v53 = vadd.s32 4294967294, %v1985_v40  ;;  %v1823_v33 = vadd.s32 1, %v4095_v15  ;;  %v3619_v2 = vsel %vm3615_vm0, %v3603_v37, %v3618_v57  ;;  %v3624_v58 = vsel %vm3614_vm15, %v3621_v62, %v3623_v1 }
 0x365   : > { %v3627_v30 = vsel %vm3615_vm0, %v3609_v44, %v3626_v56  ;;  %v7060_v45 = vmul.u32.u64.low %v7036_v28, %v3624_v58  ;;  %v7061_v32 = vmul.u32.u64.high %v7036_v28, %v3624_v58, %v7060_v45  ;;  %v2003_v6 = vsub.s32 4, %v7020_v51 }
 0x366   : > { %vm4102_vm1 = vcmp.lt.s32.totalorder %v4101_v53, 0  ;;  %v3628_v23 = vsel %vm3614_vm15, %v3625_v39, %v3627_v30  ;;  %vm1824_vm2 = vcmp.gt.s32.totalorder %v1823_v33, 0  ;;  %vm3361_vm3 = vweird.f32 %v6682_v4 }
 0x367   : > { %v1988_v17 = vsel %vm4102_vm1, 0, %v4101_v53  ;;  %v3620_v46 = vsel %vm3614_vm15, %v3617_v5, %v3619_v2  ;;  %v7068_v26 = vmul.u32.u64.low %v7036_v28, %v3628_v23  ;;  %v7069_v60 = vmul.u32.u64.high %v7036_v28, %v3628_v23, %v7068_v26 }
 0x368   : > { %v1989_v24 = vsub.s32 32, %v1988_v17  ;;  %v1993_v50 = vsub.s32 4294967266, %v1988_v17  ;;  %v1825_v42 = vsel %vm1824_vm2, %v1823_v33, 0  ;;  %v1990_v11 = vshll.u32 %v7038_v61, %v1988_v17 }
 0x369   : > { %v1827_v37 = vand.u32 31, %v1825_v42  ;;  %vm3364_vm4 = vcmp.lt.s32.totalorder %v7022_v19, 2  ;;  %vm3365_vm5 = vcmp.eq.s32.totalorder %v7022_v19, 0  ;;  %vm7077_vm6 = vcmp.le.f32.partialorder %v1917_v13, 0.7853982 }
 0x36a   : > { %v1991_v54 = vshrl.u32 %v7030_v34, %v1989_v24  ;;  %v1994_v22 = vadd.s32 127, %v1993_v50  ;;  %v3639_v43 = vadd.s32 1, %v7061_v32  ;;  %vm3368_vm7 = vcmp.eq.s32.totalorder %v7022_v19, 2 }
 0x36b   : > { %v4580_v10 = vpop.eup %4579  ;;  %v2004_v34 = vsel %vm1919_vm14, %v2003_v6, %v7020_v51  ;;  %v3636_v44 = vmul.u32 %v7036_v28, %v3620_v46  ;;  %vm3638_vm8 = vc.u32 %v7069_v60, %v7060_v45  ;;  %v1828_v13 = vsub.s32 32, %v1827_v37 }
 0x36c   : > { %v1992_v61 = vor.u32 %v1991_v54, %v1990_v11  ;;  %v1995_v18 = vshll.u32 %v1994_v22, 23  ;;  %v4582_v20 = vpop.eup %4581  ;;  %v3369_v59 = vxor.u32 2147483648, %v4580_v10  ;;  %v3640_v55 = vsel %vm3638_vm8, %v3639_v43, %v7061_v32 }
 0x36d   : > { %v3366_v3 = vxor.u32 2147483648, %v4582_v20  ;;  %v7090_v15 = vshll.u32 %v1821_v8, 8  ;;  %v2006_v57 = vsel %vm7077_vm6, 0, %v2004_v34  ;;  %v3641_v51 = vadd.s32 %v3640_v55, %v3636_v44 }
 0x36e   : > { %v1996_v63 = vor.u32 4788187, %v1995_v18  ;;  %v3370_v40 = vsel %vm3368_vm7, %v3369_v59, %v4582_v20  ;;  %v7096_v62 = vadd.f32 %v6930_v47, %v6635_v41  ;;  %v1999_v14 = vcvt.s32.f32 %v1992_v61 }
 0x36f   : > { %v3367_v28 = vsel %vm3365_vm5, %v4580_v10, %v3366_v3  ;;  %v7100_v39 = vshrl.u32 %v1825_v42, 5  ;;  %v3642_v5 = vadd.s32 536870912, %v3641_v51  ;;  %v1831_v1 = vshrl.u32 %v4685_v25, %v1828_v13 }
 0x370   : > { %v1997_v53 = vand.u32 2147483647, %v1996_v63  ;;  %v3371_v8 = vsel %vm3364_vm4, %v3367_v28, %v3370_v40  ;;  %v1834_v56 = vshrl.u32 %v4686_v27, %v1828_v13  ;;  %v1830_v2 = vshll.u32 %v4684_v21, %v1827_v37 }
 0x371   : > { %v3372_v33 = vsel %vm3361_vm3, nan, %v3371_v8  ;;  %v1837_v58 = vshrl.u32 %v4687_v29, %v1828_v13  ;;  %v3643_v30 = vshrl.u32 %v3642_v5, 30  ;;  %v1833_v17 = vshll.u32 %v4685_v25, %v1827_v37 }
 0x372   : > { %v2000_v41 = vmul.f32 %v1999_v14, %v1997_v53  ;;  %3919 = vst [vmem:[%s5180_s6 + $0xd0] sm:$0xff] %v3372_v33  ;;  %v1836_v19 = vshll.u32 %v4686_v27, %v1827_v37  ;;  %v1840_v23 = vshrl.u32 %v4688_v31, %v1828_v13  ;;  %v1839_v24 = vshll.u32 %v4687_v29, %v1827_v37 }
 0x373   : > { %v1842_v50 = vshll.u32 %v4688_v31, %v1827_v37  ;;  %v1843_v4 = vshrl.u32 %v4689_v38, %v1828_v13  ;;  %v2010_v6 = vadd.s32 3, %v2006_v57  ;;  %v3644_v46 = vshll.u32 %v3643_v30, 30 }
 0x374   : > { %v2001_v32 = vxor.u32 2147483648, %v2000_v41  ;;  %v1832_v26 = vor.u32 %v1831_v1, %v1830_v2  ;;  %v1835_v42 = vor.u32 %v1834_v56, %v1833_v17  ;;  %v1838_v54 = vor.u32 %v1837_v58, %v1836_v19 }
 0x375   : > { %v1841_v22 = vor.u32 %v1840_v23, %v1839_v24  ;;  %v1844_v43 = vor.u32 %v1843_v4, %v1842_v50  ;;  %v7122_v61 = vsub.s32 %v3641_v51, %v3644_v46  ;;  %v1829_v37 = vshrl.u32 %v4684_v21, %v1828_v13 }
 0x376   : > { %v2002_v11 = vsel %vm1919_vm14, %v2001_v32, %v2000_v41  ;;  %v3480_v18 = vand.u32 2139095040, %v7096_v62  ;;  %vm1845_vm10 = vcmp.lt.s32.totalorder %v7100_v39, 1  ;;  %vm1846_vm9 = vcmp.lt.s32.totalorder %v7100_v39, 2 }
 0x377   : > { %v2005_v10 = vsel %vm7077_vm6, %v6816_v48, %v2002_v11  ;;  %vm1847_vm11 = vcmp.lt.s32.totalorder %v7100_v39, 3  ;;  %v3647_v34 = vsub.s32 0, %v7122_v61  ;;  %vm1848_vm12 = vcmp.lt.s32.totalorder %v7100_v39, 4 }
 0x378   : > { %4583 = vcosq.f32 %v2005_v10  ;;  %v1853_v7 = vsel %vm1845_vm10, %v1832_v26, %v1835_v42  ;;  %v1850_v20 = vsel %vm1848_vm12, %v1838_v54, 2102212464  ;;  %v1854_v59 = vsel %vm1848_vm12, %v1841_v22, 920167782 }
 0x379   : > { %4585 = vsinq.f32 %v2005_v10  ;;  %v1857_v44 = vsel %vm1845_vm10, %v1835_v42, %v1838_v54  ;;  %v1858_v13 = vsel %vm1848_vm12, %v1844_v43, 1326507024  ;;  %v4164_v3 = vmin.u32 %v3647_v34, %v7122_v61 }
 0x37a   : > { %v3667_v63 = vsub.s32 4, %v3643_v30  ;;  %v1855_v55 = vsel %vm1847_vm11, %v1838_v54, %v1854_v59  ;;  %v1859_v40 = vsel %vm1847_vm11, %v1841_v22, %v1858_v13  ;;  %v2011_v57 = vand.u32 3, %v2010_v6 }
 0x37b   : > { %v1856_v51 = vsel %vm1846_vm9, %v1853_v7, %v1855_v55  ;;  %v1860_v28 = vsel %vm1846_vm9, %v1857_v44, %v1859_v40  ;;  %v3481_v53 = vshrl.u32 %v3480_v18, 23  ;;  %vm3583_vm13 = vcmp.lt.s32.totalorder %v6934_v49, 0 }
 0x37c   : > { %v3649_v14 = vclz %v4164_v3  ;;  %v1849_v8 = vsel %vm1845_vm10, %v1829_v37, %v1832_v26  ;;  %v1851_v5 = vsel %vm1847_vm11, %v1835_v42, %v1850_v20  ;;  %vm2009_vm14 = vweird.f32 %v6816_v48 }
 0x37d   : > { %v7150_v1 = vmul.u32.u64.low %v7090_v15, %v1860_v28  ;;  %v7151_v56 = vmul.u32.u64.high %v7090_v15, %v1860_v28, %v7150_v1  ;;  %v7154_v33 = vmul.u32.u64.low %v7090_v15, %v1856_v51  ;;  %v7155_v41 = vmul.u32.u64.high %v7090_v15, %v1856_v51, %v7154_v33 }
 0x37e   : > { %vm7161_vm15 = vcmp.le.f32.partialorder %v3581_v9, 0.7853982  ;;  %v4165_v58 = vadd.s32 4294967294, %v3649_v14  ;;  %v3668_v17 = vsel %vm3583_vm13, %v3667_v63, %v3643_v30  ;;  %v4159_v19 = vadd.s32 4294967169, %v3481_v53 }
 0x37f   : > { %vm2012_vm0 = vcmp.lt.s32.totalorder %v2011_v57, 2  ;;  %vm2013_vm1 = vcmp.eq.s32.totalorder %v2011_v57, 0  ;;  %vm2016_vm2 = vcmp.eq.s32.totalorder %v2011_v57, 2  ;;  %v1852_v23 = vsel %vm1846_vm9, %v1849_v8, %v1851_v5 }
 0x380   : > { %v3637_v32 = vadd.s32 %v7060_v45, %v7069_v60  ;;  %vm4166_vm3 = vcmp.lt.s32.totalorder %v4165_v58, 0  ;;  %v3477_v9 = vand.u32 2147483647, %v7096_v62  ;;  %v3487_v24 = vadd.s32 1, %v4159_v19 }
 0x381   : > { %v3652_v4 = vsel %vm4166_vm3, 0, %v4165_v58  ;;  %v3670_v6 = vsel %vm7161_vm15, 0, %v3668_v17  ;;  %vm1870_vm4 = vc.u32 %v7151_v56, %v7154_v33  ;;  %v1871_v30 = vadd.s32 1, %v7155_v41 }
 0x382   : > { %v4584_v50 = vpop.eup %4583  ;;  %v3653_v26 = vsub.s32 32, %v3652_v4  ;;  %v3657_v42 = vsub.s32 4294967266, %v3652_v4  ;;  %v1868_v45 = vmul.u32 %v7090_v15, %v1852_v23  ;;  %v3654_v11 = vshll.u32 %v7122_v61, %v3652_v4 }
 0x383   : > { %v4586_v46 = vpop.eup %4585  ;;  %v2017_v39 = vxor.u32 2147483648, %v4584_v50  ;;  %v1872_v54 = vsel %vm1870_vm4, %v1871_v30, %v7155_v41  ;;  %vm3488_vm5 = vcmp.gt.s32.totalorder %v3487_v24, 0  ;;  %v3674_v34 = vadd.s32 3, %v3670_v6 }
 0x384   : > { %v2014_v60 = vxor.u32 2147483648, %v4586_v46  ;;  %v3655_v43 = vshrl.u32 %v3637_v32, %v3653_v26  ;;  %v3658_v10 = vadd.s32 127, %v3657_v42  ;;  %v1873_v37 = vadd.s32 %v1872_v54, %v1868_v45 }
 0x385   : > { %v2018_v22 = vsel %vm2016_vm2, %v2017_v39, %v4586_v46  ;;  %v3484_v7 = vand.u32 8388607, %v3477_v9  ;;  %v3489_v20 = vsel %vm3488_vm5, %v3487_v24, 0  ;;  %v7190_v14 = vand.u32 3, %v3674_v34 }
 0x386   : > { %v2015_v18 = vsel %vm2013_vm1, %v4584_v50, %v2014_v60  ;;  %v3656_v59 = vor.u32 %v3655_v43, %v3654_v11  ;;  %v3659_v61 = vshll.u32 %v3658_v10, 23  ;;  %v1874_v44 = vadd.s32 536870912, %v1873_v37 }
 0x387   : > { %v2019_v15 = vsel %vm2012_vm0, %v2015_v18, %v2018_v22  ;;  %v3491_v3 = vand.u32 31, %v3489_v20  ;;  %v3485_v40 = vor.u32 8388608, %v3484_v7  ;;  %v7198_v1 = vadd.f32 %v6930_v47, %v6745_v35 }
 0x388   : > { %v2020_v13 = vsel %vm2009_vm14, nan, %v2019_v15  ;;  %v3660_v63 = vor.u32 4788187, %v3659_v61  ;;  %v7188_v55 = vshrl.u32 %v1874_v44, 30  ;;  %v3663_v53 = vcvt.s32.f32 %v3656_v59 }
 0x389   : > { %3906 = vst [vmem:[%s5180_s6 + $0x68] sm:$0xff] %v2020_v13  ;;  %v3492_v51 = vsub.s32 32, %v3491_v3  ;;  %v3494_v17 = vshll.u32 %v4684_v21, %v3491_v3  ;;  %v3490_v23 = vshrl.u32 %v3489_v20, 5  ;;  %v3497_v32 = vshll.u32 %v4685_v25, %v3491_v3 }
 0x38a   : > { %v3661_v28 = vand.u32 2147483647, %v3660_v63  ;;  %v1876_v57 = vshll.u32 %v7188_v55, 30  ;;  %v3500_v24 = vshll.u32 %v4686_v27, %v3491_v3  ;;  %v7206_v50 = vshll.u32 %v3485_v40, 8 }
 0x38b   : > { %v3495_v8 = vshrl.u32 %v4685_v25, %v3492_v51  ;;  %v3498_v5 = vshrl.u32 %v4686_v27, %v3492_v51  ;;  %v3501_v48 = vshrl.u32 %v4687_v29, %v3492_v51  ;;  %v3504_v19 = vshrl.u32 %v4688_v31, %v3492_v51 }
 0x38c   : > { %v3664_v41 = vmul.f32 %v3663_v53, %v3661_v28  ;;  %v7200_v58 = vsub.s32 %v1873_v37, %v1876_v57  ;;  %v3503_v35 = vshll.u32 %v4687_v29, %v3491_v3  ;;  %v3506_v26 = vshll.u32 %v4688_v31, %v3491_v3 }
 0x38d   : > { %v3496_v30 = vor.u32 %v3495_v8, %v3494_v17  ;;  %v3499_v46 = vor.u32 %v3498_v5, %v3497_v32  ;;  %v3502_v39 = vor.u32 %v3501_v48, %v3500_v24  ;;  %v3507_v42 = vshrl.u32 %v4689_v38, %v3492_v51 }
 0x38e   : > { %v3665_v4 = vxor.u32 2147483648, %v3664_v41  ;;  %v1879_v6 = vsub.s32 0, %v7200_v58  ;;  %v3505_v11 = vor.u32 %v3504_v19, %v3503_v35  ;;  %v2128_v54 = vand.u32 2139095040, %v7198_v1 }
 0x38f   : > { %v1899_v43 = vsub.s32 4, %v7188_v55  ;;  %v3493_v10 = vshrl.u32 %v4684_v21, %v3492_v51  ;;  %v3508_v37 = vor.u32 %v3507_v42, %v3506_v26  ;;  %vm1815_vm6 = vcmp.lt.s32.totalorder %v6996_v52, 0 }
 0x390   : > { %v3666_v45 = vsel %vm3583_vm13, %v3665_v4, %v3664_v41  ;;  %v4096_v60 = vmin.u32 %v1879_v6, %v7200_v58  ;;  %vm3509_vm7 = vcmp.lt.s32.totalorder %v3490_v23, 1  ;;  %vm3512_vm8 = vcmp.lt.s32.totalorder %v3490_v23, 4 }
 0x391   : > { %v3669_v22 = vsel %vm7161_vm15, %v6934_v49, %v3666_v45  ;;  %vm3510_vm10 = vcmp.lt.s32.totalorder %v3490_v23, 2  ;;  %v3514_v34 = vsel %vm3512_vm8, %v3502_v39, 2102212464  ;;  %v3517_v7 = vsel %vm3509_vm7, %v3496_v30, %v3499_v46 }
 0x392   : > { %4587 = vcosq.f32 %v3669_v22  ;;  %v1881_v18 = vclz %v4096_v60  ;;  %vm3511_vm9 = vcmp.lt.s32.totalorder %v3490_v23, 3  ;;  %v3518_v15 = vsel %vm3512_vm8, %v3505_v11, 920167782 }
 0x393   : > { %4589 = vsinq.f32 %v3669_v22  ;;  %v3521_v2 = vsel %vm3509_vm7, %v3499_v46, %v3502_v39  ;;  %vm7224_vm11 = vcmp.le.f32.partialorder %v1813_v12, 0.7853982  ;;  %v3513_v61 = vsel %vm3509_vm7, %v3493_v10, %v3496_v30 }
 0x394   : > { %v4097_v20 = vadd.s32 4294967294, %v1881_v18  ;;  %v3519_v44 = vsel %vm3511_vm9, %v3502_v39, %v3518_v15  ;;  %v3522_v13 = vsel %vm3512_vm8, %v3508_v37, 1326507024  ;;  %v2129_v3 = vshrl.u32 %v2128_v54, 23 }
 0x395   : > { %v3515_v63 = vsel %vm3511_vm9, %v3499_v46, %v3514_v34  ;;  %v3520_v40 = vsel %vm3510_vm10, %v3517_v7, %v3519_v44  ;;  %v3523_v51 = vsel %vm3511_vm9, %v3505_v11, %v3522_v13  ;;  %vm3676_vm13 = vcmp.lt.s32.totalorder %v7190_v14, 2 }
 0x396   : > { %vm4098_vm12 = vcmp.lt.s32.totalorder %v4097_v20, 0  ;;  %v3524_v53 = vsel %vm3510_vm10, %v3521_v2, %v3523_v51  ;;  %v7231_v57 = vmul.u32.u64.low %v7206_v50, %v3520_v40  ;;  %v7232_v8 = vmul.u32.u64.high %v7206_v50, %v3520_v40, %v7231_v57 }
 0x397   : > { %v1884_v28 = vsel %vm4098_vm12, 0, %v4097_v20  ;;  %v1869_v12 = vadd.s32 %v7154_v33, %v7151_v56  ;;  %v4107_v41 = vadd.s32 4294967169, %v2129_v3  ;;  %vm3673_vm14 = vweird.f32 %v6934_v49 }
 0x398   : > { %v1885_v5 = vsub.s32 32, %v1884_v28  ;;  %v1889_v48 = vsub.s32 4294967266, %v1884_v28  ;;  %vm3677_vm15 = vcmp.eq.s32.totalorder %v7190_v14, 0  ;;  %v3516_v17 = vsel %vm3510_vm10, %v3513_v61, %v3515_v63 }
 0x399   : > { %v7242_v19 = vmul.u32.u64.low %v7206_v50, %v3524_v53  ;;  %v7243_v32 = vmul.u32.u64.high %v7206_v50, %v3524_v53, %v7242_v19  ;;  %v1886_v24 = vshll.u32 %v7200_v58, %v1884_v28  ;;  %v2135_v30 = vadd.s32 1, %v4107_v41 }
 0x39a   : > { %v1887_v4 = vshrl.u32 %v1869_v12, %v1885_v5  ;;  %v1890_v6 = vadd.s32 127, %v1889_v48  ;;  %vm3680_vm0 = vcmp.eq.s32.totalorder %v7190_v14, 2  ;;  %v1900_v56 = vsel %vm1815_vm6, %v1899_v43, %v7188_v55 }
 0x39b   : > { %v3535_v33 = vadd.s32 1, %v7232_v8  ;;  %v7253_v23 = vadd.f32 %v6930_v47, %v6818_v36  ;;  %v2125_v58 = vand.u32 2147483647, %v7198_v1  ;;  %vm2136_vm1 = vcmp.gt.s32.totalorder %v2135_v30, 0 }
 0x39c   : > { %v4588_v35 = vpop.eup %4587  ;;  %v1888_v46 = vor.u32 %v1887_v4, %v1886_v24  ;;  %v1891_v39 = vshll.u32 %v1890_v6, 23  ;;  %v3532_v45 = vmul.u32 %v7206_v50, %v3516_v17  ;;  %vm3534_vm2 = vc.u32 %v7243_v32, %v7231_v57 }
 0x39d   : > { %v4590_v26 = vpop.eup %4589  ;;  %v3681_v42 = vxor.u32 2147483648, %v4588_v35  ;;  %v2137_v55 = vsel %vm2136_vm1, %v2135_v30, 0  ;;  %v1902_v36 = vsel %vm7224_vm11, 0, %v1900_v56  ;;  %v3536_v54 = vsel %vm3534_vm2, %v3535_v33, %v7232_v8 }
 0x39e   : > { %v3678_v60 = vxor.u32 2147483648, %v4590_v26  ;;  %v1892_v11 = vor.u32 4788187, %v1891_v39  ;;  %v3537_v43 = vadd.s32 %v3536_v54, %v3532_v45  ;;  %v2139_v10 = vand.u32 31, %v2137_v55 }
 0x39f   : > { %v3682_v22 = vsel %vm3680_vm0, %v3681_v42, %v4590_v26  ;;  %v7266_v50 = vadd.f32 %v6930_v47, %v6900_v16  ;;  %v1895_v34 = vcvt.s32.f32 %v1888_v46  ;;  %v2132_v7 = vand.u32 8388607, %v2125_v58 }
 0x3a0   : > { %v3679_v37 = vsel %vm3677_vm15, %v4588_v35, %v3678_v60  ;;  %v1893_v18 = vand.u32 2147483647, %v1892_v11  ;;  %v1906_v15 = vadd.s32 3, %v1902_v36  ;;  %v3538_v2 = vadd.s32 536870912, %v3537_v43 }
 0x3a1   : > { %v3683_v20 = vsel %vm3676_vm13, %v3679_v37, %v3682_v22  ;;  %v2140_v61 = vsub.s32 32, %v2139_v10  ;;  %v2142_v16 = vshll.u32 %v4684_v21, %v2139_v10  ;;  %v2145_v47 = vshll.u32 %v4685_v25, %v2139_v10 }
 0x3a2   : > { %v3684_v44 = vsel %vm3673_vm14, nan, %v3683_v20  ;;  %v1896_v13 = vmul.f32 %v1895_v34, %v1893_v18  ;;  %v7279_v3 = vshrl.u32 %v3538_v2, 30  ;;  %v2148_v14 = vshll.u32 %v4686_v27, %v2139_v10 }
 0x3a3   : > { %3922 = vst [vmem:[%s5180_s6 + $0xe8] sm:$0xff] %v3684_v44  ;;  %v2143_v63 = vshrl.u32 %v4685_v25, %v2140_v61  ;;  %v2146_v40 = vshrl.u32 %v4686_v27, %v2140_v61  ;;  %v2149_v28 = vshrl.u32 %v4687_v29, %v2140_v61  ;;  %v2151_v49 = vshll.u32 %v4687_v29, %v2139_v10 }
 0x3a4   : > { %v1897_v51 = vxor.u32 2147483648, %v1896_v13  ;;  %v2152_v53 = vshrl.u32 %v4688_v31, %v2140_v61  ;;  %v3540_v8 = vshll.u32 %v7279_v3, 30  ;;  %v2138_v12 = vshrl.u32 %v2137_v55, 5 }
 0x3a5   : > { %v2144_v5 = vor.u32 %v2143_v63, %v2142_v16  ;;  %v3792_v48 = vand.u32 2139095040, %v7253_v23  ;;  %v2147_v17 = vor.u32 %v2146_v40, %v2145_v47  ;;  %v2150_v19 = vor.u32 %v2149_v28, %v2148_v14 }
 0x3a6   : > { %v1898_v41 = vsel %vm1815_vm6, %v1897_v51, %v1896_v13  ;;  %v2153_v24 = vor.u32 %v2152_v53, %v2151_v49  ;;  %v7294_v6 = vsub.s32 %v3537_v43, %v3540_v8  ;;  %v2154_v30 = vshll.u32 %v4688_v31, %v2139_v10 }
 0x3a7   : > { %v1901_v4 = vsel %vm7224_vm11, %v6996_v52, %v1898_v41  ;;  %v2155_v56 = vshrl.u32 %v4689_v38, %v2140_v61  ;;  %v7298_v33 = vand.u32 3, %v1906_v15  ;;  %v2133_v35 = vor.u32 8388608, %v2132_v7 }
 0x3a8   : > { %4591 = vcosq.f32 %v1901_v4  ;;  %v3789_v46 = vand.u32 2147483647, %v7253_v23  ;;  %vm3479_vm3 = vcmp.lt.s32.totalorder %v7096_v62, 0  ;;  %v3543_v39 = vsub.s32 0, %v7294_v6 }
 0x3a9   : > { %4593 = vsinq.f32 %v1901_v4  ;;  %v2156_v26 = vor.u32 %v2155_v56, %v2154_v30  ;;  %v3793_v59 = vshrl.u32 %v3792_v48, 23  ;;  %v2141_v42 = vshrl.u32 %v4684_v21, %v2140_v61 }
 0x3aa   : > { %vm2157_vm4 = vcmp.lt.s32.totalorder %v2138_v12, 1  ;;  %vm2159_vm5 = vcmp.lt.s32.totalorder %v2138_v12, 3  ;;  %vm2160_vm6 = vcmp.lt.s32.totalorder %v2138_v12, 4  ;;  %v4160_v45 = vmin.u32 %v3543_v39, %v7294_v6 }
 0x3ab   : > { %v2162_v55 = vsel %vm2160_vm6, %v2150_v19, 2102212464  ;;  %v2165_v60 = vsel %vm2157_vm4, %v2144_v5, %v2147_v17  ;;  %v2166_v11 = vsel %vm2160_vm6, %v2153_v24, 920167782  ;;  %v2169_v54 = vsel %vm2157_vm4, %v2147_v17, %v2150_v19 }
 0x3ac   : > { %v2167_v36 = vsel %vm2159_vm5, %v2150_v19, %v2166_v11  ;;  %v2170_v22 = vsel %vm2160_vm6, %v2156_v26, 1326507024  ;;  %v2173_v43 = vshll.u32 %v2133_v35, 8  ;;  %vm7308_vm7 = vcmp.le.f32.partialorder %v3477_v9, 0.7853982 }
 0x3ad   : > { %v3545_v37 = vclz %v4160_v45  ;;  %vm2158_vm8 = vcmp.lt.s32.totalorder %v2138_v12, 2  ;;  %v2161_v18 = vsel %vm2157_vm4, %v2141_v42, %v2144_v5  ;;  %v2163_v34 = vsel %vm2159_vm5, %v2147_v17, %v2162_v55 }
 0x3ae   : > { %v3563_v7 = vsub.s32 4, %v7279_v3  ;;  %v2168_v20 = vsel %vm2158_vm8, %v2165_v60, %v2167_v36  ;;  %v2171_v15 = vsel %vm2159_vm5, %v2153_v24, %v2170_v22  ;;  %v4171_v2 = vadd.s32 4294967169, %v3793_v59 }
 0x3af   : > { %vm1905_vm10 = vweird.f32 %v6996_v52  ;;  %v4161_v61 = vadd.s32 4294967294, %v3545_v37  ;;  %v2172_v44 = vsel %vm2158_vm8, %v2169_v54, %v2171_v15  ;;  %vm1908_vm9 = vcmp.lt.s32.totalorder %v7298_v33, 2 }
 0x3b0   : > { %v7316_v13 = vmul.u32.u64.low %v2173_v43, %v2168_v20  ;;  %v7317_v9 = vmul.u32.u64.high %v2173_v43, %v2168_v20, %v7316_v13  ;;  %v2164_v16 = vsel %vm2158_vm8, %v2161_v18, %v2163_v34  ;;  %vm1909_vm11 = vcmp.eq.s32.totalorder %v7298_v33, 0 }
 0x3b1   : > { %v7321_v47 = vmul.u32.u64.low %v2173_v43, %v2172_v44  ;;  %v7322_v63 = vmul.u32.u64.high %v2173_v43, %v2172_v44, %v7321_v47  ;;  %vm1912_vm12 = vcmp.eq.s32.totalorder %v7298_v33, 2  ;;  %vm4162_vm13 = vcmp.lt.s32.totalorder %v4161_v61, 0 }
 0x3b2   : > { %v3799_v40 = vadd.s32 1, %v4171_v2  ;;  %v4592_v14 = vpop.eup %4591  ;;  %v3533_v51 = vadd.s32 %v7231_v57, %v7243_v32  ;;  %v3548_v28 = vsel %vm4162_vm13, 0, %v4161_v61  ;;  %v3564_v49 = vsel %vm3479_vm3, %v3563_v7, %v7279_v3 }
 0x3b3   : > { %v3796_v53 = vand.u32 8388607, %v3789_v46  ;;  %v4594_v8 = vpop.eup %4593  ;;  %v1913_v12 = vxor.u32 2147483648, %v4592_v14  ;;  %v3549_v5 = vsub.s32 32, %v3548_v28  ;;  %v3553_v48 = vsub.s32 4294967266, %v3548_v28 }
 0x3b4   : > { %v2180_v41 = vmul.u32 %v2173_v43, %v2164_v16  ;;  %v1910_v17 = vxor.u32 2147483648, %v4594_v8  ;;  %v3550_v19 = vshll.u32 %v7294_v6, %v3548_v28  ;;  %vm2182_vm14 = vc.u32 %v7322_v63, %v7316_v13 }
 0x3b5   : > { %v2183_v57 = vadd.s32 1, %v7317_v9  ;;  %v1914_v32 = vsel %vm1912_vm12, %v1913_v12, %v4594_v8  ;;  %v3551_v3 = vshrl.u32 %v3533_v51, %v3549_v5  ;;  %v3554_v24 = vadd.s32 127, %v3553_v48 }
 0x3b6   : > { %vm3800_vm15 = vcmp.gt.s32.totalorder %v3799_v40, 0  ;;  %v1911_v4 = vsel %vm1909_vm11, %v4592_v14, %v1910_v17  ;;  %v3566_v30 = vsel %vm7308_vm7, 0, %v3564_v49  ;;  %v3797_v36 = vor.u32 8388608, %v3796_v53 }
 0x3b7   : > { %v2184_v6 = vsel %vm2182_vm14, %v2183_v57, %v7317_v9  ;;  %v3801_v56 = vsel %vm3800_vm15, %v3799_v40, 0  ;;  %v1915_v35 = vsel %vm1908_vm9, %v1911_v4, %v1914_v32  ;;  %v3552_v39 = vor.u32 %v3551_v3, %v3550_v19 }
 0x3b8   : > { %v3555_v26 = vshll.u32 %v3554_v24, 23  ;;  %v2185_v59 = vadd.s32 %v2184_v6, %v2180_v41  ;;  %v1916_v42 = vsel %vm1905_vm10, nan, %v1915_v35  ;;  %v3803_v45 = vand.u32 31, %v3801_v56 }
 0x3b9   : > { %3905 = vst [vmem:[%s5180_s6 + $0x60] sm:$0xff] %v1916_v42  ;;  %v3570_v11 = vadd.s32 3, %v3566_v30  ;;  %v3559_v43 = vcvt.s32.f32 %v3552_v39  ;;  %v2024_v33 = vand.u32 2139095040, %v7266_v50  ;;  %v3802_v18 = vshrl.u32 %v3801_v56, 5 }
 0x3ba   : > { %v3556_v55 = vor.u32 4788187, %v3555_v26  ;;  %v2186_v60 = vadd.s32 536870912, %v2185_v59  ;;  %v3804_v54 = vsub.s32 32, %v3803_v45  ;;  %v3812_v2 = vshll.u32 %v4686_v27, %v3803_v45 }
 0x3bb   : > { %v3806_v44 = vshll.u32 %v4684_v21, %v3803_v45  ;;  %v3809_v9 = vshll.u32 %v4685_v25, %v3803_v45  ;;  %v3815_v16 = vshll.u32 %v4687_v29, %v3803_v45  ;;  %v7362_v14 = vand.u32 3, %v3570_v11 }
 0x3bc   : > { %v3557_v22 = vand.u32 2147483647, %v3556_v55  ;;  %v7349_v37 = vshrl.u32 %v2186_v60, 30  ;;  %v3807_v34 = vshrl.u32 %v4685_v25, %v3804_v54  ;;  %v3810_v7 = vshrl.u32 %v4686_v27, %v3804_v54 }
 0x3bd   : > { %v3813_v52 = vshrl.u32 %v4687_v29, %v3804_v54  ;;  %v3816_v61 = vshrl.u32 %v4688_v31, %v3804_v54  ;;  %v3819_v47 = vshrl.u32 %v4689_v38, %v3804_v54  ;;  %v3818_v12 = vshll.u32 %v4688_v31, %v3803_v45 }
 0x3be   : > { %v3560_v20 = vmul.f32 %v3559_v43, %v3557_v22  ;;  %v2188_v15 = vshll.u32 %v7349_v37, 30  ;;  %v3808_v49 = vor.u32 %v3807_v34, %v3806_v44  ;;  %v3811_v53 = vor.u32 %v3810_v7, %v3809_v9 }
 0x3bf   : > { %v3814_v28 = vor.u32 %v3813_v52, %v3812_v2  ;;  %v3817_v8 = vor.u32 %v3816_v61, %v3815_v16  ;;  %v3837_v41 = vshll.u32 %v3797_v36, 8  ;;  %v2025_v17 = vshrl.u32 %v2024_v33, 23 }
 0x3c0   : > { %v3561_v40 = vxor.u32 2147483648, %v3560_v20  ;;  %v7364_v51 = vsub.s32 %v2185_v59, %v2188_v15  ;;  %v3805_v57 = vshrl.u32 %v4684_v21, %v3804_v54  ;;  %v3820_v32 = vor.u32 %v3819_v47, %v3818_v12 }
 0x3c1   : > { %vm3824_vm0 = vcmp.lt.s32.totalorder %v3802_v18, 4  ;;  %vm3821_vm1 = vcmp.lt.s32.totalorder %v3802_v18, 1  ;;  %vm3823_vm2 = vcmp.lt.s32.totalorder %v3802_v18, 3  ;;  %v4103_v59 = vadd.s32 4294967169, %v2025_v17 }
 0x3c2   : > { %v3562_v5 = vsel %vm3479_vm3, %v3561_v40, %v3560_v20  ;;  %v2191_v48 = vsub.s32 0, %v7364_v51  ;;  %v3826_v24 = vsel %vm3824_vm0, %v3814_v28, 2102212464  ;;  %v3829_v4 = vsel %vm3821_vm1, %v3808_v49, %v3811_v53 }
 0x3c3   : > { %v3565_v19 = vsel %vm7308_vm7, %v7096_v62, %v3562_v5  ;;  %v3830_v30 = vsel %vm3824_vm0, %v3817_v8, 920167782  ;;  %v3825_v56 = vsel %vm3821_vm1, %v3805_v57, %v3808_v49  ;;  %v3827_v35 = vsel %vm3823_vm2, %v3811_v53, %v3826_v24 }
 0x3c4   : > { %4595 = vcosq.f32 %v3565_v19  ;;  %v4108_v3 = vmin.u32 %v2191_v48, %v7364_v51  ;;  %v3833_v39 = vsel %vm3821_vm1, %v3811_v53, %v3814_v28  ;;  %vm3822_vm3 = vcmp.lt.s32.totalorder %v3802_v18, 2 }
 0x3c5   : > { %4597 = vsinq.f32 %v3565_v19  ;;  %v3831_v10 = vsel %vm3823_vm2, %v3814_v28, %v3830_v30  ;;  %v3834_v26 = vsel %vm3824_vm0, %v3820_v32, 1326507024  ;;  %v2021_v60 = vand.u32 2147483647, %v7266_v50 }
 0x3c6   : > { %v2193_v6 = vclz %v4108_v3  ;;  %v3832_v45 = vsel %vm3822_vm3, %v3829_v4, %v3831_v10  ;;  %v3835_v55 = vsel %vm3823_vm2, %v3817_v8, %v3834_v26  ;;  %v3828_v11 = vsel %vm3822_vm3, %v3825_v56, %v3827_v35 }
 0x3c7   : > { %v3836_v36 = vsel %vm3822_vm3, %v3833_v39, %v3835_v55  ;;  %v7376_v54 = vmul.u32.u64.low %v3837_v41, %v3832_v45  ;;  %v7377_v22 = vmul.u32.u64.high %v3837_v41, %v3832_v45, %v7376_v54  ;;  %v2031_v34 = vadd.s32 1, %v4103_v59 }
 0x3c8   : > { %v4109_v42 = vadd.s32 4294967294, %v2193_v6  ;;  %v7380_v43 = vmul.u32.u64.low %v3837_v41, %v3836_v36  ;;  %v7381_v33 = vmul.u32.u64.high %v3837_v41, %v3836_v36, %v7380_v43  ;;  %vm3576_vm5 = vcmp.eq.s32.totalorder %v7362_v14, 2 }
 0x3c9   : > { %vm2127_vm6 = vcmp.lt.s32.totalorder %v7198_v1, 0  ;;  %v2211_v7 = vsub.s32 4, %v7349_v37  ;;  %v2181_v52 = vadd.s32 %v7316_v13, %v7322_v63  ;;  %vm2032_vm7 = vcmp.gt.s32.totalorder %v2031_v34, 0 }
 0x3ca   : > { %vm4110_vm4 = vcmp.lt.s32.totalorder %v4109_v42, 0  ;;  %v3844_v2 = vmul.u32 %v3837_v41, %v3828_v11  ;;  %v3847_v61 = vadd.s32 1, %v7377_v22  ;;  %v2028_v44 = vand.u32 8388607, %v2021_v60 }
 0x3cb   : > { %v2196_v18 = vsel %vm4110_vm4, 0, %v4109_v42  ;;  %v2033_v9 = vsel %vm2032_vm7, %v2031_v34, 0  ;;  %vm3846_vm8 = vc.u32 %v7381_v33, %v7376_v54  ;;  %v2212_v63 = vsel %vm2127_vm6, %v2211_v7, %v7349_v37 }
 0x3cc   : > { %v2197_v20 = vsub.s32 32, %v2196_v18  ;;  %v2201_v15 = vsub.s32 4294967266, %v2196_v18  ;;  %v2198_v47 = vshll.u32 %v7364_v51, %v2196_v18  ;;  %v3848_v53 = vsel %vm3846_vm8, %v3847_v61, %v7377_v22  ;;  %v4619_v18 = vld [vmem:[%s7596_s2] ss:$0 sm:$0xff] }
 0x3cd   : > { %v2035_v8 = vand.u32 31, %v2033_v9  ;;  %v3849_v41 = vadd.s32 %v3848_v53, %v3844_v2  ;;  %vm3573_vm10 = vcmp.eq.s32.totalorder %v7362_v14, 0  ;;  %vm7403_vm9 = vcmp.le.f32.partialorder %v2125_v58, 0.7853982 }
 0x3ce   : > { %v4596_v16 = vpop.eup %4595  ;;  %v2199_v40 = vshrl.u32 %v2181_v52, %v2197_v20  ;;  %v2202_v28 = vadd.s32 127, %v2201_v15  ;;  %vm3572_vm11 = vcmp.lt.s32.totalorder %v7362_v14, 2  ;;  %vm3569_vm12 = vweird.f32 %v7096_v62 }
 0x3cf   : > { %v4598_v49 = vpop.eup %4597  ;;  %v3577_v13 = vxor.u32 2147483648, %v4596_v16  ;;  %v2036_v37 = vsub.s32 32, %v2035_v8  ;;  %v3850_v32 = vadd.s32 536870912, %v3849_v41  ;;  %v2214_v24 = vsel %vm7403_vm9, 0, %v2212_v63 }
 0x3d0   : > { %v3574_v12 = vxor.u32 2147483648, %v4598_v49  ;;  %v2200_v5 = vor.u32 %v2199_v40, %v2198_v47  ;;  %v2203_v48 = vshll.u32 %v2202_v28, 23  ;;  %v2029_v4 = vor.u32 8388608, %v2028_v44 }
 0x3d1   : > { %v3578_v51 = vsel %vm3576_vm5, %v3577_v13, %v4598_v49  ;;  %v7411_v58 = vshrl.u32 %v3850_v32, 30  ;;  %v2034_v35 = vshrl.u32 %v2033_v9, 5  ;;  %v2039_v39 = vshrl.u32 %v4685_v25, %v2036_v37 }
 0x3d2   : > { %v3575_v19 = vsel %vm3573_vm10, %v4596_v16, %v3574_v12  ;;  %v2204_v57 = vor.u32 4788187, %v2203_v48  ;;  %v2207_v56 = vcvt.s32.f32 %v2200_v5  ;;  %v2042_v14 = vshrl.u32 %v4686_v27, %v2036_v37 }
 0x3d3   : > { %v3579_v3 = vsel %vm3572_vm11, %v3575_v19, %v3578_v51  ;;  %v2045_v10 = vshrl.u32 %v4687_v29, %v2036_v37  ;;  %v3852_v62 = vshll.u32 %v7411_v58, 30  ;;  %v2044_v59 = vshll.u32 %v4686_v27, %v2035_v8 }
 0x3d4   : > { %v3580_v30 = vsel %vm3569_vm12, nan, %v3579_v3  ;;  %v2205_v6 = vand.u32 2147483647, %v2204_v57  ;;  %v2048_v42 = vshrl.u32 %v4688_v31, %v2036_v37  ;;  %v2038_v45 = vshll.u32 %v4684_v21, %v2035_v8 }
 0x3d5   : > { %3921 = vst [vmem:[%s5180_s6 + $0xe0] sm:$0xff] %v3580_v30  ;;  %v2041_v55 = vshll.u32 %v4685_v25, %v2035_v8  ;;  %v2047_v11 = vshll.u32 %v4687_v29, %v2035_v8  ;;  %v2051_v36 = vshrl.u32 %v4689_v38, %v2036_v37  ;;  %v7424_v43 = vsub.s32 %v3849_v41, %v3852_v62 }
 0x3d6   : > { %v2208_v26 = vmul.f32 %v2207_v56, %v2205_v6  ;;  %v2046_v34 = vor.u32 %v2045_v10, %v2044_v59  ;;  %v7430_v7 = vadd.f32 %v4619_v18, %v6976_v0  ;;  %v2040_v52 = vor.u32 %v2039_v39, %v2038_v45 }
 0x3d7   : > { %v2043_v20 = vor.u32 %v2042_v14, %v2041_v55  ;;  %v2049_v15 = vor.u32 %v2048_v42, %v2047_v11  ;;  %v2050_v2 = vshll.u32 %v4688_v31, %v2035_v8  ;;  %v2218_v44 = vadd.s32 3, %v2214_v24 }
 0x3d8   : > { %v2209_v22 = vxor.u32 2147483648, %v2208_v26  ;;  %v3855_v9 = vsub.s32 0, %v7424_v43  ;;  %v2069_v16 = vshll.u32 %v2029_v4, 8  ;;  %v2037_v40 = vshrl.u32 %v4684_v21, %v2036_v37 }
 0x3d9   : > { %v2052_v0 = vor.u32 %v2051_v36, %v2050_v2  ;;  %vm2056_vm13 = vcmp.lt.s32.totalorder %v2034_v35, 4  ;;  %vm2053_vm14 = vcmp.lt.s32.totalorder %v2034_v35, 1  ;;  %vm2054_vm15 = vcmp.lt.s32.totalorder %v2034_v35, 2 }
 0x3da   : > { %v2210_v61 = vsel %vm2127_vm6, %v2209_v22, %v2208_v26  ;;  %v4172_v28 = vmin.u32 %v3855_v9, %v7424_v43  ;;  %v2058_v49 = vsel %vm2056_vm13, %v2046_v34, 2102212464  ;;  %v2061_v13 = vsel %vm2053_vm14, %v2040_v52, %v2043_v20 }
 0x3db   : > { %v2213_v47 = vsel %vm7403_vm9, %v7198_v1, %v2210_v61  ;;  %v2062_v63 = vsel %vm2056_vm13, %v2049_v15, 920167782  ;;  %vm2055_vm0 = vcmp.lt.s32.totalorder %v2034_v35, 3  ;;  %v2057_v8 = vsel %vm2053_vm14, %v2037_v40, %v2040_v52 }
 0x3dc   : > { %4599 = vcosq.f32 %v2213_v47  ;;  %v3857_v53 = vclz %v4172_v28  ;;  %v2065_v12 = vsel %vm2053_vm14, %v2043_v20, %v2046_v34  ;;  %v2059_v5 = vsel %vm2055_vm0, %v2043_v20, %v2058_v49 }
 0x3dd   : > { %4601 = vsinq.f32 %v2213_v47  ;;  %v2063_v48 = vsel %vm2055_vm0, %v2046_v34, %v2062_v63  ;;  %v2066_v41 = vsel %vm2056_vm13, %v2052_v0, 1326507024  ;;  %v3688_v51 = vand.u32 2139095040, %v7430_v7 }
 0x3de   : > { %v2219_v17 = vand.u32 3, %v2218_v44  ;;  %v4173_v37 = vadd.s32 4294967294, %v3857_v53  ;;  %v2064_v19 = vsel %vm2054_vm15, %v2061_v13, %v2063_v48  ;;  %v2067_v57 = vsel %vm2055_vm0, %v2049_v15, %v2066_v41 }
 0x3df   : > { %v2068_v32 = vsel %vm2054_vm15, %v2065_v12, %v2067_v57  ;;  %v7444_v3 = vmul.u32.u64.low %v2069_v16, %v2064_v19  ;;  %v7445_v24 = vmul.u32.u64.high %v2069_v16, %v2064_v19, %v7444_v3  ;;  %v3689_v4 = vshrl.u32 %v3688_v51, 23 }
 0x3e0   : > { %vm4174_vm1 = vcmp.lt.s32.totalorder %v4173_v37, 0  ;;  %v2060_v30 = vsel %vm2054_vm15, %v2057_v8, %v2059_v5  ;;  %v7449_v6 = vmul.u32.u64.low %v2069_v16, %v2068_v32  ;;  %v7450_v56 = vmul.u32.u64.high %v2069_v16, %v2068_v32, %v7449_v6 }
 0x3e1   : > { %v3860_v39 = vsel %vm4174_vm1, 0, %v4173_v37  ;;  %v4167_v14 = vadd.s32 4294967169, %v3689_v4  ;;  %vm3791_vm2 = vcmp.lt.s32.totalorder %v7253_v23, 0  ;;  %v3845_v10 = vadd.s32 %v7376_v54, %v7381_v33 }
 0x3e2   : > { %v3861_v26 = vsub.s32 32, %v3860_v39  ;;  %v3865_v62 = vsub.s32 4294967266, %v3860_v39  ;;  %vm2224_vm3 = vcmp.eq.s32.totalorder %v2219_v17, 2  ;;  %v2076_v59 = vmul.u32 %v2069_v16, %v2060_v30 }
 0x3e3   : > { %v2079_v42 = vadd.s32 1, %v7445_v24  ;;  %v3695_v45 = vadd.s32 1, %v4167_v14  ;;  %v3862_v35 = vshll.u32 %v7424_v43, %v3860_v39  ;;  %vm2078_vm4 = vc.u32 %v7450_v56, %v7444_v3 }
 0x3e4   : > { %v3863_v11 = vshrl.u32 %v3845_v10, %v3861_v26  ;;  %v3866_v36 = vadd.s32 127, %v3865_v62  ;;  %v3875_v18 = vsub.s32 4, %v7411_v58  ;;  %vm2221_vm6 = vcmp.eq.s32.totalorder %v2219_v17, 0 }
 0x3e5   : > { %v2080_v54 = vsel %vm2078_vm4, %v2079_v42, %v7445_v24  ;;  %vm3696_vm5 = vcmp.gt.s32.totalorder %v3695_v45, 0  ;;  %v3685_v2 = vand.u32 2147483647, %v7430_v7  ;;  %vm2220_vm7 = vcmp.lt.s32.totalorder %v2219_v17, 2 }
 0x3e6   : > { %v4600_v55 = vpop.eup %4599  ;;  %v3864_v52 = vor.u32 %v3863_v11, %v3862_v35  ;;  %v3867_v20 = vshll.u32 %v3866_v36, 23  ;;  %v2081_v15 = vadd.s32 %v2080_v54, %v2076_v59  ;;  %v3697_v61 = vsel %vm3696_vm5, %v3695_v45, 0 }
 0x3e7   : > { %v4602_v22 = vpop.eup %4601  ;;  %v2225_v34 = vxor.u32 2147483648, %v4600_v55  ;;  %vm2217_vm8 = vweird.f32 %v7198_v1  ;;  %v3876_v40 = vsel %vm3791_vm2, %v3875_v18, %v7411_v58  ;;  %v3699_v0 = vand.u32 31, %v3697_v61 }
 0x3e8   : > { %v2222_v33 = vxor.u32 2147483648, %v4602_v22  ;;  %v3868_v9 = vor.u32 4788187, %v3867_v20  ;;  %v2082_v16 = vadd.s32 536870912, %v2081_v15  ;;  %v3871_v13 = vcvt.s32.f32 %v3864_v52 }
 0x3e9   : > { %v2226_v43 = vsel %vm2224_vm3, %v2225_v34, %v4602_v22  ;;  %vm7472_vm10 = vcmp.le.f32.partialorder %v3789_v46, 0.7853982  ;;  %v3692_v1 = vand.u32 8388607, %v3685_v2  ;;  %v3700_v8 = vsub.s32 32, %v3699_v0 }
 0x3ea   : > { %v2223_v44 = vsel %vm2221_vm6, %v4600_v55, %v2222_v33  ;;  %v3869_v49 = vand.u32 2147483647, %v3868_v9  ;;  %v7467_v63 = vshrl.u32 %v2082_v16, 30  ;;  %v3878_v58 = vsel %vm7472_vm10, 0, %v3876_v40 }
 0x3eb   : > { %v2227_v47 = vsel %vm2220_vm7, %v2223_v44, %v2226_v43  ;;  %v3702_v48 = vshll.u32 %v4684_v21, %v3699_v0  ;;  %v3703_v41 = vshrl.u32 %v4685_v25, %v3700_v8  ;;  %v3705_v51 = vshll.u32 %v4685_v25, %v3699_v0 }
 0x3ec   : > { %v2228_v28 = vsel %vm2217_vm8, nan, %v2227_v47  ;;  %v3872_v12 = vmul.f32 %v3871_v13, %v3869_v49  ;;  %v2084_v5 = vshll.u32 %v7467_v63, 30  ;;  %v3706_v46 = vshrl.u32 %v4686_v27, %v3700_v8 }
 0x3ed   : > { %3908 = vst [vmem:[%s5180_s6 + $0x78] sm:$0xff] %v2228_v28  ;;  %v3709_v17 = vshrl.u32 %v4687_v29, %v3700_v8  ;;  %v3708_v57 = vshll.u32 %v4686_v27, %v3699_v0  ;;  %v3712_v32 = vshrl.u32 %v4688_v31, %v3700_v8  ;;  %v3693_v24 = vor.u32 8388608, %v3692_v1 }
 0x3ee   : > { %v3873_v37 = vxor.u32 2147483648, %v3872_v12  ;;  %v2085_v19 = vsub.s32 %v2081_v15, %v2084_v5  ;;  %v3698_v4 = vshrl.u32 %v3697_v61, 5  ;;  %v3704_v30 = vor.u32 %v3703_v41, %v3702_v48 }
 0x3ef   : > { %v3711_v6 = vshll.u32 %v4687_v29, %v3699_v0  ;;  %v3707_v25 = vor.u32 %v3706_v46, %v3705_v51  ;;  %v3710_v10 = vor.u32 %v3709_v17, %v3708_v57  ;;  %v3714_v27 = vshll.u32 %v4688_v31, %v3699_v0 }
 0x3f0   : > { %v3874_v39 = vsel %vm3791_vm2, %v3873_v37, %v3872_v12  ;;  %v2087_v14 = vsub.s32 0, %v2085_v19  ;;  %v3715_v59 = vshrl.u32 %v4689_v38, %v3700_v8  ;;  %v3882_v45 = vadd.s32 3, %v3878_v58 }
 0x3f1   : > { %v3877_v26 = vsel %vm7472_vm10, %v7253_v23, %v3874_v39  ;;  %v3713_v62 = vor.u32 %v3712_v32, %v3711_v6  ;;  %v3733_v55 = vshll.u32 %v3693_v24, 8  ;;  %v3701_v11 = vshrl.u32 %v4684_v21, %v3700_v8 }
 0x3f2   : > { %4603 = vcosq.f32 %v3877_v26  ;;  %v4104_v42 = vmin.u32 %v2087_v14, %v2085_v19  ;;  %v3716_v29 = vor.u32 %v3715_v59, %v3714_v27  ;;  %vm3717_vm9 = vcmp.lt.s32.totalorder %v3698_v4, 1 }
 0x3f3   : > { %4605 = vsinq.f32 %v3877_v26  ;;  %vm3720_vm11 = vcmp.lt.s32.totalorder %v3698_v4, 4  ;;  %vm3719_vm12 = vcmp.lt.s32.totalorder %v3698_v4, 3  ;;  %v3725_v22 = vsel %vm3717_vm9, %v3704_v30, %v3707_v25 }
 0x3f4   : > { %v2089_v35 = vclz %v4104_v42  ;;  %v3722_v36 = vsel %vm3720_vm11, %v3710_v10, 2102212464  ;;  %v3726_v34 = vsel %vm3720_vm11, %v3713_v62, 920167782  ;;  %vm3718_vm13 = vcmp.lt.s32.totalorder %v3698_v4, 2 }
 0x3f5   : > { %v3727_v31 = vsel %vm3719_vm12, %v3710_v10, %v3726_v34  ;;  %v3729_v54 = vsel %vm3717_vm9, %v3707_v25, %v3710_v10  ;;  %v3721_v38 = vsel %vm3717_vm9, %v3701_v11, %v3704_v30  ;;  %v3723_v33 = vsel %vm3719_vm12, %v3707_v25, %v3722_v36 }
 0x3f6   : > { %v4105_v18 = vadd.s32 4294967294, %v2089_v35  ;;  %v3728_v52 = vsel %vm3718_vm13, %v3725_v22, %v3727_v31  ;;  %v3730_v20 = vsel %vm3720_vm11, %v3716_v29, 1326507024  ;;  %v3883_v9 = vand.u32 3, %v3882_v45 }
 0x3f7   : > { %v3731_v15 = vsel %vm3719_vm12, %v3713_v62, %v3730_v20  ;;  %v7498_v43 = vmul.u32.u64.low %v3733_v55, %v3728_v52  ;;  %v7499_v61 = vmul.u32.u64.high %v3733_v55, %v3728_v52, %v7498_v43  ;;  %v2077_v16 = vadd.s32 %v7444_v3, %v7450_v56 }
 0x3f8   : > { %vm4106_vm14 = vcmp.lt.s32.totalorder %v4105_v18, 0  ;;  %v3732_v44 = vsel %vm3718_vm13, %v3729_v54, %v3731_v15  ;;  %v3724_v0 = vsel %vm3718_vm13, %v3721_v38, %v3723_v33  ;;  %vm3888_vm15 = vcmp.eq.s32.totalorder %v3883_v9, 2 }
 0x3f9   : > { %v2092_v21 = vsel %vm4106_vm14, 0, %v4105_v18  ;;  %v7506_v28 = vmul.u32.u64.low %v3733_v55, %v3732_v44  ;;  %v7507_v49 = vmul.u32.u64.high %v3733_v55, %v3732_v44, %v7506_v28  ;;  %v3743_v12 = vadd.s32 1, %v7499_v61 }
 0x3fa   : > { %v2093_v47 = vsub.s32 32, %v2092_v21  ;;  %v2097_v40 = vsub.s32 4294967266, %v2092_v21  ;;  %v2094_v53 = vshll.u32 %v2085_v19, %v2092_v21  ;;  %vm3885_vm0 = vcmp.eq.s32.totalorder %v3883_v9, 0 }
 0x3fb   : > { %v3740_v51 = vmul.u32 %v3733_v55, %v3724_v0  ;;  %vm3742_vm1 = vc.u32 %v7507_v49, %v7498_v43  ;;  %vm3884_vm2 = vcmp.lt.s32.totalorder %v3883_v9, 2  ;;  %vm3881_vm3 = vweird.f32 %v7253_v23 }
 0x3fc   : > { %v4604_v13 = vpop.eup %4603  ;;  %v2095_v1 = vshrl.u32 %v2077_v16, %v2093_v47  ;;  %v2098_v8 = vadd.s32 127, %v2097_v40  ;;  %v3744_v37 = vsel %vm3742_vm1, %v3743_v12, %v7499_v61  ;;  %v2107_v39 = vsub.s32 4, %v7467_v63 }
 0x3fd   : > { %v4606_v58 = vpop.eup %4605  ;;  %v3889_v5 = vxor.u32 2147483648, %v4604_v13  ;;  %v3745_v57 = vadd.s32 %v3744_v37, %v3740_v51  ;;  %vm2023_vm4 = vcmp.lt.s32.totalorder %v7266_v50, 0  ;;  %vm2022_vm5 = vcmp.le.f32.partialorder %v2021_v60, 0.7853982 }
 0x3fe   : > { %v3886_v48 = vxor.u32 2147483648, %v4606_v58  ;;  %v2096_v41 = vor.u32 %v2095_v1, %v2094_v53  ;;  %v2099_v3 = vshll.u32 %v2098_v8, 23  ;;  %v2108_v23 = vsel %vm2023_vm4, %v2107_v39, %v7467_v63 }
 0x3ff   : > { %v3890_v56 = vsel %vm3888_vm15, %v3889_v5, %v4606_v58  ;;  %v3746_v30 = vadd.s32 536870912, %v3745_v57  ;;  %v2110_v59 = vsel %vm2022_vm5, 0, %v2108_v23  ;;  %v3741_v63 = vadd.s32 %v7498_v43, %v7507_v49 }
 0x400   : > { %v3887_v46 = vsel %vm3885_vm0, %v4604_v13, %v3886_v48  ;;  %v2100_v17 = vor.u32 4788187, %v2099_v3  ;;  %v2103_v4 = vcvt.s32.f32 %v2096_v41  ;;  %v2114_v29 = vadd.s32 3, %v2110_v59 }
 0x401   : > { %v3891_v19 = vsel %vm3884_vm2, %v3887_v46, %v3890_v56  ;;  %v3747_v14 = vshrl.u32 %v3746_v30, 30  ;;  %vm2113_vm9 = vweird.f32 %v7266_v50  ;;  %vm3687_vm11 = vcmp.lt.s32.totalorder %v7430_v7, 0 }
 0x402   : > { %v3892_v32 = vsel %vm3881_vm3, nan, %v3891_v19  ;;  %v2101_v24 = vand.u32 2147483647, %v2100_v17  ;;  %v2115_v11 = vand.u32 3, %v2114_v29  ;;  %vm3686_vm12 = vcmp.le.f32.partialorder %v3685_v2, 0.7853982 }
 0x403   : > { %3924 = vst [vmem:[%s5180_s6 + $0xf8] sm:$0xff] %v3892_v32  ;;  %v3748_v10 = vshll.u32 %v3747_v14, 30  ;;  %v3771_v0 = vsub.s32 4, %v3747_v14  ;;  %vm3777_vm0 = vweird.f32 %v7430_v7 }
 0x404   : > { %v2104_v6 = vmul.f32 %v2103_v4, %v2101_v24  ;;  %vm2117_vm7 = vcmp.eq.s32.totalorder %v2115_v11, 0  ;;  %vm2120_vm8 = vcmp.eq.s32.totalorder %v2115_v11, 2  ;;  %vm2116_vm10 = vcmp.lt.s32.totalorder %v2115_v11, 2 }
 0x405   : > { %v3749_v27 = vsub.s32 %v3745_v57, %v3748_v10  ;;  %v3772_v13 = vsel %vm3687_vm11, %v3771_v0, %v3747_v14 }
 0x406   : > { %v2105_v25 = vxor.u32 2147483648, %v2104_v6  ;;  %v3774_v53 = vsel %vm3686_vm12, 0, %v3772_v13 }
 0x407   : > { %v3751_v42 = vsub.s32 0, %v3749_v27  ;;  %v3778_v1 = vadd.s32 3, %v3774_v53 }
 0x408   : > { %v2106_v26 = vsel %vm2023_vm4, %v2105_v25, %v2104_v6 }
 0x409   : > { %v2109_v62 = vsel %vm2022_vm5, %v7266_v50, %v2106_v26  ;;  %v4168_v45 = vmin.u32 %v3751_v42, %v3749_v27  ;;  %v3779_v8 = vand.u32 3, %v3778_v1 }
 0x40a   : > { %4607 = vcosq.f32 %v2109_v62 }
 0x40b   : > { %4609 = vsinq.f32 %v2109_v62  ;;  %v3753_v55 = vclz %v4168_v45  ;;  %vm3784_vm13 = vcmp.eq.s32.totalorder %v3779_v8, 2  ;;  %vm3781_vm14 = vcmp.eq.s32.totalorder %v3779_v8, 0 }
 0x40c   : > { %vm3780_vm15 = vcmp.lt.s32.totalorder %v3779_v8, 2 }
 0x40d   : > { %v4169_v35 = vadd.s32 4294967294, %v3753_v55 }
 0x40f   : > { %vm4170_vm6 = vcmp.lt.s32.totalorder %v4169_v35, 0 }
 0x410   : > { %v3756_v22 = vsel %vm4170_vm6, 0, %v4169_v35 }
 0x411   : > { %v3757_v18 = vsub.s32 32, %v3756_v22  ;;  %v3761_v31 = vsub.s32 4294967266, %v3756_v22  ;;  %v3758_v33 = vshll.u32 %v3749_v27, %v3756_v22 }
 0x413   : > { %v3759_v52 = vshrl.u32 %v3741_v63, %v3757_v18  ;;  %v3762_v20 = vadd.s32 127, %v3761_v31 }
 0x414   : > { %v4608_v36 = vpop.eup %4607 }
 0x415   : > { %v4610_v34 = vpop.eup %4609  ;;  %v2121_v60 = vxor.u32 2147483648, %v4608_v36  ;;  %v3760_v21 = vor.u32 %v3759_v52, %v3758_v33  ;;  %v3763_v44 = vshll.u32 %v3762_v20, 23 }
 0x416   : > { %v2118_v54 = vxor.u32 2147483648, %v4610_v34 }
 0x417   : > { %v2122_v38 = vsel %vm2120_vm8, %v2121_v60, %v4610_v34  ;;  %v3764_v43 = vor.u32 4788187, %v3763_v44  ;;  %v3767_v47 = vcvt.s32.f32 %v3760_v21 }
 0x418   : > { %v2119_v15 = vsel %vm2117_vm7, %v4608_v36, %v2118_v54 }
 0x419   : > { %v2123_v61 = vsel %vm2116_vm10, %v2119_v15, %v2122_v38  ;;  %v3765_v16 = vand.u32 2147483647, %v3764_v43 }
 0x41a   : > { %v2124_v9 = vsel %vm2113_vm9, nan, %v2123_v61 }
 0x41b   : > { %3907 = vst [vmem:[%s5180_s6 + $0x70] sm:$0xff] %v2124_v9  ;;  %v3768_v40 = vmul.f32 %v3767_v47, %v3765_v16 }
 0x41d   : > { %v3769_v28 = vxor.u32 2147483648, %v3768_v40 }
 0x41f   : > { %v3770_v49 = vsel %vm3687_vm11, %v3769_v28, %v3768_v40 }
 0x420   : > { %v3773_v50 = vsel %vm3686_vm12, %v7430_v7, %v3770_v49 }
 0x421   : > { %4611 = vcosq.f32 %v3773_v50 }
 0x422   : > { %4613 = vsinq.f32 %v3773_v50 }
 0x42b   : > { %v4612_v12 = vpop.eup %4611 }
 0x42c   : > { %v4614_v58 = vpop.eup %4613  ;;  %v3785_v5 = vxor.u32 2147483648, %v4612_v12  ;;  %3932 = sbr.rel (!%p4751_p5) target bundleno = 1103 (0x44f), region = 36 }
 0x42d   : > { %v3782_v48 = vxor.u32 2147483648, %v4614_v58 }
 0x42e   : > { %v3786_v41 = vsel %vm3784_vm13, %v3785_v5, %v4614_v58 }
 0x42f   : > { %v3783_v2 = vsel %vm3781_vm14, %v4612_v12, %v3782_v48 }
 0x430   : > { %v3787_v3 = vsel %vm3780_vm15, %v3783_v2, %v3786_v41 }
 0x431   : > { %v3788_v56 = vsel %vm3777_vm0, nan, %v3787_v3 }
 0x432   : > { %3923 = vst [vmem:[%s5180_s6 + $0xf0] sm:$0xff] %v3788_v56 }
 0x433   : > { %s7665_s27 = smov (!%p3935_p11, %s3934_s27), 32 }
 0x434   : > { %s7538_s29 = sshll.u32 %s7665_s27, 7 }
 0x435   : > { %s3939_s4 = ssub.s32 4096, %s7538_s29 }
 0x436   : > { %3940 = vsyncadd %s7533_s26, %s3939_s4  ;;  %p4178_p12 = scmp.ne.s32.totalorder %s7538_s29, 0  ;;  %s4184_s28 = sshll.u32 %s4734_s16, 12 }
 0x437   : > { %s7547_s7 = scalar_lea.hbm %s7597_s3, %s4184_s28  ;;  %s3945_s30 = sshll.u32 %s5180_s6, 4  ;;  %s7550_s30 = int_to_ptr.vmem [resolvable:$true] %s3945_s30 }
 0x438   : > { %s4620_s8 = scalar_lea.vmem %s7550_s30, %s7538_s29  ;;  %s4690_s9 = smov [#allocation2]  }
 0x439   : > { %p4621_p13 = scmp.ne.s32.totalorder %s7550_s30, %s4620_s8  ;;  %s4624_s10 = sshll.u32 %s4690_s9, 4  ;;  %s4625_s10 = int_to_ptr.vmem [resolvable:$false] %s4624_s10 }
 0x43a   : > { %s4626_s16 = scalar_lea.vmem %s4625_s10, 8192  ;;  %p4627_p2 = scmp.lt.s32.totalorder %s7550_s30, %s4625_s10 }
 0x43b   : > { %p4622_p0 = pnand %p4621_p13, %p4178_p12  ;;  %p4628_p3 = scmp.lt.s32.totalorder %s4626_s16, %s4620_s8 }
 0x43d   : > { %p4623_p1 = pneg %p4622_p0  ;;  %p4629_p4 = por %p4628_p3, %p4627_p2 }
 0x43f   : > { %p4630_p5 = pnand %p4629_p4, %p4623_p1 }
 0x441   : > { %4633 = shalt.err (!%p4630_p5)
}
 0x442   : > { %s4634_s6 = scalar_lea.hbm %s7547_s7, %s7538_s29  ;;  %s4638_s19 = scalar_lea.hbm %s7597_s3, 16000 }
 0x443   : > { %p4635_p7 = scmp.ne.s32.totalorder %s7547_s7, %s4634_s6  ;;  %p4639_p10 = scmp.lt.u32.totalorder %s7547_s7, %s7597_s3 }
 0x444   : > { %p4640_p11 = scmp.lt.u32.totalorder %s4638_s19, %s4634_s6  ;;  %p4642_p0 = scmp.lt.u32.totalorder %s4634_s6, %s7547_s7 }
 0x445   : > { %p4636_p8 = pnand %p4635_p7, %p4178_p12 }
 0x446   : > { %p4641_p13 = por %p4640_p11, %p4639_p10 }
 0x447   : > { %p4637_p9 = pneg %p4636_p8 }
 0x448   : > { %p4643_p1 = por %p4642_p0, %p4641_p13 }
 0x44a   : > { %p4644_p2 = pnand %p4643_p1, %p4637_p9 }
 0x44c   : > { %4647 = shalt.err (!%p4644_p2)
}
 0x44d   : > { %s4691_s25 = smov 128   ;;  %s4692_s27 = smov 8  }
 0x44e   : > { %3951 = dma.vmem_to_hbm [thread:$0]  (%p4178_p12), %s7550_s30, %s7538_s29, %s7547_s7, %s7533_s26, %s4691_s25, %s4691_s25, %s4692_s27  }
 0x44f PF: > { %p4446_p3 = scmp.ge.s32.totalorder %s4682_s15, 2  ;;  %s3960_s4 = sand.u32 1, %s4670_s12  }
 0x450   : > { %s3961_s28 = scalar_lea.sflag [#allocation3], %s3960_s4 }
 0x451   : > { %p4443_p4 = pnand %p4446_p3, %p4755_p6 }
 0x453   : > { %4665 = dma.done.wait (!%p4443_p4), %s3961_s28, 4096  }
 0x454   : > { %4667 = vsyncadd (!%p4443_p4), %s3961_s28, 4294963200  ;;  %p13_p5 = scmp.ge.s32.totalorder %s4738_s18, 6   ;;  %s7660_s12 = smov %s4674_s13 }
 0x455   : > { %s7661_s13 = smov %s4678_s14  ;;  %s7662_s14 = smov %s4749_s21 }
 0x456   : > { %s7663_s15 = smov %s4738_s18  ;;  %15 = sbr.rel (!%p13_p5) target bundleno = 3 (0x3), region = 67 }
 0x45d   :  { %3966 = vsyncpa [#allocation3], 1 }
 0x45e   :  { %3968 = vsyncpa [#allocation3 + $0x1], 1 }

</bundles_post_ra>
